<compile_context>
chip_gen: v5e
topology: v5e:2x2
jax: 0.10.0
libtpu: 0.0.40
codegen_flags: <defaults>
</compile_context>

<pallas_src>
import numpy as np
import jax
import jax.numpy as jnp
from jax.experimental import pallas as pl
from jax.experimental.pallas import tpu as pltpu

SEGMENT_SIZE = 500
BATCH = 2

# ------------------------------ static layer geometry ----------------------------- #
L0 = SEGMENT_SIZE                               # 500
L1 = (L0 + 2 * 1 - 3) // 3 + 1                  # 167  Conv1d(1,16,3,stride=3,pad=1)
L1P = (L1 - 2) // 2 + 1                         # 83   MaxPool1d(2,stride=2)
L2 = (L1P + 2 * 1 - 3) // 2 + 1                 # 42   Conv1d(16,8,3,stride=2,pad=1)
L2P = (L2 - 2) // 1 + 1                         # 41   MaxPool1d(2,stride=1)
L3 = (L2P - 1) * 2 + 3                          # 83   ConvTranspose1d(8,16,3,stride=2)
L4 = (L3 - 1) * 3 - 2 * 1 + 5                   # 249  ConvTranspose1d(16,8,5,stride=3,pad=1)
L5 = (L4 - 1) * 2 - 2 * 1 + 1                   # 495  ConvTranspose1d(8,1,1,stride=2,pad=1)
assert L5 == 495, L5                            # must match Linear(495, segment_size)


# ------------------------------ selection-matrix builders -------------------------- #
def _conv_selectors(lin, lout, k_size, stride, pad):
    """G[k, j, i] = 1  iff  j == i*stride + k - pad  (zero-padding folded in)."""
    g = np.zeros((k_size, lin, lout), np.float32)
    for k in range(k_size):
        for i in range(lout):
            j = i * stride + k - pad
            if 0 <= j < lin:
                g[k, j, i] = 1.0
    return g


def _deconv_selectors(lin, lout, k_size, stride, pad):
    """G[k, i, j] = 1  iff  j == i*stride + k - pad  (PyTorch ConvTranspose1d scatter)."""
    g = np.zeros((k_size, lin, lout), np.float32)
    for k in range(k_size):
        for i in range(lin):
            j = i * stride + k - pad
            if 0 <= j < lout:
                g[k, i, j] = 1.0
    return g


def _pool_selectors(lin, lout, stride):
    """A/B select left/right element of each kernel=2 pooling window."""
    p = np.zeros((2, lin, lout), np.float32)
    for i in range(lout):
        p[0, i * stride, i] = 1.0
        p[1, i * stride + 1, i] = 1.0
    return p


# ----------------------------------- fused kernel ---------------------------------- #
def _autoencoder_kernel(x_ref,
                        w1_ref, b1_ref, g1_ref, p1_ref,
                        w2_ref, b2_ref, g2_ref, p2_ref,
                        w3_ref, b3_ref, g3_ref,
                        w4_ref, b4_ref, g4_ref,
                        w5_ref, b5_ref, g5_ref,
                        lwt_ref, lb_ref,
                        o_ref):
    f32 = jnp.float32

    def conv(h, w_ref, g_ref, b_ref, relu):
        # h: (Cin, Lin); w_ref: (K, Cout, Cin); g_ref: (K, Lin, Lout); b_ref: (Cout, 1)
        k_size, _, cin = w_ref.shape
        acc = None
        for k in range(k_size):                                   # unrolled, K <= 5
            p = jnp.dot(h, g_ref[k], preferred_element_type=f32)  # (Cin, Lout) tap gather
            if cin == 1:
                t = w_ref[k] * p                                  # (Cout,1)*(1,Lout) broadcast
            else:
                t = jnp.dot(w_ref[k], p, preferred_element_type=f32)
            acc = t if acc is None else acc + t
        acc = acc + b_ref[...]
        return jnp.maximum(acc, 0.0) if relu else acc

    def pool(h, p_ref):
        a = jnp.dot(h, p_ref[0], preferred_element_type=f32)
        b = jnp.dot(h, p_ref[1], preferred_element_type=f32)
        return jnp.maximum(a, b)

    h = x_ref[0]                                       # (1, 500)
    # encoder
    h = conv(h, w1_ref, g1_ref, b1_ref, True)          # (16, 167)
    h = pool(h, p1_ref)                                # (16, 83)
    h = conv(h, w2_ref, g2_ref, b2_ref, True)          # (8, 42)
    h = pool(h, p2_ref)                                # (8, 41)
    # decoder
    h = conv(h, w3_ref, g3_ref, b3_ref, True)          # (16, 83)
    h = conv(h, w4_ref, g4_ref, b4_ref, True)          # (8, 249)
    h = conv(h, w5_ref, g5_ref, b5_ref, False)         # (1, 495)
    y = jnp.dot(h, lwt_ref[...], preferred_element_type=f32) + lb_ref[...]   # (1, 500)
    o_ref[0] = y


def _const_spec(arr):
    nd = arr.ndim
    return pl.BlockSpec(arr.shape, lambda b, _nd=nd: (0,) * _nd)


def forward(x, kp):
    """x: (B, SEGMENT_SIZE) -> (B, SEGMENT_SIZE); mirrors convautoencoder.forward."""
    B = x.shape[0]
    x3 = x.reshape(B, 1, SEGMENT_SIZE)
    operands = [x3,
                kp["w1"], kp["b1"], kp["g1"], kp["p1"],
                kp["w2"], kp["b2"], kp["g2"], kp["p2"],
                kp["w3"], kp["b3"], kp["g3"],
                kp["w4"], kp["b4"], kp["g4"],
                kp["w5"], kp["b5"], kp["g5"],
                kp["lwt"], kp["lb"]]
    in_specs = [pl.BlockSpec((1, 1, SEGMENT_SIZE), lambda b: (b, 0, 0))]
    in_specs += [_const_spec(a) for a in operands[1:]]

    out = pl.pallas_call(
        _autoencoder_kernel,
        grid=(B,),
        in_specs=in_specs,
        out_specs=pl.BlockSpec((1, 1, SEGMENT_SIZE), lambda b: (b, 0, 0)),
        out_shape=jax.ShapeDtypeStruct((B, 1, SEGMENT_SIZE), jnp.float32),
        compiler_params=pltpu.CompilerParams(
            dimension_semantics=("parallel",),
            vmem_limit_bytes=32 * 1024 * 1024),
    )(*operands)
    return out.reshape(B, SEGMENT_SIZE)


# ----------------------------------- parameters ------------------------------------ #
def init_params(key):
    """Deterministic PyTorch-style uniform(-1/sqrt(fan_in), 1/sqrt(fan_in)) init."""
    def uni(k, shape, fan_in):
        bound = 1.0 / float(fan_in) ** 0.5
        return jax.random.uniform(k, shape, jnp.float32, -bound, bound)

    keys = jax.random.split(key, 12)
    return {
        "enc1_w": uni(keys[0], (16, 1, 3), 1 * 3),     # Conv1d(1,16,3)
        "enc1_b": uni(keys[1], (16,), 1 * 3),
        "enc2_w": uni(keys[2], (8, 16, 3), 16 * 3),    # Conv1d(16,8,3)
        "enc2_b": uni(keys[3], (8,), 16 * 3),
        "dec1_w": uni(keys[4], (8, 16, 3), 16 * 3),    # ConvTranspose1d(8,16,3)
        "dec1_b": uni(keys[5], (16,), 16 * 3),
        "dec2_w": uni(keys[6], (16, 8, 5), 8 * 5),     # ConvTranspose1d(16,8,5)
        "dec2_b": uni(keys[7], (8,), 8 * 5),
        "dec3_w": uni(keys[8], (8, 1, 1), 1 * 1),      # ConvTranspose1d(8,1,1)
        "dec3_b": uni(keys[9], (1,), 1 * 1),
        "lin_w": uni(keys[10], (SEGMENT_SIZE, 495), 495),  # Linear(495, segment_size)
        "lin_b": uni(keys[11], (SEGMENT_SIZE,), 495),
    }


def pack_params(p):
    """Precompute kernel-ready layouts: per-tap weight stacks, column biases,
    selection matrices, transposed Linear weight.  Done once, outside the hot path."""
    return {
        # Conv1d weights (Cout,Cin,K) -> (K,Cout,Cin); ConvT (Cin,Cout,K) -> (K,Cout,Cin)
        "w1": jnp.transpose(p["enc1_w"], (2, 0, 1)), "b1": p["enc1_b"].reshape(-1, 1),
        "w2": jnp.transpose(p["enc2_w"], (2, 0, 1)), "b2": p["enc2_b"].reshape(-1, 1),
        "w3": jnp.transpose(p["dec1_w"], (2, 1, 0)), "b3": p["dec1_b"].reshape(-1, 1),
        "w4": jnp.transpose(p["dec2_w"], (2, 1, 0)), "b4": p["dec2_b"].reshape(-1, 1),
        "w5": jnp.transpose(p["dec3_w"], (2, 1, 0)), "b5": p["dec3_b"].reshape(-1, 1),
        "lwt": p["lin_w"].T, "lb": p["lin_b"].reshape(1, -1),
        # 0/1 tap-selection matrices (shape-only constants)
        "g1": jnp.asarray(_conv_selectors(L0, L1, 3, 3, 1)),
        "p1": jnp.asarray(_pool_selectors(L1, L1P, 2)),
        "g2": jnp.asarray(_conv_selectors(L1P, L2, 3, 2, 1)),
        "p2": jnp.asarray(_pool_selectors(L2, L2P, 1)),
        "g3": jnp.asarray(_deconv_selectors(L2P, L3, 3, 2, 0)),
        "g4": jnp.asarray(_deconv_selectors(L3, L4, 5, 3, 1)),
        "g5": jnp.asarray(_deconv_selectors(L4, L5, 1, 2, 1)),
    }


# --------------------------- pure-JAX reference (for checking) --------------------- #
_HI = jax.lax.Precision.HIGHEST


def _conv1d_ref(x, w, b, stride, padding):
    B, Cin, L = x.shape
    Cout, _, K = w.shape
    if padding >= 0:
        xp = jnp.pad(x, ((0, 0), (0, 0), (padding, padding)))
    else:
        xp = x[:, :, -padding:L + padding]
    Lp = xp.shape[-1]
    Lout = (Lp - K) // stride + 1
    idx = jnp.arange(Lout)[:, None] * stride + jnp.arange(K)[None, :]
    patches = xp[:, :, idx]                                    # (B,Cin,Lout,K)
    return jnp.einsum('bclk,ock->bol', patches, w, precision=_HI) + b[None, :, None]


def _deconv1d_ref(x, w, b, stride, padding):
    B, Cin, L = x.shape
    _, Cout, K = w.shape
    Ld = (L - 1) * stride + 1
    xd = jnp.zeros((B, Cin, Ld), x.dtype).at[:, :, ::stride].set(x)
    wf = jnp.flip(w, axis=-1).transpose(1, 0, 2)
    return _conv1d_ref(xd, wf, b, stride=1, padding=K - 1 - padding)


def _pool_ref(x, stride):
    L = x.shape[-1]
    Lout = (L - 2) // stride + 1
    idx = jnp.arange(Lout) * stride
    return jnp.maximum(x[:, :, idx], x[:, :, idx + 1])


def forward_ref(x, p):
    h = x[:, None, :]
    h = jax.nn.relu(_conv1d_ref(h, p["enc1_w"], p["enc1_b"], 3, 1))
    h = _pool_ref(h, 2)
    h = jax.nn.relu(_conv1d_ref(h, p["enc2_w"], p["enc2_b"], 2, 1))
    h = _pool_ref(h, 1)
    h = jax.nn.relu(_deconv1d_ref(h, p["dec1_w"], p["dec1_b"], 2, 0))
    h = jax.nn.relu(_deconv1d_ref(h, p["dec2_w"], p["dec2_b"], 3, 1))
    h = _deconv1d_ref(h, p["dec3_w"], p["dec3_b"], 2, 1)
    y = jnp.einsum('bcl,nl->bcn', h, p["lin_w"], precision=_HI) + p["lin_b"][None, None, :]
    return y[:, 0, :]


# --------------------------------------- main -------------------------------------- #
if __name__ == "__main__":
    key = jax.random.PRNGKey(0)
    pkey, xkey = jax.random.split(key)
    params = init_params(pkey)
    kparams = pack_params(params)
    x = jax.random.normal(xkey, (BATCH, SEGMENT_SIZE), jnp.float32)

    y = jax.block_until_ready(jax.jit(forward)(x, kparams))

    assert y.shape == (BATCH, SEGMENT_SIZE), y.shape
    assert bool(jnp.all(jnp.isfinite(y)))

    # Cross-check the fused Pallas kernel against a pure-JAX reference of the module.
    y_ref = jax.block_until_ready(jax.jit(forward_ref)(x, params))
    max_err = float(jnp.max(jnp.abs(y - y_ref)))
    assert max_err < 1e-2, f"mismatch vs reference: {max_err}"

    print("KERNEL_OK")
</pallas_src>

<mosaic_0001>
module attributes {stable_mosaic.version = 11 : i64} {
  func.func @_autoencoder_kernel(%arg0: i32, %arg1: memref<1x1x500xf32, #tpu.memory_space<vmem>>, %arg2: memref<3x16x1xf32, #tpu.memory_space<vmem>>, %arg3: memref<16x1xf32, #tpu.memory_space<vmem>>, %arg4: memref<3x500x167xf32, #tpu.memory_space<vmem>>, %arg5: memref<2x167x83xf32, #tpu.memory_space<vmem>>, %arg6: memref<3x8x16xf32, #tpu.memory_space<vmem>>, %arg7: memref<8x1xf32, #tpu.memory_space<vmem>>, %arg8: memref<3x83x42xf32, #tpu.memory_space<vmem>>, %arg9: memref<2x42x41xf32, #tpu.memory_space<vmem>>, %arg10: memref<3x16x8xf32, #tpu.memory_space<vmem>>, %arg11: memref<16x1xf32, #tpu.memory_space<vmem>>, %arg12: memref<3x41x83xf32, #tpu.memory_space<vmem>>, %arg13: memref<5x8x16xf32, #tpu.memory_space<vmem>>, %arg14: memref<8x1xf32, #tpu.memory_space<vmem>>, %arg15: memref<5x83x249xf32, #tpu.memory_space<vmem>>, %arg16: memref<1x1x8xf32, #tpu.memory_space<vmem>>, %arg17: memref<1x1xf32, #tpu.memory_space<vmem>>, %arg18: memref<1x249x495xf32, #tpu.memory_space<vmem>>, %arg19: memref<495x500xf32, #tpu.memory_space<vmem>>, %arg20: memref<1x500xf32, #tpu.memory_space<vmem>>, %arg21: memref<1x1x500xf32, #tpu.memory_space<vmem>>) attributes {dimension_semantics = [#tpu.dimension_semantics<parallel>], iteration_bounds = array<i64: 2>, scalar_prefetch = 0 : i64, scratch_operands = 0 : i64, tpu.core_type = #tpu.core_type<tc>, window_params = [{transform_indices = @transform_0, window_bounds = array<i64: 1, 1, 500>}, {pipeline_mode = #tpu.pipeline_mode<synchronous>, transform_indices = @transform_1, window_bounds = array<i64: 3, 16, 1>}, {pipeline_mode = #tpu.pipeline_mode<synchronous>, transform_indices = @transform_2, window_bounds = array<i64: 16, 1>}, {pipeline_mode = #tpu.pipeline_mode<synchronous>, transform_indices = @transform_3, window_bounds = array<i64: 3, 500, 167>}, {pipeline_mode = #tpu.pipeline_mode<synchronous>, transform_indices = @transform_4, window_bounds = array<i64: 2, 167, 83>}, {pipeline_mode = #tpu.pipeline_mode<synchronous>, transform_indices = @transform_5, window_bounds = array<i64: 3, 8, 16>}, {pipeline_mode = #tpu.pipeline_mode<synchronous>, transform_indices = @transform_6, window_bounds = array<i64: 8, 1>}, {pipeline_mode = #tpu.pipeline_mode<synchronous>, transform_indices = @transform_7, window_bounds = array<i64: 3, 83, 42>}, {pipeline_mode = #tpu.pipeline_mode<synchronous>, transform_indices = @transform_8, window_bounds = array<i64: 2, 42, 41>}, {pipeline_mode = #tpu.pipeline_mode<synchronous>, transform_indices = @transform_9, window_bounds = array<i64: 3, 16, 8>}, {pipeline_mode = #tpu.pipeline_mode<synchronous>, transform_indices = @transform_10, window_bounds = array<i64: 16, 1>}, {pipeline_mode = #tpu.pipeline_mode<synchronous>, transform_indices = @transform_11, window_bounds = array<i64: 3, 41, 83>}, {pipeline_mode = #tpu.pipeline_mode<synchronous>, transform_indices = @transform_12, window_bounds = array<i64: 5, 8, 16>}, {pipeline_mode = #tpu.pipeline_mode<synchronous>, transform_indices = @transform_13, window_bounds = array<i64: 8, 1>}, {pipeline_mode = #tpu.pipeline_mode<synchronous>, transform_indices = @transform_14, window_bounds = array<i64: 5, 83, 249>}, {pipeline_mode = #tpu.pipeline_mode<synchronous>, transform_indices = @transform_15, window_bounds = array<i64: 1, 1, 8>}, {pipeline_mode = #tpu.pipeline_mode<synchronous>, transform_indices = @transform_16, window_bounds = array<i64: 1, 1>}, {pipeline_mode = #tpu.pipeline_mode<synchronous>, transform_indices = @transform_17, window_bounds = array<i64: 1, 249, 495>}, {pipeline_mode = #tpu.pipeline_mode<synchronous>, transform_indices = @transform_18, window_bounds = array<i64: 495, 500>}, {pipeline_mode = #tpu.pipeline_mode<synchronous>, transform_indices = @transform_19, window_bounds = array<i64: 1, 500>}, {transform_indices = @transform_20, window_bounds = array<i64: 1, 1, 500>}]} {
    %c0 = arith.constant 0 : index
    %c0_0 = arith.constant 0 : index
    %c0_1 = arith.constant 0 : index
    %0 = vector.load %arg1[%c0, %c0_0, %c0_1] : memref<1x1x500xf32, #tpu.memory_space<vmem>>, vector<1x1x500xf32>
    %1 = vector.shape_cast %0 : vector<1x1x500xf32> to vector<1x500xf32>
    %c0_2 = arith.constant 0 : index
    %c0_3 = arith.constant 0 : index
    %c0_4 = arith.constant 0 : index
    %2 = vector.load %arg4[%c0_2, %c0_3, %c0_4] : memref<3x500x167xf32, #tpu.memory_space<vmem>>, vector<1x500x167xf32>
    %3 = vector.shape_cast %2 : vector<1x500x167xf32> to vector<500x167xf32>
    %cst = arith.constant dense<0.000000e+00> : vector<1x167xf32>
    %4 = tpu.matmul %1, %3, %cst {dimension_numbers = #tpu.dot_dimension_numbers<[1], [0], [0], [1], [0, 0, 1, 1], [], []>} : vector<1x500xf32>, vector<500x167xf32>, vector<1x167xf32> -> vector<1x167xf32>
    %c0_5 = arith.constant 0 : index
    %c0_6 = arith.constant 0 : index
    %c0_7 = arith.constant 0 : index
    %5 = vector.load %arg2[%c0_5, %c0_6, %c0_7] : memref<3x16x1xf32, #tpu.memory_space<vmem>>, vector<1x16x1xf32>
    %6 = vector.shape_cast %5 : vector<1x16x1xf32> to vector<16x1xf32>
    %7 = vector.broadcast %6 : vector<16x1xf32> to vector<16x167xf32>
    %8 = vector.broadcast %4 : vector<1x167xf32> to vector<16x167xf32>
    %9 = arith.mulf %7, %8 : vector<16x167xf32>
    %c1 = arith.constant 1 : index
    %c0_8 = arith.constant 0 : index
    %c0_9 = arith.constant 0 : index
    %10 = vector.load %arg4[%c1, %c0_8, %c0_9] : memref<3x500x167xf32, #tpu.memory_space<vmem>>, vector<1x500x167xf32>
    %11 = vector.shape_cast %10 : vector<1x500x167xf32> to vector<500x167xf32>
    %cst_10 = arith.constant dense<0.000000e+00> : vector<1x167xf32>
    %12 = tpu.matmul %1, %11, %cst_10 {dimension_numbers = #tpu.dot_dimension_numbers<[1], [0], [0], [1], [0, 0, 1, 1], [], []>} : vector<1x500xf32>, vector<500x167xf32>, vector<1x167xf32> -> vector<1x167xf32>
    %c1_11 = arith.constant 1 : index
    %c0_12 = arith.constant 0 : index
    %c0_13 = arith.constant 0 : index
    %13 = vector.load %arg2[%c1_11, %c0_12, %c0_13] : memref<3x16x1xf32, #tpu.memory_space<vmem>>, vector<1x16x1xf32>
    %14 = vector.shape_cast %13 : vector<1x16x1xf32> to vector<16x1xf32>
    %15 = vector.broadcast %14 : vector<16x1xf32> to vector<16x167xf32>
    %16 = vector.broadcast %12 : vector<1x167xf32> to vector<16x167xf32>
    %17 = arith.mulf %15, %16 : vector<16x167xf32>
    %18 = arith.addf %9, %17 : vector<16x167xf32>
    %c2 = arith.constant 2 : index
    %c0_14 = arith.constant 0 : index
    %c0_15 = arith.constant 0 : index
    %19 = vector.load %arg4[%c2, %c0_14, %c0_15] : memref<3x500x167xf32, #tpu.memory_space<vmem>>, vector<1x500x167xf32>
    %20 = vector.shape_cast %19 : vector<1x500x167xf32> to vector<500x167xf32>
    %cst_16 = arith.constant dense<0.000000e+00> : vector<1x167xf32>
    %21 = tpu.matmul %1, %20, %cst_16 {dimension_numbers = #tpu.dot_dimension_numbers<[1], [0], [0], [1], [0, 0, 1, 1], [], []>} : vector<1x500xf32>, vector<500x167xf32>, vector<1x167xf32> -> vector<1x167xf32>
    %c2_17 = arith.constant 2 : index
    %c0_18 = arith.constant 0 : index
    %c0_19 = arith.constant 0 : index
    %22 = vector.load %arg2[%c2_17, %c0_18, %c0_19] : memref<3x16x1xf32, #tpu.memory_space<vmem>>, vector<1x16x1xf32>
    %23 = vector.shape_cast %22 : vector<1x16x1xf32> to vector<16x1xf32>
    %24 = vector.broadcast %23 : vector<16x1xf32> to vector<16x167xf32>
    %25 = vector.broadcast %21 : vector<1x167xf32> to vector<16x167xf32>
    %26 = arith.mulf %24, %25 : vector<16x167xf32>
    %27 = arith.addf %18, %26 : vector<16x167xf32>
    %c0_20 = arith.constant 0 : index
    %c0_21 = arith.constant 0 : index
    %28 = vector.load %arg3[%c0_20, %c0_21] : memref<16x1xf32, #tpu.memory_space<vmem>>, vector<16x1xf32>
    %29 = vector.broadcast %28 : vector<16x1xf32> to vector<16x167xf32>
    %30 = arith.addf %27, %29 : vector<16x167xf32>
    %cst_22 = arith.constant 0.000000e+00 : f32
    %31 = vector.broadcast %cst_22 : f32 to vector<16x167xf32>
    %32 = arith.maximumf %30, %31 : vector<16x167xf32>
    %c0_23 = arith.constant 0 : index
    %c0_24 = arith.constant 0 : index
    %c0_25 = arith.constant 0 : index
    %33 = vector.load %arg5[%c0_23, %c0_24, %c0_25] : memref<2x167x83xf32, #tpu.memory_space<vmem>>, vector<1x167x83xf32>
    %34 = vector.shape_cast %33 : vector<1x167x83xf32> to vector<167x83xf32>
    %cst_26 = arith.constant dense<0.000000e+00> : vector<16x83xf32>
    %35 = tpu.matmul %32, %34, %cst_26 {dimension_numbers = #tpu.dot_dimension_numbers<[1], [0], [0], [1], [0, 0, 1, 1], [], []>} : vector<16x167xf32>, vector<167x83xf32>, vector<16x83xf32> -> vector<16x83xf32>
    %c1_27 = arith.constant 1 : index
    %c0_28 = arith.constant 0 : index
    %c0_29 = arith.constant 0 : index
    %36 = vector.load %arg5[%c1_27, %c0_28, %c0_29] : memref<2x167x83xf32, #tpu.memory_space<vmem>>, vector<1x167x83xf32>
    %37 = vector.shape_cast %36 : vector<1x167x83xf32> to vector<167x83xf32>
    %cst_30 = arith.constant dense<0.000000e+00> : vector<16x83xf32>
    %38 = tpu.matmul %32, %37, %cst_30 {dimension_numbers = #tpu.dot_dimension_numbers<[1], [0], [0], [1], [0, 0, 1, 1], [], []>} : vector<16x167xf32>, vector<167x83xf32>, vector<16x83xf32> -> vector<16x83xf32>
    %39 = arith.maximumf %35, %38 : vector<16x83xf32>
    %c0_31 = arith.constant 0 : index
    %c0_32 = arith.constant 0 : index
    %c0_33 = arith.constant 0 : index
    %40 = vector.load %arg8[%c0_31, %c0_32, %c0_33] : memref<3x83x42xf32, #tpu.memory_space<vmem>>, vector<1x83x42xf32>
    %41 = vector.shape_cast %40 : vector<1x83x42xf32> to vector<83x42xf32>
    %cst_34 = arith.constant dense<0.000000e+00> : vector<16x42xf32>
    %42 = tpu.matmul %39, %41, %cst_34 {dimension_numbers = #tpu.dot_dimension_numbers<[1], [0], [0], [1], [0, 0, 1, 1], [], []>} : vector<16x83xf32>, vector<83x42xf32>, vector<16x42xf32> -> vector<16x42xf32>
    %c0_35 = arith.constant 0 : index
    %c0_36 = arith.constant 0 : index
    %c0_37 = arith.constant 0 : index
    %43 = vector.load %arg6[%c0_35, %c0_36, %c0_37] : memref<3x8x16xf32, #tpu.memory_space<vmem>>, vector<1x8x16xf32>
    %44 = vector.shape_cast %43 : vector<1x8x16xf32> to vector<8x16xf32>
    %cst_38 = arith.constant dense<0.000000e+00> : vector<8x42xf32>
    %45 = tpu.matmul %44, %42, %cst_38 {dimension_numbers = #tpu.dot_dimension_numbers<[1], [0], [0], [1], [0, 0, 1, 1], [], []>} : vector<8x16xf32>, vector<16x42xf32>, vector<8x42xf32> -> vector<8x42xf32>
    %c1_39 = arith.constant 1 : index
    %c0_40 = arith.constant 0 : index
    %c0_41 = arith.constant 0 : index
    %46 = vector.load %arg8[%c1_39, %c0_40, %c0_41] : memref<3x83x42xf32, #tpu.memory_space<vmem>>, vector<1x83x42xf32>
    %47 = vector.shape_cast %46 : vector<1x83x42xf32> to vector<83x42xf32>
    %cst_42 = arith.constant dense<0.000000e+00> : vector<16x42xf32>
    %48 = tpu.matmul %39, %47, %cst_42 {dimension_numbers = #tpu.dot_dimension_numbers<[1], [0], [0], [1], [0, 0, 1, 1], [], []>} : vector<16x83xf32>, vector<83x42xf32>, vector<16x42xf32> -> vector<16x42xf32>
    %c1_43 = arith.constant 1 : index
    %c0_44 = arith.constant 0 : index
    %c0_45 = arith.constant 0 : index
    %49 = vector.load %arg6[%c1_43, %c0_44, %c0_45] : memref<3x8x16xf32, #tpu.memory_space<vmem>>, vector<1x8x16xf32>
    %50 = vector.shape_cast %49 : vector<1x8x16xf32> to vector<8x16xf32>
    %cst_46 = arith.constant dense<0.000000e+00> : vector<8x42xf32>
    %51 = tpu.matmul %50, %48, %cst_46 {dimension_numbers = #tpu.dot_dimension_numbers<[1], [0], [0], [1], [0, 0, 1, 1], [], []>} : vector<8x16xf32>, vector<16x42xf32>, vector<8x42xf32> -> vector<8x42xf32>
    %52 = arith.addf %45, %51 : vector<8x42xf32>
    %c2_47 = arith.constant 2 : index
    %c0_48 = arith.constant 0 : index
    %c0_49 = arith.constant 0 : index
    %53 = vector.load %arg8[%c2_47, %c0_48, %c0_49] : memref<3x83x42xf32, #tpu.memory_space<vmem>>, vector<1x83x42xf32>
    %54 = vector.shape_cast %53 : vector<1x83x42xf32> to vector<83x42xf32>
    %cst_50 = arith.constant dense<0.000000e+00> : vector<16x42xf32>
    %55 = tpu.matmul %39, %54, %cst_50 {dimension_numbers = #tpu.dot_dimension_numbers<[1], [0], [0], [1], [0, 0, 1, 1], [], []>} : vector<16x83xf32>, vector<83x42xf32>, vector<16x42xf32> -> vector<16x42xf32>
    %c2_51 = arith.constant 2 : index
    %c0_52 = arith.constant 0 : index
    %c0_53 = arith.constant 0 : index
    %56 = vector.load %arg6[%c2_51, %c0_52, %c0_53] : memref<3x8x16xf32, #tpu.memory_space<vmem>>, vector<1x8x16xf32>
    %57 = vector.shape_cast %56 : vector<1x8x16xf32> to vector<8x16xf32>
    %cst_54 = arith.constant dense<0.000000e+00> : vector<8x42xf32>
    %58 = tpu.matmul %57, %55, %cst_54 {dimension_numbers = #tpu.dot_dimension_numbers<[1], [0], [0], [1], [0, 0, 1, 1], [], []>} : vector<8x16xf32>, vector<16x42xf32>, vector<8x42xf32> -> vector<8x42xf32>
    %59 = arith.addf %52, %58 : vector<8x42xf32>
    %c0_55 = arith.constant 0 : index
    %c0_56 = arith.constant 0 : index
    %60 = vector.load %arg7[%c0_55, %c0_56] : memref<8x1xf32, #tpu.memory_space<vmem>>, vector<8x1xf32>
    %61 = vector.broadcast %60 : vector<8x1xf32> to vector<8x42xf32>
    %62 = arith.addf %59, %61 : vector<8x42xf32>
    %cst_57 = arith.constant 0.000000e+00 : f32
    %63 = vector.broadcast %cst_57 : f32 to vector<8x42xf32>
    %64 = arith.maximumf %62, %63 : vector<8x42xf32>
    %c0_58 = arith.constant 0 : index
    %c0_59 = arith.constant 0 : index
    %c0_60 = arith.constant 0 : index
    %65 = vector.load %arg9[%c0_58, %c0_59, %c0_60] : memref<2x42x41xf32, #tpu.memory_space<vmem>>, vector<1x42x41xf32>
    %66 = vector.shape_cast %65 : vector<1x42x41xf32> to vector<42x41xf32>
    %cst_61 = arith.constant dense<0.000000e+00> : vector<8x41xf32>
    %67 = tpu.matmul %64, %66, %cst_61 {dimension_numbers = #tpu.dot_dimension_numbers<[1], [0], [0], [1], [0, 0, 1, 1], [], []>} : vector<8x42xf32>, vector<42x41xf32>, vector<8x41xf32> -> vector<8x41xf32>
    %c1_62 = arith.constant 1 : index
    %c0_63 = arith.constant 0 : index
    %c0_64 = arith.constant 0 : index
    %68 = vector.load %arg9[%c1_62, %c0_63, %c0_64] : memref<2x42x41xf32, #tpu.memory_space<vmem>>, vector<1x42x41xf32>
    %69 = vector.shape_cast %68 : vector<1x42x41xf32> to vector<42x41xf32>
    %cst_65 = arith.constant dense<0.000000e+00> : vector<8x41xf32>
    %70 = tpu.matmul %64, %69, %cst_65 {dimension_numbers = #tpu.dot_dimension_numbers<[1], [0], [0], [1], [0, 0, 1, 1], [], []>} : vector<8x42xf32>, vector<42x41xf32>, vector<8x41xf32> -> vector<8x41xf32>
    %71 = arith.maximumf %67, %70 : vector<8x41xf32>
    %c0_66 = arith.constant 0 : index
    %c0_67 = arith.constant 0 : index
    %c0_68 = arith.constant 0 : index
    %72 = vector.load %arg12[%c0_66, %c0_67, %c0_68] : memref<3x41x83xf32, #tpu.memory_space<vmem>>, vector<1x41x83xf32>
    %73 = vector.shape_cast %72 : vector<1x41x83xf32> to vector<41x83xf32>
    %cst_69 = arith.constant dense<0.000000e+00> : vector<8x83xf32>
    %74 = tpu.matmul %71, %73, %cst_69 {dimension_numbers = #tpu.dot_dimension_numbers<[1], [0], [0], [1], [0, 0, 1, 1], [], []>} : vector<8x41xf32>, vector<41x83xf32>, vector<8x83xf32> -> vector<8x83xf32>
    %c0_70 = arith.constant 0 : index
    %c0_71 = arith.constant 0 : index
    %c0_72 = arith.constant 0 : index
    %75 = vector.load %arg10[%c0_70, %c0_71, %c0_72] : memref<3x16x8xf32, #tpu.memory_space<vmem>>, vector<1x16x8xf32>
    %76 = vector.shape_cast %75 : vector<1x16x8xf32> to vector<16x8xf32>
    %cst_73 = arith.constant dense<0.000000e+00> : vector<16x83xf32>
    %77 = tpu.matmul %76, %74, %cst_73 {dimension_numbers = #tpu.dot_dimension_numbers<[1], [0], [0], [1], [0, 0, 1, 1], [], []>} : vector<16x8xf32>, vector<8x83xf32>, vector<16x83xf32> -> vector<16x83xf32>
    %c1_74 = arith.constant 1 : index
    %c0_75 = arith.constant 0 : index
    %c0_76 = arith.constant 0 : index
    %78 = vector.load %arg12[%c1_74, %c0_75, %c0_76] : memref<3x41x83xf32, #tpu.memory_space<vmem>>, vector<1x41x83xf32>
    %79 = vector.shape_cast %78 : vector<1x41x83xf32> to vector<41x83xf32>
    %cst_77 = arith.constant dense<0.000000e+00> : vector<8x83xf32>
    %80 = tpu.matmul %71, %79, %cst_77 {dimension_numbers = #tpu.dot_dimension_numbers<[1], [0], [0], [1], [0, 0, 1, 1], [], []>} : vector<8x41xf32>, vector<41x83xf32>, vector<8x83xf32> -> vector<8x83xf32>
    %c1_78 = arith.constant 1 : index
    %c0_79 = arith.constant 0 : index
    %c0_80 = arith.constant 0 : index
    %81 = vector.load %arg10[%c1_78, %c0_79, %c0_80] : memref<3x16x8xf32, #tpu.memory_space<vmem>>, vector<1x16x8xf32>
    %82 = vector.shape_cast %81 : vector<1x16x8xf32> to vector<16x8xf32>
    %cst_81 = arith.constant dense<0.000000e+00> : vector<16x83xf32>
    %83 = tpu.matmul %82, %80, %cst_81 {dimension_numbers = #tpu.dot_dimension_numbers<[1], [0], [0], [1], [0, 0, 1, 1], [], []>} : vector<16x8xf32>, vector<8x83xf32>, vector<16x83xf32> -> vector<16x83xf32>
    %84 = arith.addf %77, %83 : vector<16x83xf32>
    %c2_82 = arith.constant 2 : index
    %c0_83 = arith.constant 0 : index
    %c0_84 = arith.constant 0 : index
    %85 = vector.load %arg12[%c2_82, %c0_83, %c0_84] : memref<3x41x83xf32, #tpu.memory_space<vmem>>, vector<1x41x83xf32>
    %86 = vector.shape_cast %85 : vector<1x41x83xf32> to vector<41x83xf32>
    %cst_85 = arith.constant dense<0.000000e+00> : vector<8x83xf32>
    %87 = tpu.matmul %71, %86, %cst_85 {dimension_numbers = #tpu.dot_dimension_numbers<[1], [0], [0], [1], [0, 0, 1, 1], [], []>} : vector<8x41xf32>, vector<41x83xf32>, vector<8x83xf32> -> vector<8x83xf32>
    %c2_86 = arith.constant 2 : index
    %c0_87 = arith.constant 0 : index
    %c0_88 = arith.constant 0 : index
    %88 = vector.load %arg10[%c2_86, %c0_87, %c0_88] : memref<3x16x8xf32, #tpu.memory_space<vmem>>, vector<1x16x8xf32>
    %89 = vector.shape_cast %88 : vector<1x16x8xf32> to vector<16x8xf32>
    %cst_89 = arith.constant dense<0.000000e+00> : vector<16x83xf32>
    %90 = tpu.matmul %89, %87, %cst_89 {dimension_numbers = #tpu.dot_dimension_numbers<[1], [0], [0], [1], [0, 0, 1, 1], [], []>} : vector<16x8xf32>, vector<8x83xf32>, vector<16x83xf32> -> vector<16x83xf32>
    %91 = arith.addf %84, %90 : vector<16x83xf32>
    %c0_90 = arith.constant 0 : index
    %c0_91 = arith.constant 0 : index
    %92 = vector.load %arg11[%c0_90, %c0_91] : memref<16x1xf32, #tpu.memory_space<vmem>>, vector<16x1xf32>
    %93 = vector.broadcast %92 : vector<16x1xf32> to vector<16x83xf32>
    %94 = arith.addf %91, %93 : vector<16x83xf32>
    %cst_92 = arith.constant 0.000000e+00 : f32
    %95 = vector.broadcast %cst_92 : f32 to vector<16x83xf32>
    %96 = arith.maximumf %94, %95 : vector<16x83xf32>
    %c0_93 = arith.constant 0 : index
    %c0_94 = arith.constant 0 : index
    %c0_95 = arith.constant 0 : index
    %97 = vector.load %arg15[%c0_93, %c0_94, %c0_95] : memref<5x83x249xf32, #tpu.memory_space<vmem>>, vector<1x83x249xf32>
    %98 = vector.shape_cast %97 : vector<1x83x249xf32> to vector<83x249xf32>
    %cst_96 = arith.constant dense<0.000000e+00> : vector<16x249xf32>
    %99 = tpu.matmul %96, %98, %cst_96 {dimension_numbers = #tpu.dot_dimension_numbers<[1], [0], [0], [1], [0, 0, 1, 1], [], []>} : vector<16x83xf32>, vector<83x249xf32>, vector<16x249xf32> -> vector<16x249xf32>
    %c0_97 = arith.constant 0 : index
    %c0_98 = arith.constant 0 : index
    %c0_99 = arith.constant 0 : index
    %100 = vector.load %arg13[%c0_97, %c0_98, %c0_99] : memref<5x8x16xf32, #tpu.memory_space<vmem>>, vector<1x8x16xf32>
    %101 = vector.shape_cast %100 : vector<1x8x16xf32> to vector<8x16xf32>
    %cst_100 = arith.constant dense<0.000000e+00> : vector<8x249xf32>
    %102 = tpu.matmul %101, %99, %cst_100 {dimension_numbers = #tpu.dot_dimension_numbers<[1], [0], [0], [1], [0, 0, 1, 1], [], []>} : vector<8x16xf32>, vector<16x249xf32>, vector<8x249xf32> -> vector<8x249xf32>
    %c1_101 = arith.constant 1 : index
    %c0_102 = arith.constant 0 : index
    %c0_103 = arith.constant 0 : index
    %103 = vector.load %arg15[%c1_101, %c0_102, %c0_103] : memref<5x83x249xf32, #tpu.memory_space<vmem>>, vector<1x83x249xf32>
    %104 = vector.shape_cast %103 : vector<1x83x249xf32> to vector<83x249xf32>
    %cst_104 = arith.constant dense<0.000000e+00> : vector<16x249xf32>
    %105 = tpu.matmul %96, %104, %cst_104 {dimension_numbers = #tpu.dot_dimension_numbers<[1], [0], [0], [1], [0, 0, 1, 1], [], []>} : vector<16x83xf32>, vector<83x249xf32>, vector<16x249xf32> -> vector<16x249xf32>
    %c1_105 = arith.constant 1 : index
    %c0_106 = arith.constant 0 : index
    %c0_107 = arith.constant 0 : index
    %106 = vector.load %arg13[%c1_105, %c0_106, %c0_107] : memref<5x8x16xf32, #tpu.memory_space<vmem>>, vector<1x8x16xf32>
    %107 = vector.shape_cast %106 : vector<1x8x16xf32> to vector<8x16xf32>
    %cst_108 = arith.constant dense<0.000000e+00> : vector<8x249xf32>
    %108 = tpu.matmul %107, %105, %cst_108 {dimension_numbers = #tpu.dot_dimension_numbers<[1], [0], [0], [1], [0, 0, 1, 1], [], []>} : vector<8x16xf32>, vector<16x249xf32>, vector<8x249xf32> -> vector<8x249xf32>
    %109 = arith.addf %102, %108 : vector<8x249xf32>
    %c2_109 = arith.constant 2 : index
    %c0_110 = arith.constant 0 : index
    %c0_111 = arith.constant 0 : index
    %110 = vector.load %arg15[%c2_109, %c0_110, %c0_111] : memref<5x83x249xf32, #tpu.memory_space<vmem>>, vector<1x83x249xf32>
    %111 = vector.shape_cast %110 : vector<1x83x249xf32> to vector<83x249xf32>
    %cst_112 = arith.constant dense<0.000000e+00> : vector<16x249xf32>
    %112 = tpu.matmul %96, %111, %cst_112 {dimension_numbers = #tpu.dot_dimension_numbers<[1], [0], [0], [1], [0, 0, 1, 1], [], []>} : vector<16x83xf32>, vector<83x249xf32>, vector<16x249xf32> -> vector<16x249xf32>
    %c2_113 = arith.constant 2 : index
    %c0_114 = arith.constant 0 : index
    %c0_115 = arith.constant 0 : index
    %113 = vector.load %arg13[%c2_113, %c0_114, %c0_115] : memref<5x8x16xf32, #tpu.memory_space<vmem>>, vector<1x8x16xf32>
    %114 = vector.shape_cast %113 : vector<1x8x16xf32> to vector<8x16xf32>
    %cst_116 = arith.constant dense<0.000000e+00> : vector<8x249xf32>
    %115 = tpu.matmul %114, %112, %cst_116 {dimension_numbers = #tpu.dot_dimension_numbers<[1], [0], [0], [1], [0, 0, 1, 1], [], []>} : vector<8x16xf32>, vector<16x249xf32>, vector<8x249xf32> -> vector<8x249xf32>
    %116 = arith.addf %109, %115 : vector<8x249xf32>
    %c3 = arith.constant 3 : index
    %c0_117 = arith.constant 0 : index
    %c0_118 = arith.constant 0 : index
    %117 = vector.load %arg15[%c3, %c0_117, %c0_118] : memref<5x83x249xf32, #tpu.memory_space<vmem>>, vector<1x83x249xf32>
    %118 = vector.shape_cast %117 : vector<1x83x249xf32> to vector<83x249xf32>
    %cst_119 = arith.constant dense<0.000000e+00> : vector<16x249xf32>
    %119 = tpu.matmul %96, %118, %cst_119 {dimension_numbers = #tpu.dot_dimension_numbers<[1], [0], [0], [1], [0, 0, 1, 1], [], []>} : vector<16x83xf32>, vector<83x249xf32>, vector<16x249xf32> -> vector<16x249xf32>
    %c3_120 = arith.constant 3 : index
    %c0_121 = arith.constant 0 : index
    %c0_122 = arith.constant 0 : index
    %120 = vector.load %arg13[%c3_120, %c0_121, %c0_122] : memref<5x8x16xf32, #tpu.memory_space<vmem>>, vector<1x8x16xf32>
    %121 = vector.shape_cast %120 : vector<1x8x16xf32> to vector<8x16xf32>
    %cst_123 = arith.constant dense<0.000000e+00> : vector<8x249xf32>
    %122 = tpu.matmul %121, %119, %cst_123 {dimension_numbers = #tpu.dot_dimension_numbers<[1], [0], [0], [1], [0, 0, 1, 1], [], []>} : vector<8x16xf32>, vector<16x249xf32>, vector<8x249xf32> -> vector<8x249xf32>
    %123 = arith.addf %116, %122 : vector<8x249xf32>
    %c4 = arith.constant 4 : index
    %c0_124 = arith.constant 0 : index
    %c0_125 = arith.constant 0 : index
    %124 = vector.load %arg15[%c4, %c0_124, %c0_125] : memref<5x83x249xf32, #tpu.memory_space<vmem>>, vector<1x83x249xf32>
    %125 = vector.shape_cast %124 : vector<1x83x249xf32> to vector<83x249xf32>
    %cst_126 = arith.constant dense<0.000000e+00> : vector<16x249xf32>
    %126 = tpu.matmul %96, %125, %cst_126 {dimension_numbers = #tpu.dot_dimension_numbers<[1], [0], [0], [1], [0, 0, 1, 1], [], []>} : vector<16x83xf32>, vector<83x249xf32>, vector<16x249xf32> -> vector<16x249xf32>
    %c4_127 = arith.constant 4 : index
    %c0_128 = arith.constant 0 : index
    %c0_129 = arith.constant 0 : index
    %127 = vector.load %arg13[%c4_127, %c0_128, %c0_129] : memref<5x8x16xf32, #tpu.memory_space<vmem>>, vector<1x8x16xf32>
    %128 = vector.shape_cast %127 : vector<1x8x16xf32> to vector<8x16xf32>
    %cst_130 = arith.constant dense<0.000000e+00> : vector<8x249xf32>
    %129 = tpu.matmul %128, %126, %cst_130 {dimension_numbers = #tpu.dot_dimension_numbers<[1], [0], [0], [1], [0, 0, 1, 1], [], []>} : vector<8x16xf32>, vector<16x249xf32>, vector<8x249xf32> -> vector<8x249xf32>
    %130 = arith.addf %123, %129 : vector<8x249xf32>
    %c0_131 = arith.constant 0 : index
    %c0_132 = arith.constant 0 : index
    %131 = vector.load %arg14[%c0_131, %c0_132] : memref<8x1xf32, #tpu.memory_space<vmem>>, vector<8x1xf32>
    %132 = vector.broadcast %131 : vector<8x1xf32> to vector<8x249xf32>
    %133 = arith.addf %130, %132 : vector<8x249xf32>
    %cst_133 = arith.constant 0.000000e+00 : f32
    %134 = vector.broadcast %cst_133 : f32 to vector<8x249xf32>
    %135 = arith.maximumf %133, %134 : vector<8x249xf32>
    %c0_134 = arith.constant 0 : index
    %c0_135 = arith.constant 0 : index
    %c0_136 = arith.constant 0 : index
    %136 = vector.load %arg18[%c0_134, %c0_135, %c0_136] : memref<1x249x495xf32, #tpu.memory_space<vmem>>, vector<1x249x495xf32>
    %137 = vector.shape_cast %136 : vector<1x249x495xf32> to vector<249x495xf32>
    %cst_137 = arith.constant dense<0.000000e+00> : vector<8x495xf32>
    %138 = tpu.matmul %135, %137, %cst_137 {dimension_numbers = #tpu.dot_dimension_numbers<[1], [0], [0], [1], [0, 0, 1, 1], [], []>} : vector<8x249xf32>, vector<249x495xf32>, vector<8x495xf32> -> vector<8x495xf32>
    %c0_138 = arith.constant 0 : index
    %c0_139 = arith.constant 0 : index
    %c0_140 = arith.constant 0 : index
    %139 = vector.load %arg16[%c0_138, %c0_139, %c0_140] : memref<1x1x8xf32, #tpu.memory_space<vmem>>, vector<1x1x8xf32>
    %140 = vector.shape_cast %139 : vector<1x1x8xf32> to vector<1x8xf32>
    %cst_141 = arith.constant dense<0.000000e+00> : vector<1x495xf32>
    %141 = tpu.matmul %140, %138, %cst_141 {dimension_numbers = #tpu.dot_dimension_numbers<[1], [0], [0], [1], [0, 0, 1, 1], [], []>} : vector<1x8xf32>, vector<8x495xf32>, vector<1x495xf32> -> vector<1x495xf32>
    %c0_142 = arith.constant 0 : index
    %c0_143 = arith.constant 0 : index
    %142 = vector.load %arg17[%c0_142, %c0_143] : memref<1x1xf32, #tpu.memory_space<vmem>>, vector<1x1xf32>
    %143 = vector.broadcast %142 : vector<1x1xf32> to vector<1x495xf32>
    %144 = arith.addf %141, %143 : vector<1x495xf32>
    %c0_144 = arith.constant 0 : index
    %c0_145 = arith.constant 0 : index
    %145 = vector.load %arg19[%c0_144, %c0_145] : memref<495x500xf32, #tpu.memory_space<vmem>>, vector<495x500xf32>
    %cst_146 = arith.constant dense<0.000000e+00> : vector<1x500xf32>
    %146 = tpu.matmul %144, %145, %cst_146 {dimension_numbers = #tpu.dot_dimension_numbers<[1], [0], [0], [1], [0, 0, 1, 1], [], []>} : vector<1x495xf32>, vector<495x500xf32>, vector<1x500xf32> -> vector<1x500xf32>
    %c0_147 = arith.constant 0 : index
    %c0_148 = arith.constant 0 : index
    %147 = vector.load %arg20[%c0_147, %c0_148] : memref<1x500xf32, #tpu.memory_space<vmem>>, vector<1x500xf32>
    %148 = arith.addf %146, %147 : vector<1x500xf32>
    %c0_149 = arith.constant 0 : index
    %c0_150 = arith.constant 0 : index
    %c0_151 = arith.constant 0 : index
    %149 = vector.load %arg21[%c0_149, %c0_150, %c0_151] : memref<1x1x500xf32, #tpu.memory_space<vmem>>, vector<1x1x500xf32>
    %150 = vector.shape_cast %149 : vector<1x1x500xf32> to vector<1x500xf32>
    %151 = vector.shape_cast %148 : vector<1x500xf32> to vector<1x1x500xf32>
    tpu.vector_store %arg21[%c0_149, %c0_150, %c0_151], %151 {strides = array<i32>} : memref<1x1x500xf32, #tpu.memory_space<vmem>>, vector<1x1x500xf32>,
    return
  }
  func.func @transform_0(%arg0: i32) -> (i32, i32, i32) {
    %c0_i32 = arith.constant 0 : i32
    %c0_i32_0 = arith.constant 0 : i32
    %c0_i32_1 = arith.constant 0 : i32
    return %arg0, %c0_i32, %c0_i32_0 : i32, i32, i32
  }
  func.func @transform_1(%arg0: i32) -> (i32, i32, i32) {
    %c0_i32 = arith.constant 0 : i32
    %c0_i32_0 = arith.constant 0 : i32
    %c0_i32_1 = arith.constant 0 : i32
    %c0_i32_2 = arith.constant 0 : i32
    return %c0_i32, %c0_i32_0, %c0_i32_1 : i32, i32, i32
  }
  func.func @transform_2(%arg0: i32) -> (i32, i32) {
    %c0_i32 = arith.constant 0 : i32
    %c0_i32_0 = arith.constant 0 : i32
    %c0_i32_1 = arith.constant 0 : i32
    return %c0_i32, %c0_i32_0 : i32, i32
  }
  func.func @transform_3(%arg0: i32) -> (i32, i32, i32) {
    %c0_i32 = arith.constant 0 : i32
    %c0_i32_0 = arith.constant 0 : i32
    %c0_i32_1 = arith.constant 0 : i32
    %c0_i32_2 = arith.constant 0 : i32
    return %c0_i32, %c0_i32_0, %c0_i32_1 : i32, i32, i32
  }
  func.func @transform_4(%arg0: i32) -> (i32, i32, i32) {
    %c0_i32 = arith.constant 0 : i32
    %c0_i32_0 = arith.constant 0 : i32
    %c0_i32_1 = arith.constant 0 : i32
    %c0_i32_2 = arith.constant 0 : i32
    return %c0_i32, %c0_i32_0, %c0_i32_1 : i32, i32, i32
  }
  func.func @transform_5(%arg0: i32) -> (i32, i32, i32) {
    %c0_i32 = arith.constant 0 : i32
    %c0_i32_0 = arith.constant 0 : i32
    %c0_i32_1 = arith.constant 0 : i32
    %c0_i32_2 = arith.constant 0 : i32
    return %c0_i32, %c0_i32_0, %c0_i32_1 : i32, i32, i32
  }
  func.func @transform_6(%arg0: i32) -> (i32, i32) {
    %c0_i32 = arith.constant 0 : i32
    %c0_i32_0 = arith.constant 0 : i32
    %c0_i32_1 = arith.constant 0 : i32
    return %c0_i32, %c0_i32_0 : i32, i32
  }
  func.func @transform_7(%arg0: i32) -> (i32, i32, i32) {
    %c0_i32 = arith.constant 0 : i32
    %c0_i32_0 = arith.constant 0 : i32
    %c0_i32_1 = arith.constant 0 : i32
    %c0_i32_2 = arith.constant 0 : i32
    return %c0_i32, %c0_i32_0, %c0_i32_1 : i32, i32, i32
  }
  func.func @transform_8(%arg0: i32) -> (i32, i32, i32) {
    %c0_i32 = arith.constant 0 : i32
    %c0_i32_0 = arith.constant 0 : i32
    %c0_i32_1 = arith.constant 0 : i32
    %c0_i32_2 = arith.constant 0 : i32
    return %c0_i32, %c0_i32_0, %c0_i32_1 : i32, i32, i32
  }
  func.func @transform_9(%arg0: i32) -> (i32, i32, i32) {
    %c0_i32 = arith.constant 0 : i32
    %c0_i32_0 = arith.constant 0 : i32
    %c0_i32_1 = arith.constant 0 : i32
    %c0_i32_2 = arith.constant 0 : i32
    return %c0_i32, %c0_i32_0, %c0_i32_1 : i32, i32, i32
  }
  func.func @transform_10(%arg0: i32) -> (i32, i32) {
    %c0_i32 = arith.constant 0 : i32
    %c0_i32_0 = arith.constant 0 : i32
    %c0_i32_1 = arith.constant 0 : i32
    return %c0_i32, %c0_i32_0 : i32, i32
  }
  func.func @transform_11(%arg0: i32) -> (i32, i32, i32) {
    %c0_i32 = arith.constant 0 : i32
    %c0_i32_0 = arith.constant 0 : i32
    %c0_i32_1 = arith.constant 0 : i32
    %c0_i32_2 = arith.constant 0 : i32
    return %c0_i32, %c0_i32_0, %c0_i32_1 : i32, i32, i32
  }
  func.func @transform_12(%arg0: i32) -> (i32, i32, i32) {
    %c0_i32 = arith.constant 0 : i32
    %c0_i32_0 = arith.constant 0 : i32
    %c0_i32_1 = arith.constant 0 : i32
    %c0_i32_2 = arith.constant 0 : i32
    return %c0_i32, %c0_i32_0, %c0_i32_1 : i32, i32, i32
  }
  func.func @transform_13(%arg0: i32) -> (i32, i32) {
    %c0_i32 = arith.constant 0 : i32
    %c0_i32_0 = arith.constant 0 : i32
    %c0_i32_1 = arith.constant 0 : i32
    return %c0_i32, %c0_i32_0 : i32, i32
  }
  func.func @transform_14(%arg0: i32) -> (i32, i32, i32) {
    %c0_i32 = arith.constant 0 : i32
    %c0_i32_0 = arith.constant 0 : i32
    %c0_i32_1 = arith.constant 0 : i32
    %c0_i32_2 = arith.constant 0 : i32
    return %c0_i32, %c0_i32_0, %c0_i32_1 : i32, i32, i32
  }
  func.func @transform_15(%arg0: i32) -> (i32, i32, i32) {
    %c0_i32 = arith.constant 0 : i32
    %c0_i32_0 = arith.constant 0 : i32
    %c0_i32_1 = arith.constant 0 : i32
    %c0_i32_2 = arith.constant 0 : i32
    return %c0_i32, %c0_i32_0, %c0_i32_1 : i32, i32, i32
  }
  func.func @transform_16(%arg0: i32) -> (i32, i32) {
    %c0_i32 = arith.constant 0 : i32
    %c0_i32_0 = arith.constant 0 : i32
    %c0_i32_1 = arith.constant 0 : i32
    return %c0_i32, %c0_i32_0 : i32, i32
  }
  func.func @transform_17(%arg0: i32) -> (i32, i32, i32) {
    %c0_i32 = arith.constant 0 : i32
    %c0_i32_0 = arith.constant 0 : i32
    %c0_i32_1 = arith.constant 0 : i32
    %c0_i32_2 = arith.constant 0 : i32
    return %c0_i32, %c0_i32_0, %c0_i32_1 : i32, i32, i32
  }
  func.func @transform_18(%arg0: i32) -> (i32, i32) {
    %c0_i32 = arith.constant 0 : i32
    %c0_i32_0 = arith.constant 0 : i32
    %c0_i32_1 = arith.constant 0 : i32
    return %c0_i32, %c0_i32_0 : i32, i32
  }
  func.func @transform_19(%arg0: i32) -> (i32, i32) {
    %c0_i32 = arith.constant 0 : i32
    %c0_i32_0 = arith.constant 0 : i32
    %c0_i32_1 = arith.constant 0 : i32
    return %c0_i32, %c0_i32_0 : i32, i32
  }
  func.func @transform_20(%arg0: i32) -> (i32, i32, i32) {
    %c0_i32 = arith.constant 0 : i32
    %c0_i32_0 = arith.constant 0 : i32
    %c0_i32_1 = arith.constant 0 : i32
    return %arg0, %c0_i32, %c0_i32_0 : i32, i32, i32
  }
}

</mosaic_0001>

<bundles_post_ra>
// kernel: forward.1
= control target key start
LH: loop header
LB: loop body
LE: loop exit
PB: predicated region body
PF: predicated region fallthrough
CT: control target
= control target key end

     0   :  { %s4569_s23 = smov 0   ;;  %s7831_s0 = inlined_call_operand.vmem [shape: f32[2,1,500], index: 0, kind: input, shape index: {}]   ;;  %s7832_s1 = inlined_call_operand.vmem [shape: f32[3,16,1], index: 1, kind: input, shape index: {}]   ;;  %s7833_s2 = inlined_call_operand.vmem [shape: f32[16,1], index: 2, kind: input, shape index: {}]   ;;  %s7834_s3 = inlined_call_operand.vmem [shape: f32[3,500,167], index: 3, kind: input, shape index: {}]   ;;  %s7835_s4 = inlined_call_operand.vmem [shape: f32[2,167,83], index: 4, kind: input, shape index: {}]   ;;  %s7836_s5 = inlined_call_operand.vmem [shape: f32[3,8,16], index: 5, kind: input, shape index: {}]   ;;  %s7837_s6 = inlined_call_operand.vmem [shape: f32[8,1], index: 6, kind: input, shape index: {}]   ;;  %s7838_s7 = inlined_call_operand.vmem [shape: f32[3,83,42], index: 7, kind: input, shape index: {}]   ;;  %s7839_s8 = inlined_call_operand.vmem [shape: f32[2,42,41], index: 8, kind: input, shape index: {}]   ;;  %s7840_s9 = inlined_call_operand.vmem [shape: f32[3,16,8], index: 9, kind: input, shape index: {}]   ;;  %s7841_s10 = inlined_call_operand.vmem [shape: f32[16,1], index: 10, kind: input, shape index: {}]   ;;  %s7842_s11 = inlined_call_operand.vmem [shape: f32[3,41,83], index: 11, kind: input, shape index: {}]   ;;  %s7843_s12 = inlined_call_operand.vmem [shape: f32[5,8,16], index: 12, kind: input, shape index: {}]   ;;  %s7844_s13 = inlined_call_operand.vmem [shape: f32[8,1], index: 13, kind: input, shape index: {}]   ;;  %s7845_s14 = inlined_call_operand.vmem [shape: f32[5,83,249], index: 14, kind: input, shape index: {}]   ;;  %s7846_s15 = inlined_call_operand.vmem [shape: f32[1,1,8], index: 15, kind: input, shape index: {}]   ;;  %s7847_s16 = inlined_call_operand.<no memory space> [shape: f32[1,1], index: 16, kind: input, shape index: {}]   ;;  %s7848_s17 = inlined_call_operand.vmem [shape: f32[1,249,495], index: 17, kind: input, shape index: {}]   ;;  %s7849_s18 = inlined_call_operand.vmem [shape: f32[495,500], index: 18, kind: input, shape index: {}]   ;;  %s7850_s19 = inlined_call_operand.vmem [shape: f32[1,500], index: 19, kind: input, shape index: {}]   ;;  %s7851_s20 = inlined_call_operand.vmem [shape: f32[2,1,500], index: 20, kind: output, shape index: {}]  }
   0x1   :  { %7857 = sst [smem:[#allocation3_spill]] %s7831_s0  ;;  %v25_v0 = vstv %s7847_s16 }
   0x2   :  { %7858 = sst [smem:[#allocation4_spill]] %s7832_s1  ;;  %26 = vst [vmem:[#allocation2] sm:$0x1] %v25_v0 }
   0x3   :  { %7859 = sst [smem:[#allocation5_spill]] %s7833_s2 }
   0x4   :  { %7860 = sst [smem:[#allocation6_spill]] %s7834_s3 }
   0x5   :  { %7861 = sst [smem:[#allocation7_spill]] %s7835_s4 }
   0x6 LB: > { %s3910_s24 = sadd.s32 4294967295, %s4458_s23   ;;  %p3914_p0 = scmp.ge.s32.totalorder %s4458_s23, 1  ;;  %s4458_s23 = sphi %s4569_s23, %s32_s23  }
   0x7   : > { %p563_p1 = scmp.lt.s32.totalorder %s4458_s23, 3 }
   0x9   : > { %p564_p2 = pnand %p3914_p0, %p563_p1 }
   0xa   : > { %s7862_s3 = sld [smem:[#allocation6_spill]] (!%p564_p2)  ;;  %p4827_p3 = scmp.lt.s32.totalorder (!%p564_p2), %s3910_s24, 1 }
   0xb   : > { %567 = sbr.rel (%p564_p2) target bundleno = 2288 (0x8f0), region = 100  ;;  %s7864_s30 = sld [smem:[#allocation3_spill]] (!%p564_p2) }
   0xc   : > { %s7865_s1 = sld [smem:[#allocation4_spill]] (!%p564_p2) }
   0xd   : > { %s7866_s28 = sld [smem:[#allocation5_spill]] (!%p564_p2) }
   0xe   : > { %s7867_s0 = sld [smem:[#allocation7_spill]] (!%p564_p2) }
  0x10   : > { %v722_v1 = vld [vmem:[%s7862_s3 + $0x2f0] sm:$0xff]  ;;  %v752_v2 = vld [vmem:[%s7862_s3 + $0x3e0] sm:$0xf]  ;;  %vm765_vm0 = vcmask 1043456   ;;  %v659_v59 = vld [vmem:[%s7862_s3 + $0xf8] sm:$0xff]  ;;  %s7870_s24 = smov (!%p4827_p3, %s3910_s24), 1 }
  0x11   : > { %v720_v3 = vld [vmem:[%s7862_s3 + $0x2e0] sm:$0xff]  ;;  %812 = vmatpush.msra.mxu2 %v722_v1  ;;  %3917 = vmatpush.msk.msra.mxu3 %vm765_vm0, %v752_v2  ;;  %v750_v4 = vld [vmem:[%s7862_s3 + $0x3d0] sm:$0xff]  ;;  %v657_v63 = vld [vmem:[%s7862_s3 + $0xe8] sm:$0xff]  ;;  %s7856_s26 = sshll.u32 %s7870_s24, 2  ;;  %vm762_vm1 = vcmask 949248   ;;  %vm1630_vm2 = vcmask 1046528  }
  0x12   : > { %v658_v5 = vld [vmem:[%s7862_s3 + $0xf0] sm:$0xff]  ;;  %v748_v8 = vld [vmem:[%s7862_s3 + $0x3c0] sm:$0xff]  ;;  %v753_v0 = vld [vmem:[%s7862_s3 + $0x3e8] sm:$0xf]  ;;  %s622_s4 = scalar_lea.vmem %s7864_s30, %s7856_s26  ;;  %vm1623_vm3 = vcmask 318464   ;;  %vm1771_vm4 = vcmask 1042432  }
  0x13   : > { %v690_v6 = vld [vmem:[%s7862_s3 + $0x1f0] sm:$0xff]  ;;  %772 = vmatpush.msra.mxu0 %v658_v5  ;;  %v656_v9 = vld [vmem:[%s7862_s3 + $0xe0] sm:$0xff]  ;;  %813 = vmatpush.msra.mxu2 %v720_v3  ;;  %v655_v3 = vld [vmem:[%s7862_s3 + $0xd8] sm:$0xff]  ;;  %vm1764_vm5 = vcmask 678912   ;;  %vm1839_vm6 = vcmask 130048   ;;  %vm1968_vm7 = vcmask 1041408  }
  0x14   : > { %792 = vmatpush.msra.mxu1 %v690_v6  ;;  %v718_v7 = vld [vmem:[%s7862_s3 + $0x2d0] sm:$0xff]  ;;  %834 = vmatpush.msra.mxu3 %v750_v4  ;;  %v688_v10 = vld [vmem:[%s7862_s3 + $0x1e0] sm:$0xff]  ;;  %v751_v4 = vld [vmem:[%s7862_s3 + $0x3d8] sm:$0xff]  ;;  %vm2033_vm8 = vcmask 1040384   ;;  %vm1964_vm9 = vcmask 343040   ;;  %vm2029_vm10 = vcmask 334848  }
  0x15   : > { %v716_v11 = vld [vmem:[%s7862_s3 + $0x2c0] sm:$0xff]  ;;  %773 = vmatpush.msra.mxu0 %v656_v9  ;;  %v746_v12 = vld [vmem:[%s7862_s3 + $0x3b0] sm:$0xff]  ;;  %814 = vmatpush.msra.mxu2 %v718_v7  ;;  %v691_v5 = vld [vmem:[%s7862_s3 + $0x1f8] sm:$0xff]  ;;  %vm2092_vm11 = vcmask 64512   ;;  %vm2979_vm12 = vcmask 990208   ;;  %vm3504_vm13 = vcmask 908288  }
  0x16   : > { %793 = vmatpush.msra.mxu1 %v688_v10  ;;  %v654_v13 = vld [vmem:[%s7862_s3 + $0xd0] sm:$0xff]  ;;  %835 = vmatpush.msra.mxu3 %v748_v8  ;;  %v652_v15 = vld [vmem:[%s7862_s3 + $0xc0] sm:$0xff]  ;;  %v723_v6 = vld [vmem:[%s7862_s3 + $0x2f8] sm:$0xff]  ;;  %vm3848_vm14 = vcmask 1042434   ;;  %s7868_s2 = sshll.u32 %s7870_s24, 2 }
  0x17   : > { %v686_v14 = vld [vmem:[%s7862_s3 + $0x1d0] sm:$0xff]  ;;  %v684_v16 = vld [vmem:[%s7862_s3 + $0x1c0] sm:$0xff]  ;;  %774 = vmatpush.msra.mxu0 %v654_v13  ;;  %815 = vmatpush.msra.mxu2 %v716_v11  ;;  %v653_v7 = vld [vmem:[%s7862_s3 + $0xc8] sm:$0xff]  ;;  %s626_s16 = scalar_lea.vmem %s7851_s20, %s7868_s2 }
  0x18   : > { %794 = vmatpush.msra.mxu1 %v686_v14  ;;  %v714_v17 = vld [vmem:[%s7862_s3 + $0x2b0] sm:$0xff]  ;;  %v744_v18 = vld [vmem:[%s7862_s3 + $0x3a0] sm:$0xff]  ;;  %836 = vmatpush.msra.mxu3 %v746_v12  ;;  %v749_v8 = vld [vmem:[%s7862_s3 + $0x3c8] sm:$0xff] }
  0x19   : > { %v650_v19 = vld [vmem:[%s7862_s3 + $0xb0] sm:$0xff]  ;;  %775 = vmatpush.msra.mxu0 %v652_v15  ;;  %v712_v21 = vld [vmem:[%s7862_s3 + $0x2a0] sm:$0xff]  ;;  %816 = vmatpush.msra.mxu2 %v714_v17  ;;  %v689_v9 = vld [vmem:[%s7862_s3 + $0x1e8] sm:$0xff] }
  0x1a   : > { %v682_v20 = vld [vmem:[%s7862_s3 + $0x1b0] sm:$0xff]  ;;  %795 = vmatpush.msra.mxu1 %v684_v16  ;;  %837 = vmatpush.msra.mxu3 %v744_v18  ;;  %v648_v23 = vld [vmem:[%s7862_s3 + $0xa0] sm:$0xff]  ;;  %v721_v10 = vld [vmem:[%s7862_s3 + $0x2e8] sm:$0xff] }
  0x1b   : > { %v742_v22 = vld [vmem:[%s7862_s3 + $0x390] sm:$0xff]  ;;  %v680_v24 = vld [vmem:[%s7862_s3 + $0x1a0] sm:$0xff]  ;;  %776 = vmatpush.msra.mxu0 %v650_v19  ;;  %817 = vmatpush.msra.mxu2 %v712_v21  ;;  %v651_v11 = vld [vmem:[%s7862_s3 + $0xb8] sm:$0xff] }
  0x1c   : > { %796 = vmatpush.msra.mxu1 %v682_v20  ;;  %v710_v25 = vld [vmem:[%s7862_s3 + $0x290] sm:$0xff]  ;;  %v740_v26 = vld [vmem:[%s7862_s3 + $0x380] sm:$0xff]  ;;  %838 = vmatpush.msra.mxu3 %v742_v22  ;;  %v747_v12 = vld [vmem:[%s7862_s3 + $0x3b8] sm:$0xff] }
  0x1d   : > { %v646_v27 = vld [vmem:[%s7862_s3 + $0x90] sm:$0xff]  ;;  %777 = vmatpush.msra.mxu0 %v648_v23  ;;  %v708_v29 = vld [vmem:[%s7862_s3 + $0x280] sm:$0xff]  ;;  %818 = vmatpush.msra.mxu2 %v710_v25  ;;  %v687_v13 = vld [vmem:[%s7862_s3 + $0x1d8] sm:$0xff] }
  0x1e   : > { %v678_v28 = vld [vmem:[%s7862_s3 + $0x190] sm:$0xff]  ;;  %797 = vmatpush.msra.mxu1 %v680_v24  ;;  %839 = vmatpush.msra.mxu3 %v740_v26  ;;  %v644_v31 = vld [vmem:[%s7862_s3 + $0x80] sm:$0xff]  ;;  %v719_v14 = vld [vmem:[%s7862_s3 + $0x2d8] sm:$0xff] }
  0x1f   : > { %v738_v30 = vld [vmem:[%s7862_s3 + $0x370] sm:$0xff]  ;;  %v676_v32 = vld [vmem:[%s7862_s3 + $0x180] sm:$0xff]  ;;  %778 = vmatpush.msra.mxu0 %v646_v27  ;;  %819 = vmatpush.msra.mxu2 %v708_v29  ;;  %v649_v15 = vld [vmem:[%s7862_s3 + $0xa8] sm:$0xff] }
  0x20   : > { %798 = vmatpush.msra.mxu1 %v678_v28  ;;  %v706_v33 = vld [vmem:[%s7862_s3 + $0x270] sm:$0xff]  ;;  %v736_v34 = vld [vmem:[%s7862_s3 + $0x360] sm:$0xff]  ;;  %840 = vmatpush.msra.mxu3 %v738_v30  ;;  %v745_v16 = vld [vmem:[%s7862_s3 + $0x3a8] sm:$0xff] }
  0x21   : > { %v642_v35 = vld [vmem:[%s7862_s3 + $0x70] sm:$0xff]  ;;  %779 = vmatpush.msra.mxu0 %v644_v31  ;;  %v704_v37 = vld [vmem:[%s7862_s3 + $0x260] sm:$0xff]  ;;  %820 = vmatpush.msra.mxu2 %v706_v33  ;;  %v685_v17 = vld [vmem:[%s7862_s3 + $0x1c8] sm:$0xff] }
  0x22   : > { %v674_v36 = vld [vmem:[%s7862_s3 + $0x170] sm:$0xff]  ;;  %799 = vmatpush.msra.mxu1 %v676_v32  ;;  %841 = vmatpush.msra.mxu3 %v736_v34  ;;  %v640_v39 = vld [vmem:[%s7862_s3 + $0x60] sm:$0xff]  ;;  %v717_v18 = vld [vmem:[%s7862_s3 + $0x2c8] sm:$0xff] }
  0x23   : > { %v734_v38 = vld [vmem:[%s7862_s3 + $0x350] sm:$0xff]  ;;  %v672_v40 = vld [vmem:[%s7862_s3 + $0x160] sm:$0xff]  ;;  %780 = vmatpush.msra.mxu0 %v642_v35  ;;  %821 = vmatpush.msra.mxu2 %v704_v37  ;;  %v647_v19 = vld [vmem:[%s7862_s3 + $0x98] sm:$0xff] }
  0x24   : > { %800 = vmatpush.msra.mxu1 %v674_v36  ;;  %v702_v41 = vld [vmem:[%s7862_s3 + $0x250] sm:$0xff]  ;;  %v732_v42 = vld [vmem:[%s7862_s3 + $0x340] sm:$0xff]  ;;  %842 = vmatpush.msra.mxu3 %v734_v38  ;;  %v743_v20 = vld [vmem:[%s7862_s3 + $0x398] sm:$0xff] }
  0x25   : > { %v638_v43 = vld [vmem:[%s7862_s3 + $0x50] sm:$0xff]  ;;  %781 = vmatpush.msra.mxu0 %v640_v39  ;;  %v700_v45 = vld [vmem:[%s7862_s3 + $0x240] sm:$0xff]  ;;  %822 = vmatpush.msra.mxu2 %v702_v41  ;;  %v683_v21 = vld [vmem:[%s7862_s3 + $0x1b8] sm:$0xff] }
  0x26   : > { %v670_v44 = vld [vmem:[%s7862_s3 + $0x150] sm:$0xff]  ;;  %801 = vmatpush.msra.mxu1 %v672_v40  ;;  %843 = vmatpush.msra.mxu3 %v732_v42  ;;  %v636_v47 = vld [vmem:[%s7862_s3 + $0x40] sm:$0xff]  ;;  %v715_v22 = vld [vmem:[%s7862_s3 + $0x2b8] sm:$0xff] }
  0x27   : > { %v730_v46 = vld [vmem:[%s7862_s3 + $0x330] sm:$0xff]  ;;  %v668_v48 = vld [vmem:[%s7862_s3 + $0x140] sm:$0xff]  ;;  %782 = vmatpush.msra.mxu0 %v638_v43  ;;  %823 = vmatpush.msra.mxu2 %v700_v45  ;;  %v645_v23 = vld [vmem:[%s7862_s3 + $0x88] sm:$0xff] }
  0x28   : > { %802 = vmatpush.msra.mxu1 %v670_v44  ;;  %v698_v49 = vld [vmem:[%s7862_s3 + $0x230] sm:$0xff]  ;;  %v728_v50 = vld [vmem:[%s7862_s3 + $0x320] sm:$0xff]  ;;  %844 = vmatpush.msra.mxu3 %v730_v46  ;;  %v741_v24 = vld [vmem:[%s7862_s3 + $0x388] sm:$0xff] }
  0x29   : > { %v634_v51 = vld [vmem:[%s7862_s3 + $0x30] sm:$0xff]  ;;  %783 = vmatpush.msra.mxu0 %v636_v47  ;;  %v696_v53 = vld [vmem:[%s7862_s3 + $0x220] sm:$0xff]  ;;  %824 = vmatpush.msra.mxu2 %v698_v49  ;;  %v681_v25 = vld [vmem:[%s7862_s3 + $0x1a8] sm:$0xff] }
  0x2a   : > { %v666_v52 = vld [vmem:[%s7862_s3 + $0x130] sm:$0xff]  ;;  %803 = vmatpush.msra.mxu1 %v668_v48  ;;  %845 = vmatpush.msra.mxu3 %v728_v50  ;;  %v632_v55 = vld [vmem:[%s7862_s3 + $0x20] sm:$0xff]  ;;  %v713_v26 = vld [vmem:[%s7862_s3 + $0x2a8] sm:$0xff] }
  0x2b   : > { %v726_v54 = vld [vmem:[%s7862_s3 + $0x310] sm:$0xff]  ;;  %v664_v56 = vld [vmem:[%s7862_s3 + $0x120] sm:$0xff]  ;;  %784 = vmatpush.msra.mxu0 %v634_v51  ;;  %825 = vmatpush.msra.mxu2 %v696_v53  ;;  %v643_v27 = vld [vmem:[%s7862_s3 + $0x78] sm:$0xff] }
  0x2c   : > { %804 = vmatpush.msra.mxu1 %v666_v52  ;;  %v694_v57 = vld [vmem:[%s7862_s3 + $0x210] sm:$0xff]  ;;  %v724_v58 = vld [vmem:[%s7862_s3 + $0x300] sm:$0xff]  ;;  %846 = vmatpush.msra.mxu3 %v726_v54  ;;  %v739_v28 = vld [vmem:[%s7862_s3 + $0x378] sm:$0xff] }
  0x2d   : > { %v630_v60 = vld [vmem:[%s7862_s3 + $0x10] sm:$0xff]  ;;  %785 = vmatpush.msra.mxu0 %v632_v55  ;;  %v692_v61 = vld [vmem:[%s7862_s3 + $0x200] sm:$0xff]  ;;  %826 = vmatpush.msra.mxu2 %v694_v57  ;;  %v679_v29 = vld [vmem:[%s7862_s3 + $0x198] sm:$0xff] }
  0x2e   : > { %805 = vmatpush.msra.mxu1 %v664_v56  ;;  %v662_v62 = vld [vmem:[%s7862_s3 + $0x110] sm:$0xff]  ;;  %847 = vmatpush.msra.mxu3 %v724_v58  ;;  %v628_v1 = vld [vmem:[%s7862_s3] sm:$0xff]  ;;  %v711_v30 = vld [vmem:[%s7862_s3 + $0x298] sm:$0xff] }
  0x2f   : > { %786 = vmatpush.msra.mxu0 %v630_v60  ;;  %v660_v2 = vld [vmem:[%s7862_s3 + $0x100] sm:$0xff]  ;;  %827 = vmatpush.msra.mxu2 %v692_v61  ;;  %v641_v31 = vld [vmem:[%s7862_s3 + $0x68] sm:$0xff]  ;;  %v639_v35 = vld [vmem:[%s7862_s3 + $0x58] sm:$0xff] }
  0x30   : > { %852 = vmatpush.msrb.mxu3 %v659_v59  ;;  %806 = vmatpush.msra.mxu1 %v662_v62  ;;  %v737_v32 = vld [vmem:[%s7862_s3 + $0x368] sm:$0xff]  ;;  %v735_v36 = vld [vmem:[%s7862_s3 + $0x358] sm:$0xff]  ;;  %v627_v47 = vld [vmem:[%s622_s4] sm:$0xf] }
  0x31   : > { %3919 = vmatpush.msk.msrb.mxu2 %vm765_vm0, %v753_v0  ;;  %787 = vmatpush.msra.mxu0 %v628_v1  ;;  %v677_v33 = vld [vmem:[%s7862_s3 + $0x188] sm:$0xff]  ;;  %v675_v37 = vld [vmem:[%s7862_s3 + $0x178] sm:$0xff]  ;;  %v4945_v54 = vperm.slane %v627_v47, 2  ;;  %v4956_v58 = vperm.slane %v627_v47, 3  ;;  %v3951_v60 = vld [vmem:[%s7862_s3 + $0x4e0] sm:$0xff]  ;;  %v4974_v0 = vperm.slane %v627_v47, 0 }
  0x32   : > { %853 = vmatpush.msrb.mxu3 %v657_v63  ;;  %807 = vmatpush.msra.mxu1 %v660_v2  ;;  %v709_v34 = vld [vmem:[%s7862_s3 + $0x288] sm:$0xff]  ;;  %v707_v38 = vld [vmem:[%s7862_s3 + $0x278] sm:$0xff]  ;;  %v3983_v61 = vld [vmem:[%s7862_s3 + $0x5e0] sm:$0xff]  ;;  %v4976_v1 = vperm.slane %v627_v47, 1 }
  0x33   : > { %914 = vmatpush.msrb.mxu2 %v751_v4  ;;  %872 = vmatpush.msrb.mxu0 %v691_v5  ;;  %v637_v39 = vld [vmem:[%s7862_s3 + $0x48] sm:$0xff]  ;;  %v635_v43 = vld [vmem:[%s7862_s3 + $0x38] sm:$0xff]  ;;  %v3949_v2 = vld [vmem:[%s7862_s3 + $0x4d0] sm:$0xff] }
  0x34   : > { %854 = vmatpush.msrb.mxu3 %v655_v3  ;;  %892 = vmatpush.msrb.mxu1 %v723_v6  ;;  %v733_v40 = vld [vmem:[%s7862_s3 + $0x348] sm:$0xff]  ;;  %v731_v44 = vld [vmem:[%s7862_s3 + $0x338] sm:$0xff]  ;;  %v3981_v3 = vld [vmem:[%s7862_s3 + $0x5d0] sm:$0xff] }
  0x35   : > { %915 = vmatpush.msrb.mxu2 %v749_v8  ;;  %873 = vmatpush.msrb.mxu0 %v689_v9  ;;  %v673_v41 = vld [vmem:[%s7862_s3 + $0x168] sm:$0xff]  ;;  %v671_v45 = vld [vmem:[%s7862_s3 + $0x158] sm:$0xff]  ;;  %v3947_v6 = vld [vmem:[%s7862_s3 + $0x4c0] sm:$0xff] }
  0x36   : > { %855 = vmatpush.msrb.mxu3 %v653_v7  ;;  %893 = vmatpush.msrb.mxu1 %v721_v10  ;;  %v705_v42 = vld [vmem:[%s7862_s3 + $0x268] sm:$0xff]  ;;  %v703_v46 = vld [vmem:[%s7862_s3 + $0x258] sm:$0xff]  ;;  %v3979_v7 = vld [vmem:[%s7862_s3 + $0x5c0] sm:$0xff] }
  0x37   : > { %916 = vmatpush.msrb.mxu2 %v747_v12  ;;  %874 = vmatpush.msrb.mxu0 %v687_v13  ;;  %v633_v48 = vld [vmem:[%s7862_s3 + $0x28] sm:$0xff]  ;;  %v631_v52 = vld [vmem:[%s7862_s3 + $0x18] sm:$0xff]  ;;  %v3945_v10 = vld [vmem:[%s7862_s3 + $0x4b0] sm:$0xff] }
  0x38   : > { %856 = vmatpush.msrb.mxu3 %v651_v11  ;;  %894 = vmatpush.msrb.mxu1 %v719_v14  ;;  %v729_v49 = vld [vmem:[%s7862_s3 + $0x328] sm:$0xff]  ;;  %v727_v53 = vld [vmem:[%s7862_s3 + $0x318] sm:$0xff]  ;;  %v3977_v11 = vld [vmem:[%s7862_s3 + $0x5b0] sm:$0xff] }
  0x39   : > { %917 = vmatpush.msrb.mxu2 %v745_v16  ;;  %875 = vmatpush.msrb.mxu0 %v685_v17  ;;  %v669_v50 = vld [vmem:[%s7862_s3 + $0x148] sm:$0xff]  ;;  %v667_v55 = vld [vmem:[%s7862_s3 + $0x138] sm:$0xff]  ;;  %v4015_v12 = vld [vmem:[%s7862_s3 + $0x6e0] sm:$0xff] }
  0x3a   : > { %857 = vmatpush.msrb.mxu3 %v649_v15  ;;  %895 = vmatpush.msrb.mxu1 %v717_v18  ;;  %v701_v51 = vld [vmem:[%s7862_s3 + $0x248] sm:$0xff]  ;;  %v699_v57 = vld [vmem:[%s7862_s3 + $0x238] sm:$0xff]  ;;  %v4045_v13 = vld [vmem:[%s7862_s3 + $0x7d0] sm:$0xf] }
  0x3b   : > { %918 = vmatpush.msrb.mxu2 %v743_v20  ;;  %876 = vmatpush.msrb.mxu0 %v683_v21  ;;  %v629_v56 = vld [vmem:[%s7862_s3 + $0x8] sm:$0xff]  ;;  %v663_v4 = vld [vmem:[%s7862_s3 + $0x118] sm:$0xff]  ;;  %v3943_v14 = vld [vmem:[%s7862_s3 + $0x4a0] sm:$0xff] }
  0x3c   : > { %858 = vmatpush.msrb.mxu3 %v647_v19  ;;  %896 = vmatpush.msrb.mxu1 %v715_v22  ;;  %v725_v59 = vld [vmem:[%s7862_s3 + $0x308] sm:$0xff]  ;;  %v695_v5 = vld [vmem:[%s7862_s3 + $0x218] sm:$0xff]  ;;  %v3975_v15 = vld [vmem:[%s7862_s3 + $0x5a0] sm:$0xff] }
  0x3d   : > { %919 = vmatpush.msrb.mxu2 %v741_v24  ;;  %877 = vmatpush.msrb.mxu0 %v681_v25  ;;  %v665_v62 = vld [vmem:[%s7862_s3 + $0x128] sm:$0xff]  ;;  %v4013_v16 = vld [vmem:[%s7862_s3 + $0x6d0] sm:$0xff]  ;;  %v4043_v17 = vld [vmem:[%s7862_s3 + $0x7c0] sm:$0xff] }
  0x3e   : > { %859 = vmatpush.msrb.mxu3 %v645_v23  ;;  %897 = vmatpush.msrb.mxu1 %v713_v26  ;;  %v697_v63 = vld [vmem:[%s7862_s3 + $0x228] sm:$0xff]  ;;  %v3941_v18 = vld [vmem:[%s7862_s3 + $0x490] sm:$0xff]  ;;  %v4011_v20 = vld [vmem:[%s7862_s3 + $0x6c0] sm:$0xff] }
  0x3f   : > { %920 = vmatpush.msrb.mxu2 %v739_v28  ;;  %878 = vmatpush.msrb.mxu0 %v679_v29  ;;  %v661_v8 = vld [vmem:[%s7862_s3 + $0x108] sm:$0xff]  ;;  %v3973_v19 = vld [vmem:[%s7862_s3 + $0x590] sm:$0xff]  ;;  %v3939_v22 = vld [vmem:[%s7862_s3 + $0x480] sm:$0xff] }
  0x40   : > { %860 = vmatpush.msrb.mxu3 %v643_v27  ;;  %898 = vmatpush.msrb.mxu1 %v711_v30  ;;  %v693_v9 = vld [vmem:[%s7862_s3 + $0x208] sm:$0xff]  ;;  %v4041_v21 = vld [vmem:[%s7862_s3 + $0x7b0] sm:$0xff]  ;;  %v3971_v23 = vld [vmem:[%s7862_s3 + $0x580] sm:$0xff] }
  0x41   : > { %921 = vmatpush.msrb.mxu2 %v737_v32  ;;  %879 = vmatpush.msrb.mxu0 %v677_v33  ;;  %v4009_v24 = vld [vmem:[%s7862_s3 + $0x6b0] sm:$0xff]  ;;  %v4039_v25 = vld [vmem:[%s7862_s3 + $0x7a0] sm:$0xff] }
  0x42   : > { %861 = vmatpush.msrb.mxu3 %v641_v31  ;;  %899 = vmatpush.msrb.mxu1 %v709_v34  ;;  %v3937_v26 = vld [vmem:[%s7862_s3 + $0x470] sm:$0xff]  ;;  %v4007_v28 = vld [vmem:[%s7862_s3 + $0x6a0] sm:$0xff] }
  0x43   : > { %922 = vmatpush.msrb.mxu2 %v735_v36  ;;  %880 = vmatpush.msrb.mxu0 %v675_v37  ;;  %v3969_v27 = vld [vmem:[%s7862_s3 + $0x570] sm:$0xff]  ;;  %v3935_v30 = vld [vmem:[%s7862_s3 + $0x460] sm:$0xff] }
  0x44   : > { %862 = vmatpush.msrb.mxu3 %v639_v35  ;;  %900 = vmatpush.msrb.mxu1 %v707_v38  ;;  %v4037_v29 = vld [vmem:[%s7862_s3 + $0x790] sm:$0xff]  ;;  %v3967_v31 = vld [vmem:[%s7862_s3 + $0x560] sm:$0xff] }
  0x45   : > { %923 = vmatpush.msrb.mxu2 %v733_v40  ;;  %881 = vmatpush.msrb.mxu0 %v673_v41  ;;  %v4005_v32 = vld [vmem:[%s7862_s3 + $0x690] sm:$0xff]  ;;  %v4035_v33 = vld [vmem:[%s7862_s3 + $0x780] sm:$0xff] }
  0x46   : > { %863 = vmatpush.msrb.mxu3 %v637_v39  ;;  %901 = vmatpush.msrb.mxu1 %v705_v42  ;;  %v3933_v34 = vld [vmem:[%s7862_s3 + $0x450] sm:$0xff]  ;;  %v4003_v36 = vld [vmem:[%s7862_s3 + $0x680] sm:$0xff] }
  0x47   : > { %924 = vmatpush.msrb.mxu2 %v731_v44  ;;  %882 = vmatpush.msrb.mxu0 %v671_v45  ;;  %v3965_v35 = vld [vmem:[%s7862_s3 + $0x550] sm:$0xff]  ;;  %v3931_v38 = vld [vmem:[%s7862_s3 + $0x440] sm:$0xff] }
  0x48   : > { %864 = vmatpush.msrb.mxu3 %v635_v43  ;;  %902 = vmatpush.msrb.mxu1 %v703_v46  ;;  %v4033_v37 = vld [vmem:[%s7862_s3 + $0x770] sm:$0xff]  ;;  %v3963_v39 = vld [vmem:[%s7862_s3 + $0x540] sm:$0xff]  ;;  %v4460_v43 = vmov 0  }
  0x49   : > { %925 = vmatpush.msrb.mxu2 %v729_v49  ;;  %883 = vmatpush.msrb.mxu0 %v669_v50  ;;  %v4001_v40 = vld [vmem:[%s7862_s3 + $0x670] sm:$0xff]  ;;  %v4031_v41 = vld [vmem:[%s7862_s3 + $0x760] sm:$0xff] }
  0x4a   : > { %865 = vmatpush.msrb.mxu3 %v633_v48  ;;  %903 = vmatpush.msrb.mxu1 %v701_v51  ;;  %v932_v42 = vld [vmem:[%s7865_s1] sm:$0xff]  ;;  %v3929_v44 = vld [vmem:[%s7862_s3 + $0x430] sm:$0xff] }
  0x4b   : > { %926 = vmatpush.msrb.mxu2 %v727_v53  ;;  %884 = vmatpush.msrb.mxu0 %v667_v55  ;;  %v3961_v45 = vld [vmem:[%s7862_s3 + $0x530] sm:$0xff]  ;;  %v3999_v46 = vld [vmem:[%s7862_s3 + $0x660] sm:$0xff] }
  0x4c   : > { %866 = vmatpush.msrb.mxu3 %v631_v52  ;;  %828 = vmatmul.f32.vlgmr.msra.gmra.mxu2 %v4945_v54  ;;  %v4029_v47 = vld [vmem:[%s7862_s3 + $0x750] sm:$0xff]  ;;  %v3927_v48 = vld [vmem:[%s7862_s3 + $0x420] sm:$0xff] }
  0x4d   : > { %904 = vmatpush.msrb.mxu1 %v699_v57  ;;  %927 = vmatpush.msrb.mxu2 %v725_v59  ;;  %v3959_v49 = vld [vmem:[%s7862_s3 + $0x520] sm:$0xff]  ;;  %v3997_v50 = vld [vmem:[%s7862_s3 + $0x650] sm:$0xff] }
  0x4e   : > { %867 = vmatpush.msrb.mxu3 %v629_v56  ;;  %885 = vmatpush.msrb.mxu0 %v665_v62  ;;  %v4027_v51 = vld [vmem:[%s7862_s3 + $0x740] sm:$0xff]  ;;  %v3925_v52 = vld [vmem:[%s7862_s3 + $0x410] sm:$0xff] }
  0x4f   : > { %3918 = vmatmul.msk.f32.vlgmr.msra.gmra.mxu3 %vm762_vm1, %v4956_v58  ;;  %1083 = vmatpush.msra.mxu2 %v3951_v60  ;;  %v3957_v53 = vld [vmem:[%s7862_s3 + $0x510] sm:$0xff]  ;;  %v3995_v55 = vld [vmem:[%s7862_s3 + $0x640] sm:$0xff] }
  0x50   : > { %1103 = vmatpush.msra.mxu3 %v3983_v61  ;;  %905 = vmatpush.msrb.mxu1 %v697_v63  ;;  %v4025_v56 = vld [vmem:[%s7862_s3 + $0x730] sm:$0xff]  ;;  %v3923_v57 = vld [vmem:[%s7862_s3 + $0x400] sm:$0xff] }
  0x51   : > { %788 = vmatmul.f32.vlgmr.msra.gmra.mxu0 %v4974_v0  ;;  %808 = vmatmul.f32.vlgmr.msra.gmra.mxu1 %v4976_v1  ;;  %v3955_v59 = vld [vmem:[%s7862_s3 + $0x500] sm:$0xff]  ;;  %v3993_v60 = vld [vmem:[%s7862_s3 + $0x630] sm:$0xff] }
  0x52   : > { %1084 = vmatpush.msra.mxu2 %v3949_v2  ;;  %1104 = vmatpush.msra.mxu3 %v3981_v3  ;;  %v4023_v61 = vld [vmem:[%s7862_s3 + $0x720] sm:$0xff]  ;;  %v3921_v62 = vld [vmem:[%s7862_s3 + $0x3f0] sm:$0xff] }
  0x53   : > { %886 = vmatpush.msrb.mxu0 %v663_v4  ;;  %906 = vmatpush.msrb.mxu1 %v695_v5  ;;  %v3953_v63 = vld [vmem:[%s7862_s3 + $0x4f0] sm:$0xff]  ;;  %v3991_v2 = vld [vmem:[%s7862_s3 + $0x620] sm:$0xff]  ;;  %v3984_v4 = vld [vmem:[%s7862_s3 + $0x5e8] sm:$0xff] }
  0x54   : > { %1085 = vmatpush.msra.mxu2 %v3947_v6  ;;  %1105 = vmatpush.msra.mxu3 %v3979_v7  ;;  %v4021_v3 = vld [vmem:[%s7862_s3 + $0x710] sm:$0xff]  ;;  %v4016_v5 = vld [vmem:[%s7862_s3 + $0x6e8] sm:$0xff]  ;;  %v4019_v7 = vld [vmem:[%s7862_s3 + $0x700] sm:$0xff] }
  0x55   : > { %887 = vmatpush.msrb.mxu0 %v661_v8  ;;  %907 = vmatpush.msrb.mxu1 %v693_v9  ;;  %v3989_v6 = vld [vmem:[%s7862_s3 + $0x610] sm:$0xff]  ;;  %v3982_v8 = vld [vmem:[%s7862_s3 + $0x5d8] sm:$0xff] }
  0x56   : > { %1086 = vmatpush.msra.mxu2 %v3945_v10  ;;  %1106 = vmatpush.msra.mxu3 %v3977_v11  ;;  %v4014_v9 = vld [vmem:[%s7862_s3 + $0x6d8] sm:$0xff]  ;;  %v3987_v10 = vld [vmem:[%s7862_s3 + $0x600] sm:$0xff]  ;;  %v4017_v11 = vld [vmem:[%s7862_s3 + $0x6f0] sm:$0xff] }
  0x57   : > { %1123 = vmatpush.msra.mxu0 %v4015_v12  ;;  %4047 = vmatpush.msk.msra.mxu1 %vm765_vm0, %v4045_v13  ;;  %v3952_v12 = vld [vmem:[%s7862_s3 + $0x4e8] sm:$0xff] }
  0x58   : > { %1087 = vmatpush.msra.mxu2 %v3943_v14  ;;  %1107 = vmatpush.msra.mxu3 %v3975_v15  ;;  %v3980_v13 = vld [vmem:[%s7862_s3 + $0x5c8] sm:$0xff]  ;;  %v3985_v15 = vld [vmem:[%s7862_s3 + $0x5f0] sm:$0xff] }
  0x59   : > { %1124 = vmatpush.msra.mxu0 %v4013_v16  ;;  %1145 = vmatpush.msra.mxu1 %v4043_v17  ;;  %v4012_v14 = vld [vmem:[%s7862_s3 + $0x6c8] sm:$0xff]  ;;  %v3950_v16 = vld [vmem:[%s7862_s3 + $0x4d8] sm:$0xff] }
  0x5a   : > { %1088 = vmatpush.msra.mxu2 %v3941_v18  ;;  %1108 = vmatpush.msra.mxu3 %v3973_v19  ;;  %v3978_v17 = vld [vmem:[%s7862_s3 + $0x5b8] sm:$0xff] }
  0x5b   : > { %1125 = vmatpush.msra.mxu0 %v4011_v20  ;;  %1146 = vmatpush.msra.mxu1 %v4041_v21  ;;  %v4010_v18 = vld [vmem:[%s7862_s3 + $0x6b8] sm:$0xff]  ;;  %v3948_v20 = vld [vmem:[%s7862_s3 + $0x4c8] sm:$0xff] }
  0x5c   : > { %1089 = vmatpush.msra.mxu2 %v3939_v22  ;;  %1109 = vmatpush.msra.mxu3 %v3971_v23  ;;  %v4046_v19 = vld [vmem:[%s7862_s3 + $0x7d8] sm:$0xf]  ;;  %v3976_v21 = vld [vmem:[%s7862_s3 + $0x5a8] sm:$0xff] }
  0x5d   : > { %1126 = vmatpush.msra.mxu0 %v4009_v24  ;;  %1147 = vmatpush.msra.mxu1 %v4039_v25  ;;  %v4008_v22 = vld [vmem:[%s7862_s3 + $0x6a8] sm:$0xff]  ;;  %v3946_v24 = vld [vmem:[%s7862_s3 + $0x4b8] sm:$0xff] }
  0x5e   : > { %1090 = vmatpush.msra.mxu2 %v3937_v26  ;;  %1110 = vmatpush.msra.mxu3 %v3969_v27  ;;  %v4044_v23 = vld [vmem:[%s7862_s3 + $0x7c8] sm:$0xff]  ;;  %v3974_v25 = vld [vmem:[%s7862_s3 + $0x598] sm:$0xff] }
  0x5f   : > { %1127 = vmatpush.msra.mxu0 %v4007_v28  ;;  %1148 = vmatpush.msra.mxu1 %v4037_v29  ;;  %v4006_v26 = vld [vmem:[%s7862_s3 + $0x698] sm:$0xff]  ;;  %v3944_v28 = vld [vmem:[%s7862_s3 + $0x4a8] sm:$0xff] }
  0x60   : > { %1091 = vmatpush.msra.mxu2 %v3935_v30  ;;  %1111 = vmatpush.msra.mxu3 %v3967_v31  ;;  %v4042_v27 = vld [vmem:[%s7862_s3 + $0x7b8] sm:$0xff]  ;;  %v3972_v29 = vld [vmem:[%s7862_s3 + $0x588] sm:$0xff] }
  0x61   : > { %1128 = vmatpush.msra.mxu0 %v4005_v32  ;;  %1149 = vmatpush.msra.mxu1 %v4035_v33  ;;  %v4004_v30 = vld [vmem:[%s7862_s3 + $0x688] sm:$0xff]  ;;  %v3942_v32 = vld [vmem:[%s7862_s3 + $0x498] sm:$0xff] }
  0x62   : > { %1092 = vmatpush.msra.mxu2 %v3933_v34  ;;  %1112 = vmatpush.msra.mxu3 %v3965_v35  ;;  %v4040_v31 = vld [vmem:[%s7862_s3 + $0x7a8] sm:$0xff]  ;;  %v3970_v34 = vld [vmem:[%s7862_s3 + $0x578] sm:$0xff] }
  0x63   : > { %1129 = vmatpush.msra.mxu0 %v4003_v36  ;;  %1150 = vmatpush.msra.mxu1 %v4033_v37  ;;  %v933_v33 = vld [vmem:[%s7865_s1 + $0x8] sm:$0xff]  ;;  %v4002_v35 = vld [vmem:[%s7862_s3 + $0x678] sm:$0xff] }
  0x64   : > { %4449 = vset.pattern.permute.xlu0 %v4460_v43  ;;  %1093 = vmatpush.msra.mxu2 %v3931_v38  ;;  %v4038_v36 = vld [vmem:[%s7862_s3 + $0x798] sm:$0xff]  ;;  %v3940_v37 = vld [vmem:[%s7862_s3 + $0x488] sm:$0xff] }
  0x65   : > { %1113 = vmatpush.msra.mxu3 %v3963_v39  ;;  %1130 = vmatpush.msra.mxu0 %v4001_v40  ;;  %v3968_v38 = vld [vmem:[%s7862_s3 + $0x568] sm:$0xff] }
  0x66   : > { %1151 = vmatpush.msra.mxu1 %v4031_v41  ;;  %936 = vperm.xlu0 %4449, %v932_v42   ;;  %v4000_v39 = vld [vmem:[%s7862_s3 + $0x668] sm:$0xff]  ;;  %v3938_v41 = vld [vmem:[%s7862_s3 + $0x478] sm:$0xff] }
  0x67   : > { %1094 = vmatpush.msra.mxu2 %v3929_v44  ;;  %1114 = vmatpush.msra.mxu3 %v3961_v45  ;;  %v4036_v40 = vld [vmem:[%s7862_s3 + $0x788] sm:$0xff]  ;;  %v3966_v42 = vld [vmem:[%s7862_s3 + $0x558] sm:$0xff] }
  0x68   : > { %1131 = vmatpush.msra.mxu0 %v3999_v46  ;;  %1152 = vmatpush.msra.mxu1 %v4029_v47  ;;  %v3998_v44 = vld [vmem:[%s7862_s3 + $0x658] sm:$0xff]  ;;  %v3936_v46 = vld [vmem:[%s7862_s3 + $0x468] sm:$0xff] }
  0x69   : > { %868 = vmatmul.f32.vlgmr.msrb.gmra.mxu3 %v4974_v0  ;;  %3920 = vmatmul.msk.f32.vlgmr.msrb.gmra.mxu2 %vm762_vm1, %v4956_v58  ;;  %v4034_v45 = vld [vmem:[%s7862_s3 + $0x778] sm:$0xff]  ;;  %v3964_v47 = vld [vmem:[%s7862_s3 + $0x548] sm:$0xff] }
  0x6a   : > { %1095 = vmatpush.msra.mxu2 %v3927_v48  ;;  %1115 = vmatpush.msra.mxu3 %v3959_v49  ;;  %v3996_v48 = vld [vmem:[%s7862_s3 + $0x648] sm:$0xff] }
  0x6b   : > { %1132 = vmatpush.msra.mxu0 %v3997_v50  ;;  %1153 = vmatpush.msra.mxu1 %v4027_v51  ;;  %v4032_v49 = vld [vmem:[%s7862_s3 + $0x768] sm:$0xff]  ;;  %v3934_v50 = vld [vmem:[%s7862_s3 + $0x458] sm:$0xff] }
  0x6c   : > { %1096 = vmatpush.msra.mxu2 %v3925_v52  ;;  %1116 = vmatpush.msra.mxu3 %v3957_v53  ;;  %v3962_v51 = vld [vmem:[%s7862_s3 + $0x538] sm:$0xff] }
  0x6d   : > { %1133 = vmatpush.msra.mxu0 %v3995_v55  ;;  %1154 = vmatpush.msra.mxu1 %v4025_v56  ;;  %v3994_v52 = vld [vmem:[%s7862_s3 + $0x638] sm:$0xff]  ;;  %v3932_v55 = vld [vmem:[%s7862_s3 + $0x448] sm:$0xff] }
  0x6e   : > { %1097 = vmatpush.msra.mxu2 %v3923_v57  ;;  %1117 = vmatpush.msra.mxu3 %v3955_v59  ;;  %v4030_v53 = vld [vmem:[%s7862_s3 + $0x758] sm:$0xff]  ;;  %v3960_v56 = vld [vmem:[%s7862_s3 + $0x528] sm:$0xff] }
  0x6f   : > { %1134 = vmatpush.msra.mxu0 %v3993_v60  ;;  %1155 = vmatpush.msra.mxu1 %v4023_v61  ;;  %v3992_v57 = vld [vmem:[%s7862_s3 + $0x628] sm:$0xff]  ;;  %v4051_v60 = vld [vmem:[%s7865_s1 + $0x10] sm:$0xff]  ;;  %v3930_v61 = vld [vmem:[%s7862_s3 + $0x438] sm:$0xff] }
  0x70   : > { %1098 = vmatpush.msra.mxu2 %v3921_v62  ;;  %1118 = vmatpush.msra.mxu3 %v3953_v63  ;;  %v4028_v59 = vld [vmem:[%s7862_s3 + $0x748] sm:$0xff]  ;;  %v3958_v62 = vld [vmem:[%s7862_s3 + $0x518] sm:$0xff] }
  0x71   : > { %1135 = vmatpush.msra.mxu0 %v3991_v2  ;;  %1156 = vmatpush.msra.mxu1 %v4021_v3  ;;  %v3990_v63 = vld [vmem:[%s7862_s3 + $0x618] sm:$0xff]  ;;  %v3928_v3 = vld [vmem:[%s7862_s3 + $0x428] sm:$0xff] }
  0x72   : > { %888 = vmatmul.f32.vlgmr.msrb.gmra.mxu0 %v4976_v1  ;;  %1099 = vmatmul.f32.vlgmr.msra.gmra.mxu2 %v4974_v0  ;;  %v4026_v2 = vld [vmem:[%s7862_s3 + $0x738] sm:$0xff] }
  0x73   : > { %1119 = vmatmul.f32.vlgmr.msra.gmra.mxu3 %v4976_v1  ;;  %1183 = vmatpush.msrb.mxu2 %v3984_v4  ;;  %v3956_v4 = vld [vmem:[%s7862_s3 + $0x508] sm:$0xff] }
  0x74   : > { %1203 = vmatpush.msrb.mxu3 %v4016_v5  ;;  %1136 = vmatpush.msra.mxu0 %v3989_v6  ;;  %v3988_v5 = vld [vmem:[%s7862_s3 + $0x608] sm:$0xff] }
  0x75   : > { %1157 = vmatpush.msra.mxu1 %v4019_v7  ;;  %1184 = vmatpush.msrb.mxu2 %v3982_v8  ;;  %v4024_v6 = vld [vmem:[%s7862_s3 + $0x728] sm:$0xff]  ;;  %v3926_v7 = vld [vmem:[%s7862_s3 + $0x418] sm:$0xff] }
  0x76   : > { %908 = vmatmul.f32.vlgmr.msrb.gmra.mxu1 %v4945_v54  ;;  %1204 = vmatpush.msrb.mxu3 %v4014_v9  ;;  %v3954_v8 = vld [vmem:[%s7862_s3 + $0x4f8] sm:$0xff] }
  0x77   : > { %1137 = vmatpush.msra.mxu0 %v3987_v10  ;;  %1158 = vmatpush.msra.mxu1 %v4017_v11  ;;  %v3986_v9 = vld [vmem:[%s7862_s3 + $0x5f8] sm:$0xff]  ;;  %v4147_v11 = vld [vmem:[%s7862_s3 + $0xad0] sm:$0xff] }
  0x78   : > { %1185 = vmatpush.msrb.mxu2 %v3980_v13  ;;  %1205 = vmatpush.msrb.mxu3 %v4012_v14  ;;  %v4022_v10 = vld [vmem:[%s7862_s3 + $0x718] sm:$0xff]  ;;  %v3924_v13 = vld [vmem:[%s7862_s3 + $0x408] sm:$0xff] }
  0x79   : > { %1163 = vmatpush.msrb.mxu1 %v3952_v12  ;;  %1138 = vmatpush.msra.mxu0 %v3985_v15  ;;  %v4177_v12 = vld [vmem:[%s7862_s3 + $0xbc0] sm:$0xf]  ;;  %v4020_v14 = vld [vmem:[%s7862_s3 + $0x708] sm:$0xff] }
  0x7a   : > { %1186 = vmatpush.msrb.mxu2 %v3978_v17  ;;  %1206 = vmatpush.msrb.mxu3 %v4010_v18  ;;  %v4145_v15 = vld [vmem:[%s7862_s3 + $0xac0] sm:$0xff]  ;;  %v3922_v17 = vld [vmem:[%s7862_s3 + $0x3f8] sm:$0xff] }
  0x7b   : > { %1164 = vmatpush.msrb.mxu1 %v3950_v16  ;;  %4049 = vmatpush.msk.msrb.mxu0 %vm765_vm0, %v4046_v19  ;;  %v4175_v16 = vld [vmem:[%s7862_s3 + $0xbb0] sm:$0xff]  ;;  %v4018_v18 = vld [vmem:[%s7862_s3 + $0x6f8] sm:$0xff] }
  0x7c   : > { %1139 = vmatmul.f32.vlgmr.msra.gmra.mxu0 %v4945_v54  ;;  %1187 = vmatpush.msrb.mxu2 %v3976_v21  ;;  %v4115_v19 = vld [vmem:[%s7862_s3 + $0x9d0] sm:$0xff] }
  0x7d   : > { %1165 = vmatpush.msrb.mxu1 %v3948_v20  ;;  %1207 = vmatpush.msrb.mxu3 %v4008_v22  ;;  %v4083_v20 = vld [vmem:[%s7862_s3 + $0x8d0] sm:$0xff]  ;;  %v4173_v22 = vld [vmem:[%s7862_s3 + $0xba0] sm:$0xff] }
  0x7e   : > { %1225 = vmatpush.msrb.mxu0 %v4044_v23  ;;  %4048 = vmatmul.msk.f32.vlgmr.msra.gmra.mxu1 %vm762_vm1, %v4956_v58  ;;  %v4143_v21 = vld [vmem:[%s7862_s3 + $0xab0] sm:$0xff]  ;;  %v4081_v23 = vld [vmem:[%s7862_s3 + $0x8c0] sm:$0xff] }
  0x7f   : > { %1166 = vmatpush.msrb.mxu1 %v3946_v24  ;;  %1188 = vmatpush.msrb.mxu2 %v3974_v25  ;;  %v4113_v24 = vld [vmem:[%s7862_s3 + $0x9c0] sm:$0xff] }
  0x80   : > { %1208 = vmatpush.msrb.mxu3 %v4006_v26  ;;  %1226 = vmatpush.msrb.mxu0 %v4042_v27  ;;  %v4141_v25 = vld [vmem:[%s7862_s3 + $0xaa0] sm:$0xff]  ;;  %v4171_v26 = vld [vmem:[%s7862_s3 + $0xb90] sm:$0xff] }
  0x81   : > { %1167 = vmatpush.msrb.mxu1 %v3944_v28  ;;  %1189 = vmatpush.msrb.mxu2 %v3972_v29  ;;  %v4079_v27 = vld [vmem:[%s7862_s3 + $0x8b0] sm:$0xff] }
  0x82   : > { %1209 = vmatpush.msrb.mxu3 %v4004_v30  ;;  %1227 = vmatpush.msrb.mxu0 %v4040_v31  ;;  %v4111_v28 = vld [vmem:[%s7862_s3 + $0x9b0] sm:$0xff]  ;;  %v4169_v30 = vld [vmem:[%s7862_s3 + $0xb80] sm:$0xff] }
  0x83   : > { %4451 = vset.pattern.permute.xlu2 %v4460_v43  ;;  %1168 = vmatpush.msrb.mxu1 %v3942_v32  ;;  %v4139_v29 = vld [vmem:[%s7862_s3 + $0xa90] sm:$0xff]  ;;  %v4109_v31 = vld [vmem:[%s7862_s3 + $0x9a0] sm:$0xff] }
  0x84   : > { %941 = vperm.xlu2 %4451, %v933_v33   ;;  %1190 = vmatpush.msrb.mxu2 %v3970_v34  ;;  %v4077_v32 = vld [vmem:[%s7862_s3 + $0x8a0] sm:$0xff]  ;;  %v4167_v34 = vld [vmem:[%s7862_s3 + $0xb70] sm:$0xff] }
  0x85   : > { %1210 = vmatpush.msrb.mxu3 %v4002_v35  ;;  %1228 = vmatpush.msrb.mxu0 %v4038_v36  ;;  %v4137_v33 = vld [vmem:[%s7862_s3 + $0xa80] sm:$0xff]  ;;  %v4107_v35 = vld [vmem:[%s7862_s3 + $0x990] sm:$0xff] }
  0x86   : > { %1169 = vmatpush.msrb.mxu1 %v3940_v37  ;;  %1191 = vmatpush.msrb.mxu2 %v3968_v38  ;;  %v4075_v36 = vld [vmem:[%s7862_s3 + $0x890] sm:$0xff]  ;;  %v4165_v38 = vld [vmem:[%s7862_s3 + $0xb60] sm:$0xff] }
  0x87   : > { %1211 = vmatpush.msrb.mxu3 %v4000_v39  ;;  %1229 = vmatpush.msrb.mxu0 %v4036_v40  ;;  %v4135_v37 = vld [vmem:[%s7862_s3 + $0xa70] sm:$0xff]  ;;  %v4105_v39 = vld [vmem:[%s7862_s3 + $0x980] sm:$0xff] }
  0x88   : > { %1170 = vmatpush.msrb.mxu1 %v3938_v41  ;;  %1192 = vmatpush.msrb.mxu2 %v3966_v42  ;;  %v4073_v40 = vld [vmem:[%s7862_s3 + $0x880] sm:$0xff]  ;;  %v4163_v42 = vld [vmem:[%s7862_s3 + $0xb50] sm:$0xff] }
  0x89   : > { %1212 = vmatpush.msrb.mxu3 %v3998_v44  ;;  %1230 = vmatpush.msrb.mxu0 %v4034_v45  ;;  %v4133_v41 = vld [vmem:[%s7862_s3 + $0xa60] sm:$0xff]  ;;  %v4103_v44 = vld [vmem:[%s7862_s3 + $0x970] sm:$0xff] }
  0x8a   : > { %1171 = vmatpush.msrb.mxu1 %v3936_v46  ;;  %1193 = vmatpush.msrb.mxu2 %v3964_v47  ;;  %v4071_v45 = vld [vmem:[%s7862_s3 + $0x870] sm:$0xff]  ;;  %v4161_v47 = vld [vmem:[%s7862_s3 + $0xb40] sm:$0xff] }
  0x8b   : > { %1213 = vmatpush.msrb.mxu3 %v3996_v48  ;;  %1231 = vmatpush.msrb.mxu0 %v4032_v49  ;;  %v4131_v46 = vld [vmem:[%s7862_s3 + $0xa50] sm:$0xff]  ;;  %v4052_v48 = vld [vmem:[%s7865_s1 + $0x18] sm:$0xff]  ;;  %v4069_v49 = vld [vmem:[%s7862_s3 + $0x860] sm:$0xff] }
  0x8c   : > { %1172 = vmatpush.msrb.mxu1 %v3934_v50  ;;  %1194 = vmatpush.msrb.mxu2 %v3962_v51  ;;  %v4101_v50 = vld [vmem:[%s7862_s3 + $0x960] sm:$0xff] }
  0x8d   : > { %1214 = vmatpush.msrb.mxu3 %v3994_v52  ;;  %1232 = vmatpush.msrb.mxu0 %v4030_v53  ;;  %v4129_v51 = vld [vmem:[%s7862_s3 + $0xa40] sm:$0xff]  ;;  %v4159_v52 = vld [vmem:[%s7862_s3 + $0xb30] sm:$0xff] }
  0x8e   : > { %1173 = vmatpush.msrb.mxu1 %v3932_v55  ;;  %1195 = vmatpush.msrb.mxu2 %v3960_v56  ;;  %v4067_v53 = vld [vmem:[%s7862_s3 + $0x850] sm:$0xff] }
  0x8f   : > { %1215 = vmatpush.msrb.mxu3 %v3992_v57  ;;  %1233 = vmatpush.msrb.mxu0 %v4028_v59  ;;  %v4099_v55 = vld [vmem:[%s7862_s3 + $0x950] sm:$0xff]  ;;  %v4157_v57 = vld [vmem:[%s7862_s3 + $0xb20] sm:$0xff] }
  0x90   : > { %1248 = vperm.xlu0 %4449, %v4051_v60   ;;  %1174 = vmatpush.msrb.mxu1 %v3930_v61  ;;  %v4127_v56 = vld [vmem:[%s7862_s3 + $0xa30] sm:$0xff]  ;;  %v4065_v59 = vld [vmem:[%s7862_s3 + $0x840] sm:$0xff] }
  0x91   : > { %1196 = vmatpush.msrb.mxu2 %v3958_v62  ;;  %1216 = vmatpush.msrb.mxu3 %v3990_v63  ;;  %v4097_v60 = vld [vmem:[%s7862_s3 + $0x940] sm:$0xff]  ;;  %v4155_v62 = vld [vmem:[%s7862_s3 + $0xb10] sm:$0xff] }
  0x92   : > { %1234 = vmatpush.msrb.mxu0 %v4026_v2  ;;  %1175 = vmatpush.msrb.mxu1 %v3928_v3  ;;  %v4125_v61 = vld [vmem:[%s7862_s3 + $0xa20] sm:$0xff]  ;;  %v4063_v63 = vld [vmem:[%s7862_s3 + $0x830] sm:$0xff] }
  0x93   : > { %1197 = vmatpush.msrb.mxu2 %v3956_v4  ;;  %1217 = vmatpush.msrb.mxu3 %v3988_v5  ;;  %v4095_v2 = vld [vmem:[%s7862_s3 + $0x930] sm:$0xff]  ;;  %v4153_v4 = vld [vmem:[%s7862_s3 + $0xb00] sm:$0xff] }
  0x94   : > { %1235 = vmatpush.msrb.mxu0 %v4024_v6  ;;  %1176 = vmatpush.msrb.mxu1 %v3926_v7  ;;  %v4123_v3 = vld [vmem:[%s7862_s3 + $0xa10] sm:$0xff]  ;;  %v4061_v5 = vld [vmem:[%s7862_s3 + $0x820] sm:$0xff] }
  0x95   : > { %1198 = vmatpush.msrb.mxu2 %v3954_v8  ;;  %1218 = vmatpush.msrb.mxu3 %v3986_v9  ;;  %v4093_v6 = vld [vmem:[%s7862_s3 + $0x920] sm:$0xff]  ;;  %v4151_v8 = vld [vmem:[%s7862_s3 + $0xaf0] sm:$0xff] }
  0x96   : > { %1236 = vmatpush.msrb.mxu0 %v4022_v10  ;;  %1199 = vmatmul.f32.vlgmr.msrb.gmra.mxu2 %v4976_v1  ;;  %v4121_v7 = vld [vmem:[%s7862_s3 + $0xa00] sm:$0xff]  ;;  %v4059_v9 = vld [vmem:[%s7862_s3 + $0x810] sm:$0xff] }
  0x97   : > { %1439 = vmatpush.msra.mxu2 %v4147_v11  ;;  %4179 = vmatpush.msk.msra.mxu3 %vm765_vm0, %v4177_v12  ;;  %v4091_v10 = vld [vmem:[%s7862_s3 + $0x910] sm:$0xff]  ;;  %v4149_v12 = vld [vmem:[%s7862_s3 + $0xae0] sm:$0xff] }
  0x98   : > { %1177 = vmatpush.msrb.mxu1 %v3924_v13  ;;  %1237 = vmatpush.msrb.mxu0 %v4020_v14  ;;  %v4119_v11 = vld [vmem:[%s7862_s3 + $0x9f0] sm:$0xff]  ;;  %v4084_v13 = vld [vmem:[%s7862_s3 + $0x8d8] sm:$0xff]  ;;  %v4057_v14 = vld [vmem:[%s7862_s3 + $0x800] sm:$0xff] }
  0x99   : > { %1219 = vmatmul.f32.vlgmr.msrb.gmra.mxu3 %v4945_v54  ;;  %1440 = vmatpush.msra.mxu2 %v4145_v15  ;;  %v4089_v15 = vld [vmem:[%s7862_s3 + $0x900] sm:$0xff] }
  0x9a   : > { %1461 = vmatpush.msra.mxu3 %v4175_v16  ;;  %1178 = vmatpush.msrb.mxu1 %v3922_v17  ;;  %v4117_v16 = vld [vmem:[%s7862_s3 + $0x9e0] sm:$0xff]  ;;  %v4082_v17 = vld [vmem:[%s7862_s3 + $0x8c8] sm:$0xff] }
  0x9b   : > { %1238 = vmatpush.msrb.mxu0 %v4018_v18  ;;  %1441 = vmatpush.msra.mxu2 %v4143_v21  ;;  %v4055_v18 = vld [vmem:[%s7862_s3 + $0x7f0] sm:$0xff]  ;;  %v4080_v21 = vld [vmem:[%s7862_s3 + $0x8b8] sm:$0xff] }
  0x9c   : > { %1419 = vmatpush.msra.mxu1 %v4115_v19  ;;  %1462 = vmatpush.msra.mxu3 %v4173_v22  ;;  %v4087_v19 = vld [vmem:[%s7862_s3 + $0x8f0] sm:$0xff]  ;;  %v4053_v22 = vld [vmem:[%s7862_s3 + $0x7e0] sm:$0xff] }
  0x9d   : > { %1399 = vmatpush.msra.mxu0 %v4083_v20  ;;  %1179 = vmatmul.f32.vlgmr.msrb.gmra.mxu1 %v4974_v0  ;;  %v4178_v20 = vld [vmem:[%s7862_s3 + $0xbc8] sm:$0xf] }
  0x9e   : > { %1420 = vmatpush.msra.mxu1 %v4113_v24  ;;  %1442 = vmatpush.msra.mxu2 %v4141_v25  ;;  %v4078_v24 = vld [vmem:[%s7862_s3 + $0x8a8] sm:$0xff]  ;;  %v4116_v25 = vld [vmem:[%s7862_s3 + $0x9d8] sm:$0xff] }
  0x9f   : > { %1400 = vmatpush.msra.mxu0 %v4081_v23  ;;  %1463 = vmatpush.msra.mxu3 %v4171_v26  ;;  %v4085_v23 = vld [vmem:[%s7862_s3 + $0x8e0] sm:$0xff]  ;;  %v4148_v26 = vld [vmem:[%s7862_s3 + $0xad8] sm:$0xff] }
  0xa0   : > { %1421 = vmatpush.msra.mxu1 %v4111_v28  ;;  %1443 = vmatpush.msra.mxu2 %v4139_v29  ;;  %v4176_v28 = vld [vmem:[%s7862_s3 + $0xbb8] sm:$0xff]  ;;  %v4114_v29 = vld [vmem:[%s7862_s3 + $0x9c8] sm:$0xff] }
  0xa1   : > { %1401 = vmatpush.msra.mxu0 %v4079_v27  ;;  %1464 = vmatpush.msra.mxu3 %v4169_v30  ;;  %v4076_v27 = vld [vmem:[%s7862_s3 + $0x898] sm:$0xff]  ;;  %v4146_v30 = vld [vmem:[%s7862_s3 + $0xac8] sm:$0xff] }
  0xa2   : > { %4050 = vmatmul.msk.f32.vlgmr.msrb.gmra.mxu0 %vm762_vm1, %v4956_v58  ;;  %1422 = vmatpush.msra.mxu1 %v4109_v31  ;;  %v4074_v31 = vld [vmem:[%s7862_s3 + $0x888] sm:$0xff] }
  0xa3   : > { %1402 = vmatpush.msra.mxu0 %v4077_v32  ;;  %1444 = vmatpush.msra.mxu2 %v4137_v33  ;;  %v4174_v32 = vld [vmem:[%s7862_s3 + $0xba8] sm:$0xff]  ;;  %v4112_v33 = vld [vmem:[%s7862_s3 + $0x9b8] sm:$0xff] }
  0xa4   : > { %1465 = vmatpush.msra.mxu3 %v4167_v34  ;;  %1423 = vmatpush.msra.mxu1 %v4107_v35  ;;  %v4072_v34 = vld [vmem:[%s7862_s3 + $0x878] sm:$0xff] }
  0xa5   : > { %1403 = vmatpush.msra.mxu0 %v4075_v36  ;;  %1445 = vmatpush.msra.mxu2 %v4135_v37  ;;  %v4144_v35 = vld [vmem:[%s7862_s3 + $0xab8] sm:$0xff]  ;;  %v4110_v36 = vld [vmem:[%s7862_s3 + $0x9a8] sm:$0xff] }
  0xa6   : > { %1466 = vmatpush.msra.mxu3 %v4165_v38  ;;  %1424 = vmatpush.msra.mxu1 %v4105_v39  ;;  %v4172_v37 = vld [vmem:[%s7862_s3 + $0xb98] sm:$0xff]  ;;  %v4183_v38 = vld [vmem:[%s7865_s1 + $0x20] sm:$0xff]  ;;  %v4070_v39 = vld [vmem:[%s7862_s3 + $0x868] sm:$0xff] }
  0xa7   : > { %1404 = vmatpush.msra.mxu0 %v4073_v40  ;;  %1446 = vmatpush.msra.mxu2 %v4133_v41  ;;  %v4108_v40 = vld [vmem:[%s7862_s3 + $0x998] sm:$0xff]  ;;  %v4142_v41 = vld [vmem:[%s7862_s3 + $0xaa8] sm:$0xff] }
  0xa8   : > { %1467 = vmatpush.msra.mxu3 %v4163_v42  ;;  %1425 = vmatpush.msra.mxu1 %v4103_v44  ;;  %v4068_v42 = vld [vmem:[%s7862_s3 + $0x858] sm:$0xff]  ;;  %v4106_v44 = vld [vmem:[%s7862_s3 + $0x988] sm:$0xff] }
  0xa9   : > { %1405 = vmatpush.msra.mxu0 %v4071_v45  ;;  %1447 = vmatpush.msra.mxu2 %v4131_v46  ;;  %v4140_v45 = vld [vmem:[%s7862_s3 + $0xa98] sm:$0xff] }
  0xaa   : > { %1468 = vmatpush.msra.mxu3 %v4161_v47  ;;  %1253 = vperm.xlu2 %4451, %v4052_v48   ;;  %v4168_v46 = vld [vmem:[%s7862_s3 + $0xb78] sm:$0xff]  ;;  %v4066_v47 = vld [vmem:[%s7862_s3 + $0x848] sm:$0xff] }
  0xab   : > { %1406 = vmatpush.msra.mxu0 %v4069_v49  ;;  %1426 = vmatpush.msra.mxu1 %v4101_v50  ;;  %v4104_v48 = vld [vmem:[%s7862_s3 + $0x978] sm:$0xff]  ;;  %v4138_v49 = vld [vmem:[%s7862_s3 + $0xa88] sm:$0xff] }
  0xac   : > { %1448 = vmatpush.msra.mxu2 %v4129_v51  ;;  %1469 = vmatpush.msra.mxu3 %v4159_v52  ;;  %v4166_v50 = vld [vmem:[%s7862_s3 + $0xb68] sm:$0xff]  ;;  %v4064_v51 = vld [vmem:[%s7862_s3 + $0x838] sm:$0xff] }
  0xad   : > { %1407 = vmatpush.msra.mxu0 %v4067_v53  ;;  %1427 = vmatpush.msra.mxu1 %v4099_v55  ;;  %v4102_v52 = vld [vmem:[%s7862_s3 + $0x968] sm:$0xff]  ;;  %v4136_v53 = vld [vmem:[%s7862_s3 + $0xa78] sm:$0xff] }
  0xae   : > { %1449 = vmatpush.msra.mxu2 %v4127_v56  ;;  %1470 = vmatpush.msra.mxu3 %v4157_v57  ;;  %v4164_v55 = vld [vmem:[%s7862_s3 + $0xb58] sm:$0xff]  ;;  %v1582_v56 = vld [vmem:[%s7866_s28] sm:$0xff]  ;;  %v4062_v57 = vld [vmem:[%s7862_s3 + $0x828] sm:$0xff] }
  0xaf   : > { %1408 = vmatpush.msra.mxu0 %v4065_v59  ;;  %1428 = vmatpush.msra.mxu1 %v4097_v60  ;;  %v4100_v59 = vld [vmem:[%s7862_s3 + $0x958] sm:$0xff]  ;;  %v4134_v60 = vld [vmem:[%s7862_s3 + $0xa68] sm:$0xff] }
  0xb0   : > { %1450 = vmatpush.msra.mxu2 %v4125_v61  ;;  %1471 = vmatpush.msra.mxu3 %v4155_v62  ;;  %v4162_v61 = vld [vmem:[%s7862_s3 + $0xb48] sm:$0xff]  ;;  %v4060_v62 = vld [vmem:[%s7862_s3 + $0x818] sm:$0xff] }
  0xb1   : > { %1409 = vmatpush.msra.mxu0 %v4063_v63  ;;  %1429 = vmatpush.msra.mxu1 %v4095_v2  ;;  %v4098_v63 = vld [vmem:[%s7862_s3 + $0x948] sm:$0xff]  ;;  %v4132_v2 = vld [vmem:[%s7862_s3 + $0xa58] sm:$0xff] }
  0xb2   : > { %1451 = vmatpush.msra.mxu2 %v4123_v3  ;;  %1472 = vmatpush.msra.mxu3 %v4153_v4  ;;  %v4160_v3 = vld [vmem:[%s7862_s3 + $0xb38] sm:$0xff]  ;;  %v4184_v4 = vld [vmem:[%s7865_s1 + $0x28] sm:$0xff] }
  0xb3   : > { %1410 = vmatpush.msra.mxu0 %v4061_v5  ;;  %1430 = vmatpush.msra.mxu1 %v4093_v6  ;;  %v4058_v5 = vld [vmem:[%s7862_s3 + $0x808] sm:$0xff]  ;;  %v4096_v6 = vld [vmem:[%s7862_s3 + $0x938] sm:$0xff] }
  0xb4   : > { %1452 = vmatpush.msra.mxu2 %v4121_v7  ;;  %1473 = vmatpush.msra.mxu3 %v4151_v8  ;;  %v4130_v7 = vld [vmem:[%s7862_s3 + $0xa48] sm:$0xff] }
  0xb5   : > { %1411 = vmatpush.msra.mxu0 %v4059_v9  ;;  %1431 = vmatpush.msra.mxu1 %v4091_v10  ;;  %v4158_v8 = vld [vmem:[%s7862_s3 + $0xb28] sm:$0xff]  ;;  %v4056_v9 = vld [vmem:[%s7862_s3 + $0x7f8] sm:$0xff] }
  0xb6   : > { %1453 = vmatpush.msra.mxu2 %v4119_v11  ;;  %1474 = vmatpush.msra.mxu3 %v4149_v12  ;;  %v4094_v10 = vld [vmem:[%s7862_s3 + $0x928] sm:$0xff]  ;;  %v4128_v11 = vld [vmem:[%s7862_s3 + $0xa38] sm:$0xff] }
  0xb7   : > { %1412 = vmatpush.msra.mxu0 %v4057_v14  ;;  %1432 = vmatpush.msra.mxu1 %v4089_v15  ;;  %v4156_v12 = vld [vmem:[%s7862_s3 + $0xb18] sm:$0xff]  ;;  %v4054_v14 = vld [vmem:[%s7862_s3 + $0x7e8] sm:$0xff] }
  0xb8   : > { %1479 = vmatpush.msrb.mxu3 %v4084_v13  ;;  %1454 = vmatpush.msra.mxu2 %v4117_v16  ;;  %v1583_v13 = vld [vmem:[%s7866_s28 + $0x8] sm:$0xff]  ;;  %v4092_v15 = vld [vmem:[%s7862_s3 + $0x918] sm:$0xff] }
  0xb9   : > { %1455 = vmatmul.f32.vlgmr.msra.gmra.mxu2 %v4945_v54  ;;  %1413 = vmatpush.msra.mxu0 %v4055_v18  ;;  %v4126_v16 = vld [vmem:[%s7862_s3 + $0xa28] sm:$0xff] }
  0xba   : > { %1480 = vmatpush.msrb.mxu3 %v4082_v17  ;;  %1433 = vmatpush.msra.mxu1 %v4087_v19  ;;  %v4154_v17 = vld [vmem:[%s7862_s3 + $0xb08] sm:$0xff]  ;;  %v4124_v19 = vld [vmem:[%s7862_s3 + $0xa18] sm:$0xff] }
  0xbb   : > { %4180 = vmatmul.msk.f32.vlgmr.msra.gmra.mxu3 %vm762_vm1, %v4956_v58  ;;  %4181 = vmatpush.msk.msrb.mxu2 %vm765_vm0, %v4178_v20  ;;  %v4090_v18 = vld [vmem:[%s7862_s3 + $0x908] sm:$0xff]  ;;  %v4152_v20 = vld [vmem:[%s7862_s3 + $0xaf8] sm:$0xff] }
  0xbc   : > { %1481 = vmatpush.msrb.mxu3 %v4080_v21  ;;  %1414 = vmatpush.msra.mxu0 %v4053_v22  ;;  %v4088_v21 = vld [vmem:[%s7862_s3 + $0x8f8] sm:$0xff]  ;;  %v2215_v22 = vld [vmem:[%s7841_s10] sm:$0xff] }
  0xbd   : > { %1434 = vmatpush.msra.mxu1 %v4085_v23  ;;  %1415 = vmatmul.f32.vlgmr.msra.gmra.mxu0 %v4974_v0  ;;  %v4122_v23 = vld [vmem:[%s7862_s3 + $0xa08] sm:$0xff] }
  0xbe   : > { %1435 = vmatmul.f32.vlgmr.msra.gmra.mxu1 %v4976_v1  ;;  %1482 = vmatpush.msrb.mxu3 %v4078_v24  ;;  %v4150_v24 = vld [vmem:[%s7862_s3 + $0xae8] sm:$0xff] }
  0xbf   : > { %1499 = vmatpush.msrb.mxu0 %v4116_v25  ;;  %1519 = vmatpush.msrb.mxu1 %v4148_v26  ;;  %v4086_v25 = vld [vmem:[%s7862_s3 + $0x8e8] sm:$0xff] }
  0xc0   : > { %1483 = vmatpush.msrb.mxu3 %v4076_v27  ;;  %1541 = vmatpush.msrb.mxu2 %v4176_v28  ;;  %v2216_v26 = vld [vmem:[%s7841_s10 + $0x8] sm:$0xff]  ;;  %v1950_v27 = vld [vmem:[%s7837_s6] sm:$0xff] }
  0xc1   : > { %1500 = vmatpush.msrb.mxu0 %v4114_v29  ;;  %1520 = vmatpush.msrb.mxu1 %v4146_v30  ;;  %v4118_v28 = vld [vmem:[%s7862_s3 + $0x9e8] sm:$0xff]  ;;  %v3156_v29 = vld [vmem:[#allocation2] sm:$0x1] }
  0xc2   : > { %1484 = vmatpush.msrb.mxu3 %v4074_v31  ;;  %1542 = vmatpush.msrb.mxu2 %v4174_v32  ;;  %v2841_v30 = vld [vmem:[%s7844_s13] sm:$0xff]  ;;  %v1616_v31 = vld [vmem:[%s7867_s0 + $0x70] sm:$0xff]  ;;  %v1615_v32 = vld [vmem:[%s7867_s0 + $0x68] sm:$0xff] }
  0xc3   : > { %1501 = vmatpush.msrb.mxu0 %v4112_v33  ;;  %4450 = vset.pattern.permute.xlu1 %v4460_v43  ;;  %v4170_v43 = vld [vmem:[%s7862_s3 + $0xb88] sm:$0xff]  ;;  %v4201_v33 = vld [vmem:[%s7867_s0 + $0x110] sm:$0xff] }
  0xc4   : > { %1485 = vmatpush.msrb.mxu3 %v4072_v34  ;;  %1521 = vmatpush.msrb.mxu1 %v4144_v35  ;;  %v1614_v34 = vld [vmem:[%s7867_s0 + $0x60] sm:$0xff]  ;;  %v4200_v35 = vld [vmem:[%s7867_s0 + $0x108] sm:$0xff] }
  0xc5   : > { %1502 = vmatpush.msrb.mxu0 %v4110_v36  ;;  %1543 = vmatpush.msrb.mxu2 %v4172_v37  ;;  %v1613_v36 = vld [vmem:[%s7867_s0 + $0x58] sm:$0xff]  ;;  %v4199_v37 = vld [vmem:[%s7867_s0 + $0x100] sm:$0xff] }
  0xc6   : > { %1564 = vperm.xlu1 %4450, %v4183_v38   ;;  %1486 = vmatpush.msrb.mxu3 %v4070_v39  ;;  %v1612_v39 = vld [vmem:[%s7867_s0 + $0x50] sm:$0xff] }
  0xc7   : > { %1503 = vmatpush.msrb.mxu0 %v4108_v40  ;;  %1522 = vmatpush.msrb.mxu1 %v4142_v41  ;;  %v4198_v40 = vld [vmem:[%s7867_s0 + $0xf8] sm:$0xff]  ;;  %v1611_v41 = vld [vmem:[%s7867_s0 + $0x48] sm:$0xff] }
  0xc8   : > { %1544 = vmatpush.msrb.mxu2 %v4170_v43  ;;  %1487 = vmatpush.msrb.mxu3 %v4068_v42  ;;  %v4197_v42 = vld [vmem:[%s7867_s0 + $0xf0] sm:$0xff] }
  0xc9   : > { %1504 = vmatpush.msrb.mxu0 %v4106_v44  ;;  %1523 = vmatpush.msrb.mxu1 %v4140_v45 }
  0xca   : > { %1545 = vmatpush.msrb.mxu2 %v4168_v46  ;;  %1488 = vmatpush.msrb.mxu3 %v4066_v47  ;;  %v1610_v46 = vld [vmem:[%s7867_s0 + $0x40] sm:$0xff]  ;;  %v4196_v47 = vld [vmem:[%s7867_s0 + $0xe8] sm:$0xff] }
  0xcb   : > { %1505 = vmatpush.msrb.mxu0 %v4104_v48  ;;  %1524 = vmatpush.msrb.mxu1 %v4138_v49  ;;  %v1609_v48 = vld [vmem:[%s7867_s0 + $0x38] sm:$0xff]  ;;  %v4195_v49 = vld [vmem:[%s7867_s0 + $0xe0] sm:$0xff] }
  0xcc   : > { %1546 = vmatpush.msrb.mxu2 %v4166_v50  ;;  %1489 = vmatpush.msrb.mxu3 %v4064_v51 }
  0xcd   : > { %1506 = vmatpush.msrb.mxu0 %v4102_v52  ;;  %1525 = vmatpush.msrb.mxu1 %v4136_v53  ;;  %v1608_v52 = vld [vmem:[%s7867_s0 + $0x30] sm:$0xff]  ;;  %v4194_v53 = vld [vmem:[%s7867_s0 + $0xd8] sm:$0xff] }
  0xce   : > { %1547 = vmatpush.msrb.mxu2 %v4164_v55  ;;  %1586 = vperm.xlu1 %4450, %v1582_v56   ;;  %v789_v38 = vpop.f32.mrf.mxu0  ;;  %v809_v43 = vpop.f32.mrf.mxu1 }
  0xcf   : > { %1490 = vmatpush.msrb.mxu3 %v4062_v57  ;;  %1507 = vmatpush.msrb.mxu0 %v4100_v59  ;;  %v829_v44 = vpop.f32.mrf.mxu2  ;;  %v1607_v57 = vld [vmem:[%s7867_s0 + $0x28] sm:$0xff]  ;;  %v4193_v59 = vld [vmem:[%s7867_s0 + $0xd0] sm:$0xff] }
  0xd0   : > { %1526 = vmatpush.msrb.mxu1 %v4134_v60  ;;  %1548 = vmatpush.msrb.mxu2 %v4162_v61  ;;  %v1606_v60 = vld [vmem:[%s7867_s0 + $0x20] sm:$0xff]  ;;  %v4192_v61 = vld [vmem:[%s7867_s0 + $0xc8] sm:$0xff] }
  0xd1   : > { %1491 = vmatpush.msrb.mxu3 %v4060_v62  ;;  %1508 = vmatpush.msrb.mxu0 %v4098_v63  ;;  %v1605_v62 = vld [vmem:[%s7867_s0 + $0x18] sm:$0xff]  ;;  %v4191_v63 = vld [vmem:[%s7867_s0 + $0xc0] sm:$0xff] }
  0xd2   : > { %1527 = vmatpush.msrb.mxu1 %v4132_v2  ;;  %1549 = vmatpush.msrb.mxu2 %v4160_v3  ;;  %v849_v45 = vpop.f32.mrf.mxu3  ;;  %v1604_v2 = vld [vmem:[%s7867_s0 + $0x10] sm:$0xff]  ;;  %v4190_v3 = vld [vmem:[%s7867_s0 + $0xb8] sm:$0xff] }
  0xd3   : > { %1569 = vperm.xlu0 %4449, %v4184_v4   ;;  %1492 = vmatpush.msrb.mxu3 %v4058_v5  ;;  %v1603_v5 = vld [vmem:[%s7867_s0 + $0x8] sm:$0xff] }
  0xd4   : > { %1509 = vmatpush.msrb.mxu0 %v4096_v6  ;;  %1528 = vmatpush.msrb.mxu1 %v4130_v7  ;;  %v4189_v6 = vld [vmem:[%s7867_s0 + $0xb0] sm:$0xff] }
  0xd5   : > { %1550 = vmatpush.msrb.mxu2 %v4158_v8  ;;  %1493 = vmatpush.msrb.mxu3 %v4056_v9  ;;  %v1602_v8 = vld [vmem:[%s7867_s0] sm:$0xff]  ;;  %v4188_v9 = vld [vmem:[%s7867_s0 + $0xa8] sm:$0xff] }
  0xd6   : > { %1510 = vmatpush.msrb.mxu0 %v4094_v10  ;;  %1529 = vmatpush.msrb.mxu1 %v4128_v11 }
  0xd7   : > { %1551 = vmatpush.msrb.mxu2 %v4156_v12  ;;  %1591 = vperm.xlu1 %4450, %v1583_v13   ;;  %v810_v13 = vadd.f32 %v809_v43, %v789_v38 }
  0xd8   : > { %1494 = vmatpush.msrb.mxu3 %v4054_v14  ;;  %1511 = vmatpush.msrb.mxu0 %v4092_v15 }
  0xd9   : > { %1530 = vmatpush.msrb.mxu1 %v4126_v16  ;;  %1552 = vmatpush.msrb.mxu2 %v4154_v17 }
  0xda   : > { %1495 = vmatmul.f32.vlgmr.msrb.gmra.mxu3 %v4974_v0  ;;  %1512 = vmatpush.msrb.mxu0 %v4090_v18  ;;  %v4120_v0 = vld [vmem:[%s7862_s3 + $0x9f8] sm:$0xff]  ;;  %v5918_v18 = vpop.permute.xlu0 %936 }
  0xdb   : > { %1531 = vmatpush.msrb.mxu1 %v4124_v19  ;;  %1553 = vmatpush.msrb.mxu2 %v4152_v20  ;;  %v830_v19 = vadd.f32 %v829_v44, %v810_v13 }
  0xdc   : > { %1513 = vmatpush.msrb.mxu0 %v4088_v21  ;;  %2219 = vperm.xlu0 %4449, %v2215_v22  }
  0xdd   : > { %1532 = vmatpush.msrb.mxu1 %v4122_v23  ;;  %1554 = vmatpush.msrb.mxu2 %v4150_v24  ;;  %v850_v24 = vadd.f32 %v849_v45, %v830_v19  ;;  %v1621_v45 = vld [vmem:[%s7867_s0 + $0x98] sm:$0xff] }
  0xde   : > { %4182 = vmatmul.msk.f32.vlgmr.msrb.gmra.mxu2 %vm762_vm1, %v4956_v58  ;;  %1514 = vmatpush.msrb.mxu0 %v4086_v25  ;;  %v1617_v58 = vld [vmem:[%s7867_s0 + $0x78] sm:$0xff]  ;;  %v5922_v23 = vpop.permute.xlu2 %941 }
  0xdf   : > { %1533 = vmatpush.msrb.mxu1 %v4120_v0  ;;  %1515 = vmatmul.f32.vlgmr.msrb.gmra.mxu0 %v4976_v1  ;;  %v4203_v1 = vld [vmem:[%s7867_s0 + $0x120] sm:$0xff] }
  0xe0   : > { %2224 = vperm.xlu1 %4450, %v2216_v26   ;;  %1953 = vperm.xlu2 %4451, %v1950_v27  }
  0xe1   : > { %1534 = vmatpush.msrb.mxu1 %v4118_v28  ;;  %1634 = vmatpush.msra.mxu2 %v1617_v58 }
  0xe2   : > { %1535 = vmatmul.f32.vlgmr.msrb.gmra.mxu1 %v4945_v54  ;;  %1705 = vmatpush.msra.mxu0 %v4203_v1  ;;  %v4202_v54 = vld [vmem:[%s7867_s0 + $0x118] sm:$0xff] }
  0xe3   : > { %1635 = vmatpush.msra.mxu2 %v1616_v31 }
  0xe4   : > { %3159 = vperm.xlu0 %4449, %v3156_v29   ;;  %1706 = vmatpush.msra.mxu0 %v4202_v54 }
  0xe5   : > { %1636 = vmatpush.msra.mxu2 %v1615_v32 }
  0xe6   : > { %1707 = vmatpush.msra.mxu0 %v4201_v33 }
  0xe7   : > { %1637 = vmatpush.msra.mxu2 %v1614_v34 }
  0xe8   : > { %2844 = vperm.xlu2 %4451, %v2841_v30   ;;  %1708 = vmatpush.msra.mxu0 %v4200_v35  ;;  %v944_v30 = vperm.slane %v850_v24, 0 }
  0xe9   : > { %1638 = vmatpush.msra.mxu2 %v1613_v36 }
  0xea   : > { %1709 = vmatpush.msra.mxu0 %v4199_v37  ;;  %v946_v34 = vmul.f32 %v944_v30, %v5918_v18  ;;  %v948_v43 = vmul.f32 %v944_v30, %v5922_v23 }
  0xeb   : > { %1639 = vmatpush.msra.mxu2 %v1612_v39  ;;  %v1622_v39 = vld [vmem:[%s7867_s0 + $0xa0] sm:$0x7f] }
  0xec   : > { %1710 = vmatpush.msra.mxu0 %v4198_v40  ;;  %v5876_v55 = vpop.f32.mrf.mxu2  ;;  %v5878_v56 = vpop.f32.mrf.mxu3  ;;  %v4208_v40 = vld [vmem:[%s7867_s0 + $0x148] sm:$0x7f]  ;;  %4185 = vmatpush.msk.msra.mxu3 %vm1630_vm2, %v1622_v39 }
  0xed   : > { %1640 = vmatpush.msra.mxu2 %v1611_v41  ;;  %4209 = vmatpush.msk.msra.mxu1 %vm1630_vm2, %v4208_v40  ;;  %v4221_v39 = vld [vmem:[%s7838_s7 + $0x88] sm:$0xff]  ;;  %v4238_v40 = vld [vmem:[%s7838_s7 + $0xe0] sm:$0xff] }
  0xee   : > { %1711 = vmatpush.msra.mxu0 %v4197_v42  ;;  %1669 = vmatpush.msra.mxu3 %v1621_v45  ;;  %v4219_v45 = vld [vmem:[%s7838_s7 + $0x78] sm:$0xff] }
  0xef   : > { %1641 = vmatpush.msra.mxu2 %v1610_v46  ;;  %v5866_v50 = vpop.f32.mrf.mxu0  ;;  %v4207_v46 = vld [vmem:[%s7867_s0 + $0x140] sm:$0xff] }
  0xf0   : > { %1712 = vmatpush.msra.mxu0 %v4196_v47  ;;  %1740 = vmatpush.msra.mxu1 %v4207_v46  ;;  %v4236_v46 = vld [vmem:[%s7838_s7 + $0xd0] sm:$0xff] }
  0xf1   : > { %1642 = vmatpush.msra.mxu2 %v1609_v48 }
  0xf2   : > { %1713 = vmatpush.msra.mxu0 %v4195_v49  ;;  %v1620_v49 = vld [vmem:[%s7867_s0 + $0x90] sm:$0xff] }
  0xf3   : > { %v5868_v51 = vpop.f32.mrf.mxu1  ;;  %1643 = vmatpush.msra.mxu2 %v1608_v52  ;;  %v4206_v52 = vld [vmem:[%s7867_s0 + $0x138] sm:$0xff]  ;;  %1670 = vmatpush.msra.mxu3 %v1620_v49  ;;  %v4235_v49 = vld [vmem:[%s7838_s7 + $0xc8] sm:$0xff] }
  0xf4   : > { %1714 = vmatpush.msra.mxu0 %v4194_v53  ;;  %1741 = vmatpush.msra.mxu1 %v4206_v52  ;;  %v1755_v52 = vld [vmem:[%s7838_s7 + $0x10] sm:$0xff] }
  0xf5   : > { %1644 = vmatpush.msra.mxu2 %v1607_v57  ;;  %v1100_v10 = vpop.f32.mrf.mxu2 }
  0xf6   : > { %1715 = vmatpush.msra.mxu0 %v4193_v59  ;;  %v1120_v11 = vpop.f32.mrf.mxu3  ;;  %v1619_v59 = vld [vmem:[%s7867_s0 + $0x88] sm:$0xff] }
  0xf7   : > { %1645 = vmatpush.msra.mxu2 %v1606_v60  ;;  %v1121_v12 = vadd.f32 %v1120_v11, %v1100_v10  ;;  %v4205_v60 = vld [vmem:[%s7867_s0 + $0x130] sm:$0xff]  ;;  %1671 = vmatpush.msra.mxu3 %v1619_v59  ;;  %v1754_v59 = vld [vmem:[%s7838_s7 + $0x8] sm:$0xff] }
  0xf8   : > { %1716 = vmatpush.msra.mxu0 %v4192_v61  ;;  %1742 = vmatpush.msra.mxu1 %v4205_v60  ;;  %v4216_v60 = vld [vmem:[%s7838_s7 + $0x60] sm:$0xff] }
  0xf9   : > { %1646 = vmatpush.msra.mxu2 %v1605_v62  ;;  %v1140_v4 = vpop.f32.mrf.mxu0  ;;  %v1618_v62 = vld [vmem:[%s7867_s0 + $0x80] sm:$0xff] }
  0xfa   : > { %1717 = vmatpush.msra.mxu0 %v4191_v63  ;;  %v1141_v16 = vadd.f32 %v1140_v4, %v1121_v12  ;;  %v4204_v63 = vld [vmem:[%s7867_s0 + $0x128] sm:$0xff]  ;;  %1672 = vmatpush.msra.mxu3 %v1618_v62  ;;  %v1753_v62 = vld [vmem:[%s7838_s7] sm:$0xff] }
  0xfb   : > { %1647 = vmatpush.msra.mxu2 %v1604_v2  ;;  %v1160_v7 = vpop.f32.mrf.mxu1  ;;  %1743 = vmatpush.msra.mxu1 %v4204_v63  ;;  %v4215_v63 = vld [vmem:[%s7838_s7 + $0x58] sm:$0xff] }
  0xfc   : > { %1718 = vmatpush.msra.mxu0 %v4190_v3  ;;  %v1161_v21 = vadd.f32 %v1160_v7, %v1141_v16 }
  0xfd   : > { %1648 = vmatpush.msra.mxu2 %v1603_v5  ;;  %v890_v5 = vadd.f32 %v5866_v50, %v5878_v56 }
  0xfe   : > { %1719 = vmatpush.msra.mxu0 %v4189_v6  ;;  %v1256_v26 = vperm.slane %v1161_v21, 0 }
  0xff   : > { %1649 = vmatpush.msra.mxu2 %v1602_v8  ;;  %v910_v7 = vadd.f32 %v5868_v51, %v890_v5 }
 0x100   : > { %1720 = vmatpush.msra.mxu0 %v4188_v9 }
 0x101   : > { %v930_v9 = vadd.f32 %v5876_v55, %v910_v7 }
 0x102   : > { %v5924_v29 = vpop.permute.xlu0 %1248 }
 0x103   : > { %v1258_v31 = vmul.f32 %v1256_v26, %v5924_v29  ;;  %v945_v19 = vperm.slane %v930_v9, 0 }
 0x104   : > { %v1254_v32 = vpop.permute.xlu2 %1253 }
 0x105   : > { %v1260_v36 = vmul.f32 %v1256_v26, %v1254_v32  ;;  %v1262_v37 = vadd.f32 %v1258_v31, %v946_v34  ;;  %v947_v56 = vmul.f32 %v945_v19, %v5918_v18  ;;  %v949_v55 = vmul.f32 %v945_v19, %v5922_v23  ;;  %v1763_v18 = vld [vmem:[%s7838_s7 + $0x50] sm:$0x7]  ;;  %v1762_v23 = vld [vmem:[%s7838_s7 + $0x48] sm:$0xff]  ;;  %v4224_v31 = vld [vmem:[%s7838_s7 + $0xa0] sm:$0xff] }
 0x106   : > { %4212 = vmatpush.msk.msrb.mxu3 %vm1771_vm4, %v1763_v18  ;;  %v4240_v34 = vld [vmem:[%s7838_s7 + $0xf0] sm:$0xff]  ;;  %v1959_v18 = vld [vmem:[%s7839_s8 + $0x8] sm:$0xff] }
 0x107   : > { %v1264_v47 = vadd.f32 %v1260_v36, %v948_v43  ;;  %v4222_v36 = vld [vmem:[%s7838_s7 + $0x90] sm:$0xff]  ;;  %v4220_v43 = vld [vmem:[%s7838_s7 + $0x80] sm:$0xff] }
 0x108   : > { %1781 = vmatpush.msrb.mxu3 %v1762_v23  ;;  %v1958_v23 = vld [vmem:[%s7839_s8] sm:$0xff] }
 0x119   : > { %v1200_v17 = vpop.f32.mrf.mxu2 }
 0x11a   : > { %v1180_v15 = vpop.f32.mrf.mxu1 }
 0x11b   : > { %v1201_v3 = vadd.f32 %v1200_v17, %v1180_v15 }
 0x11c   : > { %v1220_v20 = vpop.f32.mrf.mxu3 }
 0x11d   : > { %v1221_v6 = vadd.f32 %v1220_v20, %v1201_v3 }
 0x11f   : > { %v5916_v14 = vpop.f32.mrf.mxu0 }
 0x120   : > { %v1241_v8 = vadd.f32 %v5916_v14, %v1221_v6 }
 0x122   : > { %v1257_v12 = vperm.slane %v1241_v8, 0 }
 0x124   : > { %v1259_v21 = vmul.f32 %v1257_v12, %v5924_v29  ;;  %v1261_v24 = vmul.f32 %v1257_v12, %v1254_v32  ;;  %v1761_v32 = vld [vmem:[%s7838_s7 + $0x40] sm:$0xff] }
 0x125   : > { %1782 = vmatpush.msrb.mxu3 %v1761_v32  ;;  %v4265_v32 = vld [vmem:[%s7842_s11 + $0x58] sm:$0x1] }
 0x126   : > { %v1263_v51 = vadd.f32 %v1259_v21, %v947_v56  ;;  %v1265_v26 = vadd.f32 %v1261_v24, %v949_v55  ;;  %v4229_v24 = vld [vmem:[%s7836_s5 + $0x8] sm:$0xff] }
 0x138   : > { %v5920_v22 = vpop.permute.xlu1 %1564 }
 0x13a   : > { %v1416_v25 = vpop.f32.mrf.mxu0 }
 0x13b   : > { %v1436_v0 = vpop.f32.mrf.mxu1 }
 0x13c   : > { %v1437_v27 = vadd.f32 %v1436_v0, %v1416_v25  ;;  %v1456_v28 = vpop.f32.mrf.mxu2 }
 0x13e   : > { %v1457_v58 = vadd.f32 %v1456_v28, %v1437_v27  ;;  %v1476_v1 = vpop.f32.mrf.mxu3 }
 0x140   : > { %v1477_v54 = vadd.f32 %v1476_v1, %v1457_v58  ;;  %v5927_v33 = vpop.permute.xlu1 %1586  ;;  %v4242_v1 = vld [vmem:[%s7838_s7 + $0x100] sm:$0x7] }
 0x141   : > { %4243 = vmatpush.msk.msrb.mxu0 %vm1771_vm4, %v4242_v1  ;;  %v4250_v1 = vld [vmem:[%s7839_s8 + $0x30] sm:$0xff] }
 0x142   : > { %v1572_v35 = vperm.slane %v1477_v54, 0  ;;  %v4241_v54 = vld [vmem:[%s7838_s7 + $0xf8] sm:$0xff] }
 0x143   : > { %1907 = vmatpush.msrb.mxu0 %v4241_v54  ;;  %v2027_v54 = vld [vmem:[%s7842_s11 + $0x20] sm:$0xff] }
 0x144   : > { %v1574_v38 = vmul.f32 %v1572_v35, %v5920_v22 }
 0x145   : > { %v1570_v41 = vpop.permute.xlu0 %1569  ;;  %1908 = vmatpush.msrb.mxu0 %v4240_v34  ;;  %v2026_v34 = vld [vmem:[%s7842_s11 + $0x18] sm:$0xff] }
 0x146   : > { %v1578_v42 = vadd.f32 %v1574_v38, %v1262_v37  ;;  %v1576_v44 = vmul.f32 %v1572_v35, %v1570_v41  ;;  %v1760_v35 = vld [vmem:[%s7838_s7 + $0x38] sm:$0xff]  ;;  %v4239_v37 = vld [vmem:[%s7838_s7 + $0xe8] sm:$0xff]  ;;  %v1759_v38 = vld [vmem:[%s7838_s7 + $0x30] sm:$0xff] }
 0x147   : > { %1783 = vmatpush.msrb.mxu3 %v1760_v35  ;;  %1909 = vmatpush.msrb.mxu0 %v4239_v37  ;;  %v4263_v35 = vld [vmem:[%s7842_s11 + $0x48] sm:$0xff]  ;;  %v4262_v37 = vld [vmem:[%s7842_s11 + $0x40] sm:$0xff] }
 0x148   : > { %v1594_v48 = vadd.f32 %v5927_v33, %v1578_v42  ;;  %v1580_v53 = vadd.f32 %v1576_v44, %v1264_v47  ;;  %v4237_v42 = vld [vmem:[%s7838_s7 + $0xd8] sm:$0xff]  ;;  %v1757_v44 = vld [vmem:[%s7838_s7 + $0x20] sm:$0xff] }
 0x149   : > { %v1592_v61 = vpop.permute.xlu1 %1591  ;;  %1784 = vmatpush.msrb.mxu3 %v1759_v38  ;;  %1910 = vmatpush.msrb.mxu0 %v4238_v40  ;;  %v1756_v47 = vld [vmem:[%s7838_s7 + $0x18] sm:$0xff]  ;;  %v2024_v38 = vld [vmem:[%s7842_s11 + $0x8] sm:$0xff] }
 0x14a   : > { %v1598_v57 = vmax.f32 %v1594_v48, 0.0  ;;  %v1596_v2 = vadd.f32 %v1592_v61, %v1580_v53  ;;  %v4218_v48 = vld [vmem:[%s7838_s7 + $0x70] sm:$0xff]  ;;  %v4217_v53 = vld [vmem:[%s7838_s7 + $0x68] sm:$0xff] }
 0x14b   : > { %1911 = vmatpush.msrb.mxu0 %v4237_v42 }
 0x14c   : > { %1650 = vmatmul.f32.vlgmr.msra.gmra.mxu2 %v1598_v57  ;;  %1721 = vmatmul.f32.vlgmr.msra.gmra.mxu0 %v1598_v57  ;;  %v1600_v4 = vmax.f32 %v1596_v2, 0.0  ;;  %v4234_v57 = vld [vmem:[%s7838_s7 + $0xc0] sm:$0xff]  ;;  %v4232_v2 = vld [vmem:[%s7838_s7 + $0xb0] sm:$0xff] }
 0x14d   : > { %1912 = vmatpush.msrb.mxu0 %v4236_v46 }
 0x14f   : > { %1913 = vmatpush.msrb.mxu0 %v4235_v49  ;;  %v4279_v49 = vld [vmem:[%s7842_s11 + $0x88] sm:$0x1] }
 0x151   : > { %1914 = vmatpush.msrb.mxu0 %v4234_v57  ;;  %v4277_v57 = vld [vmem:[%s7842_s11 + $0x78] sm:$0xff] }
 0x154   : > { %1653 = vmatmul.f32.gmra.mxu2 %v1600_v4  ;;  %1724 = vmatmul.f32.gmra.mxu0 %v1600_v4 }
 0x15c   : > { %v1516_v10 = vpop.f32.mrf.mxu0 }
 0x15d   : > { %v1496_v11 = vpop.f32.mrf.mxu3 }
 0x15e   : > { %v1517_v13 = vadd.f32 %v1516_v10, %v1496_v11 }
 0x15f   : > { %v1536_v16 = vpop.f32.mrf.mxu1 }
 0x160   : > { %v1537_v15 = vadd.f32 %v1536_v16, %v1517_v13 }
 0x161   : > { %v1556_v17 = vpop.f32.mrf.mxu2 }
 0x162   : > { %v1557_v50 = vadd.f32 %v1556_v17, %v1537_v15 }
 0x164   : > { %v1573_v20 = vperm.slane %v1557_v50, 0 }
 0x166   : > { %v1575_v14 = vmul.f32 %v1573_v20, %v5920_v22  ;;  %v1577_v25 = vmul.f32 %v1573_v20, %v1570_v41  ;;  %v4225_v22 = vld [vmem:[%s7838_s7 + $0xa8] sm:$0x7] }
 0x167   : > { %4226 = vmatpush.msk.msrb.mxu1 %vm1771_vm4, %v4225_v22  ;;  %v1758_v41 = vld [vmem:[%s7838_s7 + $0x28] sm:$0xff]  ;;  %v4251_v22 = vld [vmem:[%s7839_s8 + $0x38] sm:$0xff] }
 0x168   : > { %v1579_v0 = vadd.f32 %v1575_v14, %v1263_v51  ;;  %v1581_v28 = vadd.f32 %v1577_v25, %v1265_v26  ;;  %1785 = vmatpush.msrb.mxu3 %v1758_v41  ;;  %v4246_v51 = vld [vmem:[%s7836_s5 + $0x10] sm:$0xff]  ;;  %v1963_v14 = vld [vmem:[%s7839_s8 + $0x28] sm:$0x3]  ;;  %v1798_v25 = vld [vmem:[%s7836_s5] sm:$0xff] }
 0x169   : > { %1820 = vmatpush.msrb.mxu1 %v4224_v31  ;;  %v1962_v26 = vld [vmem:[%s7839_s8 + $0x20] sm:$0xff]  ;;  %v2028_v31 = vld [vmem:[%s7842_s11 + $0x28] sm:$0x1] }
 0x16a   : > { %v1595_v27 = vadd.f32 %v5927_v33, %v1579_v0  ;;  %v1597_v29 = vadd.f32 %v1592_v61, %v1581_v28  ;;  %v4223_v33 = vld [vmem:[%s7838_s7 + $0x98] sm:$0xff]  ;;  %1786 = vmatpush.msrb.mxu3 %v1757_v44 }
 0x16b   : > { %1821 = vmatpush.msrb.mxu1 %v4223_v33  ;;  %v4233_v61 = vld [vmem:[%s7838_s7 + $0xb8] sm:$0xff]  ;;  %v4264_v33 = vld [vmem:[%s7842_s11 + $0x50] sm:$0xff] }
 0x16c   : > { %v1599_v30 = vmax.f32 %v1595_v27, 0.0  ;;  %v1601_v58 = vmax.f32 %v1597_v29, 0.0  ;;  %1787 = vmatpush.msrb.mxu3 %v1756_v47  ;;  %1915 = vmatpush.msrb.mxu0 %v4233_v61  ;;  %v4255_v0 = vld [vmem:[%s7839_s8 + $0x58] sm:$0x3]  ;;  %v4254_v27 = vld [vmem:[%s7839_s8 + $0x50] sm:$0xff]  ;;  %v4274_v61 = vld [vmem:[%s7842_s11 + $0x60] sm:$0xff] }
 0x16d   : > { %1822 = vmatpush.msrb.mxu1 %v4222_v36  ;;  %v1961_v28 = vld [vmem:[%s7839_s8 + $0x18] sm:$0xff]  ;;  %v1960_v29 = vld [vmem:[%s7839_s8 + $0x10] sm:$0xff] }
 0x16e   : > { %4186 = vmatmul.msk.f32.vlgmr.msra.gmra.mxu3 %vm1623_vm3, %v1599_v30  ;;  %4210 = vmatmul.msk.f32.vlgmr.msra.gmra.mxu1 %vm1623_vm3, %v1599_v30  ;;  %v4253_v30 = vld [vmem:[%s7839_s8 + $0x48] sm:$0xff]  ;;  %v2025_v36 = vld [vmem:[%s7842_s11 + $0x10] sm:$0xff] }
 0x16f   : > { %1823 = vmatpush.msrb.mxu1 %v4221_v39  ;;  %1788 = vmatpush.msrb.mxu3 %v1755_v52  ;;  %v2023_v39 = vld [vmem:[%s7842_s11] sm:$0xff]  ;;  %v4260_v52 = vld [vmem:[%s7842_s11 + $0x30] sm:$0xff] }
 0x170   : > { %1916 = vmatpush.msrb.mxu0 %v4232_v2 }
 0x171   : > { %1824 = vmatpush.msrb.mxu1 %v4220_v43  ;;  %1789 = vmatpush.msrb.mxu3 %v1754_v59  ;;  %v4276_v59 = vld [vmem:[%s7842_s11 + $0x70] sm:$0xff] }
 0x172   : > { %4266 = vmatpush.msk.msra.mxu0 %vm2033_vm8, %v4265_v32  ;;  %v2240_v32 = vld [vmem:[%s7845_s14 + $0x48] sm:$0xff] }
 0x173   : > { %1825 = vmatpush.msrb.mxu1 %v4219_v45  ;;  %1790 = vmatpush.msrb.mxu3 %v1753_v62  ;;  %v1954_v45 = vpop.permute.xlu2 %1953 }
 0x174   : > { %2080 = vmatpush.msra.mxu0 %v4264_v33  ;;  %v4300_v33 = vld [vmem:[%s7845_s14 + $0xf0] sm:$0xff] }
 0x175   : > { %1826 = vmatpush.msrb.mxu1 %v4218_v48  ;;  %v4261_v48 = vld [vmem:[%s7842_s11 + $0x38] sm:$0xff] }
 0x176   : > { %4187 = vmatmul.msk.f32.gmra.mxu3 %vm1623_vm3, %v1601_v58  ;;  %4211 = vmatmul.msk.f32.gmra.mxu1 %vm1623_vm3, %v1601_v58  ;;  %v4252_v58 = vld [vmem:[%s7839_s8 + $0x40] sm:$0xff] }
 0x177   : > { %1827 = vmatpush.msrb.mxu1 %v4217_v53  ;;  %2081 = vmatpush.msra.mxu0 %v4263_v35  ;;  %v4278_v53 = vld [vmem:[%s7842_s11 + $0x80] sm:$0xff]  ;;  %v2237_v35 = vld [vmem:[%s7845_s14 + $0x30] sm:$0xff] }
 0x179   : > { %1828 = vmatpush.msrb.mxu1 %v4216_v60  ;;  %2082 = vmatpush.msra.mxu0 %v4262_v37  ;;  %v4275_v60 = vld [vmem:[%s7842_s11 + $0x68] sm:$0xff]  ;;  %v4298_v37 = vld [vmem:[%s7845_s14 + $0xe0] sm:$0xff] }
 0x17b   : > { %1829 = vmatpush.msrb.mxu1 %v4215_v63  ;;  %2083 = vmatpush.msra.mxu0 %v4261_v48  ;;  %v2232_v48 = vld [vmem:[%s7845_s14 + $0x8] sm:$0xff] }
 0x17d   : > { %2084 = vmatpush.msra.mxu0 %v4260_v52  ;;  %v4341_v52 = vld [vmem:[%s7845_s14 + $0x1e0] sm:$0xff] }
 0x1c9   : > { %v1722_v4 = vpop.f32.mrf.mxu0 }
 0x1cf   : > { %v1651_v5 = vpop.f32.mrf.mxu2 }
 0x1d1   : > { %v1725_v11 = vpop.f32.mrf.mxu0 }
 0x1d7   : > { %v1654_v12 = vpop.f32.mrf.mxu2 }
 0x1eb   : > { %v1745_v3 = vpop.f32.mrf.mxu1 }
 0x1ec   : > { %v1746_v7 = vadd.f32 %v1745_v3, %v1722_v4  ;;  %v4312_v3 = vld [vmem:[%s7845_s14 + $0x150] sm:$0x7]  ;;  %v4310_v4 = vld [vmem:[%s7845_s14 + $0x140] sm:$0xff] }
 0x1f1   : > { %v1674_v6 = vpop.f32.mrf.mxu3 }
 0x1f2   : > { %v1675_v8 = vadd.f32 %v1674_v6, %v1651_v5  ;;  %v4308_v5 = vld [vmem:[%s7845_s14 + $0x130] sm:$0xff]  ;;  %v4306_v6 = vld [vmem:[%s7845_s14 + $0x120] sm:$0xff] }
 0x1f3   : > { %v1748_v10 = vpop.f32.mrf.mxu1 }
 0x1f4   : > { %v1751_v9 = vmax.f32 %v1675_v8, %v1746_v7  ;;  %v1749_v16 = vadd.f32 %v1748_v10, %v1725_v11  ;;  %v4304_v7 = vld [vmem:[%s7845_s14 + $0x110] sm:$0xff]  ;;  %v4302_v8 = vld [vmem:[%s7845_s14 + $0x100] sm:$0xff] }
 0x1f5   : > { %v2057_v10 = vld [vmem:[%s7840_s9] sm:$0xff] }
 0x1f6   : > { %4213 = vmatmul.msk.f32.vlgmr.msrb.gmra.mxu3 %vm1764_vm5, %v1751_v9  ;;  %4227 = vmatmul.msk.f32.vlgmr.msrb.gmra.mxu1 %vm1764_vm5, %v1751_v9 }
 0x1f7   : > { %4244 = vmatmul.msk.f32.vlgmr.msrb.gmra.mxu0 %vm1764_vm5, %v1751_v9  ;;  %v4268_v9 = vld [vmem:[%s7840_s9 + $0x10] sm:$0xff] }
 0x1f9   : > { %v1677_v13 = vpop.f32.mrf.mxu3 }
 0x1fa   : > { %v1678_v19 = vadd.f32 %v1677_v13, %v1654_v12  ;;  %v2251_v13 = vld [vmem:[%s7845_s14 + $0xa0] sm:$0x7] }
 0x1fc   : > { %v1752_v15 = vmax.f32 %v1678_v19, %v1749_v16  ;;  %v2252_v16 = vld [vmem:[%s7845_s14 + $0xa8] sm:$0x7]  ;;  %v2249_v19 = vld [vmem:[%s7845_s14 + $0x90] sm:$0xff] }
 0x1fe   : > { %4214 = vmatmul.msk.f32.gmra.mxu3 %vm1764_vm5, %v1752_v15  ;;  %4228 = vmatmul.msk.f32.gmra.mxu1 %vm1764_vm5, %v1752_v15 }
 0x1ff   : > { %4245 = vmatmul.msk.f32.gmra.mxu0 %vm1764_vm5, %v1752_v15  ;;  %v2250_v15 = vld [vmem:[%s7845_s14 + $0x98] sm:$0xff] }
 0x273   : > { %v1831_v17 = vpop.f32.mrf.mxu1 }
 0x274   : > { %v1918_v21 = vpop.f32.mrf.mxu0 }
 0x279   : > { %v1792_v50 = vpop.f32.mrf.mxu3 }
 0x27b   : > { %v1834_v56 = vpop.f32.mrf.mxu1 }
 0x27c   : > { %v1921_v20 = vpop.f32.mrf.mxu0  ;;  %1857 = vmatpush.msrb.mxu2 %v1834_v56  ;;  %v4269_v56 = vld [vmem:[%s7840_s9 + $0x18] sm:$0xff] }
 0x27d   : > { %1943 = vmatpush.msra.mxu1 %v1921_v20  ;;  %v2058_v20 = vld [vmem:[%s7840_s9 + $0x8] sm:$0xff] }
 0x27e   : > { %1858 = vmatpush.msrb.mxu2 %v1831_v17  ;;  %v2247_v17 = vld [vmem:[%s7845_s14 + $0x80] sm:$0xff] }
 0x27f   : > { %1944 = vmatpush.msra.mxu1 %v1918_v21  ;;  %4230 = vmatmul.msk.f32.vlgmr.msrb.gmra.mxu2 %vm1839_vm6, %v4229_v24  ;;  %v2248_v21 = vld [vmem:[%s7845_s14 + $0x88] sm:$0xff] }
 0x280   : > { %4247 = vmatmul.msk.f32.vlgmr.msra.gmra.mxu1 %vm1839_vm6, %v4246_v51  ;;  %4248 = vmatpush.msk.msra.mxu2 %vm1968_vm7, %v1963_v14  ;;  %v4282_v51 = vld [vmem:[%s7840_s9 + $0x20] sm:$0xff]  ;;  %v2246_v14 = vld [vmem:[%s7845_s14 + $0x78] sm:$0xff] }
 0x281   : > { %v1795_v55 = vpop.f32.mrf.mxu3  ;;  %4258 = vmatpush.msk.msrb.mxu1 %vm2033_vm8, %v2028_v31  ;;  %v4297_v31 = vld [vmem:[%s7845_s14 + $0xd8] sm:$0xff] }
 0x282   : > { %1880 = vmatpush.msra.mxu3 %v1795_v55  ;;  %1983 = vmatpush.msra.mxu2 %v1962_v26  ;;  %v4313_v55 = vld [vmem:[%s7845_s14 + $0x158] sm:$0x7]  ;;  %v4311_v26 = vld [vmem:[%s7845_s14 + $0x148] sm:$0xff] }
 0x283   : > { %2048 = vmatpush.msrb.mxu1 %v2027_v54  ;;  %v2239_v54 = vld [vmem:[%s7845_s14 + $0x40] sm:$0xff] }
 0x284   : > { %1881 = vmatpush.msra.mxu3 %v1792_v50  ;;  %1984 = vmatpush.msra.mxu2 %v1961_v28  ;;  %v2245_v50 = vld [vmem:[%s7845_s14 + $0x70] sm:$0xff]  ;;  %v2242_v28 = vld [vmem:[%s7845_s14 + $0x58] sm:$0xff] }
 0x285   : > { %4231 = vmatmul.msk.f32.vlgmr.msra.gmra.mxu3 %vm1839_vm6, %v1798_v25  ;;  %2049 = vmatpush.msrb.mxu1 %v2026_v34  ;;  %v2243_v25 = vld [vmem:[%s7845_s14 + $0x60] sm:$0xff]  ;;  %v4295_v34 = vld [vmem:[%s7845_s14 + $0xc8] sm:$0xff] }
 0x286   : > { %4256 = vmatpush.msk.msrb.mxu3 %vm1968_vm7, %v4255_v0  ;;  %1985 = vmatpush.msra.mxu2 %v1960_v29  ;;  %v2244_v0 = vld [vmem:[%s7845_s14 + $0x68] sm:$0xff] }
 0x287   : > { %2050 = vmatpush.msrb.mxu1 %v2025_v36  ;;  %v4307_v29 = vld [vmem:[%s7845_s14 + $0x128] sm:$0xff]  ;;  %v2238_v36 = vld [vmem:[%s7845_s14 + $0x38] sm:$0xff] }
 0x288   : > { %2013 = vmatpush.msrb.mxu3 %v4254_v27  ;;  %1986 = vmatpush.msra.mxu2 %v1959_v18  ;;  %v2241_v27 = vld [vmem:[%s7845_s14 + $0x50] sm:$0xff]  ;;  %v4305_v18 = vld [vmem:[%s7845_s14 + $0x118] sm:$0xff] }
 0x289   : > { %2051 = vmatpush.msrb.mxu1 %v2024_v38  ;;  %v4293_v38 = vld [vmem:[%s7845_s14 + $0xb8] sm:$0xff] }
 0x28a   : > { %2014 = vmatpush.msrb.mxu3 %v4253_v30  ;;  %1987 = vmatpush.msra.mxu2 %v1958_v23  ;;  %v4309_v30 = vld [vmem:[%s7845_s14 + $0x138] sm:$0xff] }
 0x28b   : > { %2052 = vmatpush.msrb.mxu1 %v2023_v39  ;;  %v4301_v23 = vld [vmem:[%s7845_s14 + $0xf8] sm:$0xff]  ;;  %v2235_v39 = vld [vmem:[%s7845_s14 + $0x20] sm:$0xff] }
 0x28c   : > { %2015 = vmatpush.msrb.mxu3 %v4252_v58  ;;  %v4283_v58 = vld [vmem:[%s7840_s9 + $0x28] sm:$0xff] }
 0x28d   : > { %4280 = vmatpush.msk.msra.mxu1 %vm2033_vm8, %v4279_v49  ;;  %v4292_v49 = vld [vmem:[%s7845_s14 + $0xb0] sm:$0xff] }
 0x28e   : > { %2016 = vmatpush.msrb.mxu3 %v4251_v22  ;;  %v4303_v22 = vld [vmem:[%s7845_s14 + $0x108] sm:$0xff] }
 0x28f   : > { %2172 = vmatpush.msra.mxu1 %v4278_v53  ;;  %v4339_v53 = vld [vmem:[%s7845_s14 + $0x1d0] sm:$0xff] }
 0x290   : > { %2017 = vmatpush.msrb.mxu3 %v4250_v1  ;;  %v4299_v1 = vld [vmem:[%s7845_s14 + $0xe8] sm:$0xff] }
 0x291   : > { %2173 = vmatpush.msra.mxu1 %v4277_v57  ;;  %v4337_v57 = vld [vmem:[%s7845_s14 + $0x1c0] sm:$0xff] }
 0x293   : > { %2174 = vmatpush.msra.mxu1 %v4276_v59  ;;  %v4335_v59 = vld [vmem:[%s7845_s14 + $0x1b0] sm:$0xff] }
 0x295   : > { %2175 = vmatpush.msra.mxu1 %v4275_v60  ;;  %v4333_v60 = vld [vmem:[%s7845_s14 + $0x1a0] sm:$0xff] }
 0x297   : > { %2176 = vmatpush.msra.mxu1 %v4274_v61  ;;  %v4331_v61 = vld [vmem:[%s7845_s14 + $0x190] sm:$0xff] }
 0x2fd   : > { %v1946_v43 = vpop.f32.mrf.mxu1 }
 0x302   : > { %v1860_v40 = vpop.f32.mrf.mxu2 }
 0x308   : > { %v1883_v41 = vpop.f32.mrf.mxu3 }
 0x309   : > { %v1884_v42 = vadd.f32 %v1883_v41, %v1860_v40  ;;  %v2236_v40 = vld [vmem:[%s7845_s14 + $0x28] sm:$0xff]  ;;  %v4296_v41 = vld [vmem:[%s7845_s14 + $0xd0] sm:$0xff] }
 0x30b   : > { %v1949_v44 = vadd.f32 %v1946_v43, %v1884_v42  ;;  %v4345_v43 = vld [vmem:[%s7845_s14 + $0x200] sm:$0x7]  ;;  %v2233_v42 = vld [vmem:[%s7845_s14 + $0x10] sm:$0xff] }
 0x30d   : > { %v1956_v46 = vadd.f32 %v1954_v45, %v1949_v44  ;;  %v2234_v44 = vld [vmem:[%s7845_s14 + $0x18] sm:$0xff]  ;;  %v4294_v45 = vld [vmem:[%s7845_s14 + $0xc0] sm:$0xff] }
 0x30f   : > { %v1957_v47 = vmax.f32 %v1956_v46, 0.0  ;;  %v4343_v46 = vld [vmem:[%s7845_s14 + $0x1f0] sm:$0xff] }
 0x311   : > { %4249 = vmatmul.msk.f32.vlgmr.msra.gmra.mxu2 %vm1964_vm9, %v1957_v47  ;;  %4257 = vmatmul.msk.f32.vlgmr.msrb.gmra.mxu3 %vm1964_vm9, %v1957_v47  ;;  %v2231_v47 = vld [vmem:[%s7845_s14] sm:$0xff] }
 0x394   : > { %v1989_v62 = vpop.f32.mrf.mxu2  ;;  %v2019_v63 = vpop.f32.mrf.mxu3 }
 0x395   : > { %v2022_v2 = vmax.f32 %v1989_v62, %v2019_v63  ;;  %v4329_v62 = vld [vmem:[%s7845_s14 + $0x180] sm:$0xff]  ;;  %v4327_v63 = vld [vmem:[%s7845_s14 + $0x170] sm:$0xff] }
 0x397   : > { %4259 = vmatmul.msk.f32.vlgmr.msrb.gmra.mxu1 %vm2029_vm10, %v2022_v2  ;;  %4267 = vmatmul.msk.f32.vlgmr.msra.gmra.mxu0 %vm2029_vm10, %v2022_v2 }
 0x398   : > { %4314 = vmatpush.msk.msrb.mxu1 %vm1771_vm4, %v4312_v3 }
 0x39a   : > { %2347 = vmatpush.msrb.mxu1 %v4310_v4 }
 0x39c   : > { %2348 = vmatpush.msrb.mxu1 %v4308_v5 }
 0x39e   : > { %2349 = vmatpush.msrb.mxu1 %v4306_v6 }
 0x39f   : > { %4281 = vmatmul.msk.f32.vlgmr.msra.gmra.mxu1 %vm2029_vm10, %v2022_v2  ;;  %v4325_v2 = vld [vmem:[%s7845_s14 + $0x160] sm:$0xff] }
 0x3a0   : > { %2350 = vmatpush.msrb.mxu1 %v4304_v7 }
 0x3a2   : > { %2351 = vmatpush.msrb.mxu1 %v4302_v8  ;;  %v2220_v8 = vpop.permute.xlu0 %2219 }
 0x3a4   : > { %2352 = vmatpush.msrb.mxu1 %v4300_v33  ;;  %v6452_v33 = vld [vmem:[%s7843_s12 + $0x10] sm:$0xff] }
 0x3a6   : > { %2353 = vmatpush.msrb.mxu1 %v4298_v37  ;;  %v4372_v37 = vld [vmem:[%s7845_s14 + $0x290] sm:$0xff] }
 0x3a8   : > { %2354 = vmatpush.msrb.mxu1 %v4296_v41  ;;  %v4364_v41 = vld [vmem:[%s7845_s14 + $0x250] sm:$0xff] }
 0x3aa   : > { %2355 = vmatpush.msrb.mxu1 %v4294_v45  ;;  %v4356_v45 = vld [vmem:[%s7845_s14 + $0x210] sm:$0xff] }
 0x3ac   : > { %2356 = vmatpush.msrb.mxu1 %v4292_v49  ;;  %v4402_v49 = vld [vmem:[%s7845_s14 + $0x338] sm:$0xff] }
 0x414   : > { %v2054_v11 = vpop.f32.mrf.mxu1  ;;  %v2086_v12 = vpop.f32.mrf.mxu0 }
 0x415   : > { %2114 = vmatpush.msrb.mxu2 %v2086_v12  ;;  %2143 = vmatpush.msra.mxu3 %v2054_v11 }
 0x416   : > { %4270 = vmatmul.msk.f32.vlgmr.msrb.gmra.mxu2 %vm2092_vm11, %v4268_v9  ;;  %4272 = vmatmul.msk.f32.vlgmr.msra.gmra.mxu3 %vm2092_vm11, %v2057_v10 }
 0x417   : > { %4286 = vmatpush.msk.msra.mxu2 %vm1771_vm4, %v2251_v13  ;;  %4289 = vmatpush.msk.msrb.mxu3 %vm1771_vm4, %v2252_v16 }
 0x419   : > { %2271 = vmatpush.msra.mxu2 %v2249_v19  ;;  %2294 = vmatpush.msrb.mxu3 %v2250_v15  ;;  %v2225_v15 = vpop.permute.xlu1 %2224 }
 0x41b   : > { %2272 = vmatpush.msra.mxu2 %v2247_v17  ;;  %2295 = vmatpush.msrb.mxu3 %v2248_v21 }
 0x41c   : > { %v2178_v24 = vpop.f32.mrf.mxu1 }
 0x41d   : > { %2205 = vmatpush.msrb.mxu0 %v2178_v24  ;;  %2273 = vmatpush.msra.mxu2 %v2245_v50 }
 0x41e   : > { %4271 = vmatmul.msk.f32.gmra.mxu2 %vm2092_vm11, %v4269_v56  ;;  %4273 = vmatmul.msk.f32.gmra.mxu3 %vm2092_vm11, %v2058_v20 }
 0x41f   : > { %4284 = vmatmul.msk.f32.vlgmr.msrb.gmra.mxu0 %vm2092_vm11, %v4282_v51  ;;  %2296 = vmatpush.msrb.mxu3 %v2246_v14 }
 0x420   : > { %4317 = vmatpush.msk.msra.mxu0 %vm1771_vm4, %v4313_v55  ;;  %2274 = vmatpush.msra.mxu2 %v2243_v25  ;;  %v4346_v55 = vld [vmem:[%s7845_s14 + $0x208] sm:$0x7] }
 0x421   : > { %2297 = vmatpush.msrb.mxu3 %v2244_v0  ;;  %v4320_v25 = vld [vmem:[%s7843_s12 + $0x8] sm:$0xff]  ;;  %v4344_v0 = vld [vmem:[%s7845_s14 + $0x1f8] sm:$0xff] }
 0x422   : > { %2370 = vmatpush.msra.mxu0 %v4311_v26  ;;  %2275 = vmatpush.msra.mxu2 %v2241_v27 }
 0x423   : > { %2298 = vmatpush.msrb.mxu3 %v2242_v28  ;;  %v4342_v28 = vld [vmem:[%s7845_s14 + $0x1e8] sm:$0xff] }
 0x424   : > { %2371 = vmatpush.msra.mxu0 %v4309_v30  ;;  %2276 = vmatpush.msra.mxu2 %v2239_v54  ;;  %v2311_v30 = vld [vmem:[%s7843_s12] sm:$0xff]  ;;  %v4330_v54 = vld [vmem:[%s7845_s14 + $0x188] sm:$0xff] }
 0x425   : > { %2299 = vmatpush.msrb.mxu3 %v2240_v32  ;;  %v4376_v32 = vld [vmem:[%s7845_s14 + $0x2b0] sm:$0x7] }
 0x426   : > { %2372 = vmatpush.msra.mxu0 %v4307_v29  ;;  %2277 = vmatpush.msra.mxu2 %v2237_v35  ;;  %v4340_v29 = vld [vmem:[%s7845_s14 + $0x1d8] sm:$0xff]  ;;  %v4374_v35 = vld [vmem:[%s7845_s14 + $0x2a0] sm:$0xff] }
 0x427   : > { %4285 = vmatmul.msk.f32.gmra.mxu0 %vm2092_vm11, %v4283_v58  ;;  %2300 = vmatpush.msrb.mxu3 %v2238_v36  ;;  %v4326_v36 = vld [vmem:[%s7845_s14 + $0x168] sm:$0xff] }
 0x428   : > { %2373 = vmatpush.msra.mxu0 %v4305_v18  ;;  %2278 = vmatpush.msra.mxu2 %v2235_v39  ;;  %v4338_v18 = vld [vmem:[%s7845_s14 + $0x1c8] sm:$0xff]  ;;  %v4368_v39 = vld [vmem:[%s7845_s14 + $0x270] sm:$0xff] }
 0x429   : > { %2301 = vmatpush.msrb.mxu3 %v2236_v40  ;;  %v4366_v40 = vld [vmem:[%s7845_s14 + $0x260] sm:$0xff] }
 0x42a   : > { %2374 = vmatpush.msra.mxu0 %v4303_v22  ;;  %2279 = vmatpush.msra.mxu2 %v2233_v42  ;;  %v4336_v22 = vld [vmem:[%s7845_s14 + $0x1b8] sm:$0xff]  ;;  %v4360_v42 = vld [vmem:[%s7845_s14 + $0x230] sm:$0xff] }
 0x42b   : > { %2302 = vmatpush.msrb.mxu3 %v2234_v44  ;;  %v4358_v44 = vld [vmem:[%s7845_s14 + $0x220] sm:$0xff] }
 0x42c   : > { %2375 = vmatpush.msra.mxu0 %v4301_v23  ;;  %2280 = vmatpush.msra.mxu2 %v2231_v47  ;;  %v4334_v23 = vld [vmem:[%s7845_s14 + $0x1a8] sm:$0xff]  ;;  %v4406_v47 = vld [vmem:[%s7845_s14 + $0x358] sm:$0xff] }
 0x42d   : > { %2303 = vmatpush.msrb.mxu3 %v2232_v48  ;;  %v4404_v48 = vld [vmem:[%s7845_s14 + $0x348] sm:$0xff] }
 0x42e   : > { %2376 = vmatpush.msra.mxu0 %v4299_v1  ;;  %v4332_v1 = vld [vmem:[%s7845_s14 + $0x198] sm:$0xff] }
 0x430   : > { %2377 = vmatpush.msra.mxu0 %v4297_v31 }
 0x432   : > { %2378 = vmatpush.msra.mxu0 %v4295_v34  ;;  %v4328_v34 = vld [vmem:[%s7845_s14 + $0x178] sm:$0xff] }
 0x434   : > { %2379 = vmatpush.msra.mxu0 %v4293_v38  ;;  %v4370_v38 = vld [vmem:[%s7845_s14 + $0x280] sm:$0xff] }
 0x436   : > { %4347 = vmatpush.msk.msrb.mxu0 %vm1771_vm4, %v4345_v43  ;;  %v4362_v43 = vld [vmem:[%s7845_s14 + $0x240] sm:$0xff] }
 0x438   : > { %2510 = vmatpush.msrb.mxu0 %v4343_v46  ;;  %v4408_v46 = vld [vmem:[%s7845_s14 + $0x368] sm:$0x7] }
 0x43a   : > { %2511 = vmatpush.msrb.mxu0 %v4341_v52  ;;  %v4400_v52 = vld [vmem:[%s7845_s14 + $0x328] sm:$0xff] }
 0x43c   : > { %2512 = vmatpush.msrb.mxu0 %v4339_v53  ;;  %v4398_v53 = vld [vmem:[%s7845_s14 + $0x318] sm:$0xff] }
 0x43e   : > { %2513 = vmatpush.msrb.mxu0 %v4337_v57  ;;  %v4396_v57 = vld [vmem:[%s7845_s14 + $0x308] sm:$0xff] }
 0x440   : > { %2514 = vmatpush.msrb.mxu0 %v4335_v59  ;;  %v4394_v59 = vld [vmem:[%s7845_s14 + $0x2f8] sm:$0xff] }
 0x442   : > { %2515 = vmatpush.msrb.mxu0 %v4333_v60  ;;  %v4392_v60 = vld [vmem:[%s7845_s14 + $0x2e8] sm:$0xff] }
 0x444   : > { %2516 = vmatpush.msrb.mxu0 %v4331_v61  ;;  %v4390_v61 = vld [vmem:[%s7845_s14 + $0x2d8] sm:$0xff] }
 0x446   : > { %2517 = vmatpush.msrb.mxu0 %v4329_v62  ;;  %v4388_v62 = vld [vmem:[%s7845_s14 + $0x2c8] sm:$0xff] }
 0x448   : > { %2518 = vmatpush.msrb.mxu0 %v4327_v63 }
 0x44a   : > { %2519 = vmatpush.msrb.mxu0 %v4325_v2 }
 0x499   : > { %v2116_v3 = vpop.f32.mrf.mxu2  ;;  %v2145_v4 = vpop.f32.mrf.mxu3 }
 0x49a   : > { %v2146_v5 = vadd.f32 %v2145_v4, %v2116_v3 }
 0x49c   : > { %v2207_v6 = vpop.f32.mrf.mxu0 }
 0x49d   : > { %v2213_v7 = vadd.f32 %v2207_v6, %v2146_v5 }
 0x49f   : > { %v2227_v9 = vadd.f32 %v2220_v8, %v2213_v7 }
 0x4a1   : > { %v6384_v10 = vmax.f32 %v2227_v9, 0.0  ;;  %v2119_v11 = vpop.f32.mrf.mxu2  ;;  %v2148_v12 = vpop.f32.mrf.mxu3 }
 0x4a2   : > { %v2149_v13 = vadd.f32 %v2148_v12, %v2119_v11  ;;  %v4377_v11 = vld [vmem:[%s7845_s14 + $0x2b8] sm:$0x7]  ;;  %v4375_v12 = vld [vmem:[%s7845_s14 + $0x2a8] sm:$0xff] }
 0x4a3   : > { %4287 = vmatmul.msk.f32.vlgmr.msra.gmra.mxu2 %vm1764_vm5, %v6384_v10  ;;  %4290 = vmatmul.msk.f32.vlgmr.msrb.gmra.mxu3 %vm1764_vm5, %v6384_v10 }
 0x4a4   : > { %4315 = vmatmul.msk.f32.vlgmr.msrb.gmra.mxu1 %vm1764_vm5, %v6384_v10  ;;  %4318 = vmatmul.msk.f32.vlgmr.msra.gmra.mxu0 %vm1764_vm5, %v6384_v10  ;;  %v2210_v16 = vpop.f32.mrf.mxu0 }
 0x4a5   : > { %v2214_v19 = vadd.f32 %v2210_v16, %v2149_v13  ;;  %v4373_v13 = vld [vmem:[%s7845_s14 + $0x298] sm:$0xff]  ;;  %v4371_v16 = vld [vmem:[%s7845_s14 + $0x288] sm:$0xff] }
 0x4a7   : > { %v2228_v17 = vadd.f32 %v2225_v15, %v2214_v19  ;;  %v4369_v15 = vld [vmem:[%s7845_s14 + $0x278] sm:$0xff] }
 0x4a9   : > { %v6394_v21 = vmax.f32 %v2228_v17, 0.0  ;;  %v6564_v17 = vld [vmem:[%s7843_s12 + $0x18] sm:$0xff] }
 0x4ab   : > { %4288 = vmatmul.msk.f32.gmra.mxu2 %vm1764_vm5, %v6394_v21  ;;  %4291 = vmatmul.msk.f32.gmra.mxu3 %vm1764_vm5, %v6394_v21 }
 0x4ac   : > { %4316 = vmatmul.msk.f32.gmra.mxu1 %vm1764_vm5, %v6394_v21  ;;  %4319 = vmatmul.msk.f32.gmra.mxu0 %vm1764_vm5, %v6394_v21 }
 0x4b4   : > { %4348 = vmatmul.msk.f32.vlgmr.msrb.gmra.mxu0 %vm1764_vm5, %v6384_v10 }
 0x4bc   : > { %4349 = vmatmul.msk.f32.gmra.mxu0 %vm1764_vm5, %v6394_v21 }
 0x521   : > { %v2358_v50 = vpop.f32.mrf.mxu1  ;;  %v2381_v56 = vpop.f32.mrf.mxu0 }
 0x526   : > { %v2282_v20 = vpop.f32.mrf.mxu2  ;;  %v2305_v24 = vpop.f32.mrf.mxu3 }
 0x529   : > { %v2361_v51 = vpop.f32.mrf.mxu1  ;;  %v2384_v14 = vpop.f32.mrf.mxu0 }
 0x52a   : > { %2406 = vmatpush.msrb.mxu2 %v2361_v51  ;;  %2426 = vmatpush.msra.mxu3 %v2384_v14  ;;  %v4363_v51 = vld [vmem:[%s7845_s14 + $0x248] sm:$0xff]  ;;  %v4403_v14 = vld [vmem:[%s7845_s14 + $0x340] sm:$0xff] }
 0x52c   : > { %2407 = vmatpush.msrb.mxu2 %v2358_v50  ;;  %2427 = vmatpush.msra.mxu3 %v2381_v56  ;;  %v4367_v50 = vld [vmem:[%s7845_s14 + $0x268] sm:$0xff]  ;;  %v4407_v56 = vld [vmem:[%s7845_s14 + $0x360] sm:$0x7] }
 0x52d   : > { %4321 = vmatmul.msk.f32.vlgmr.msrb.gmra.mxu2 %vm1839_vm6, %v4320_v25  ;;  %4322 = vmatmul.msk.f32.vlgmr.msra.gmra.mxu3 %vm1839_vm6, %v4320_v25  ;;  %v4401_v25 = vld [vmem:[%s7845_s14 + $0x330] sm:$0xff] }
 0x52e   : > { %4350 = vmatpush.msk.msrb.mxu3 %vm1771_vm4, %v4346_v55  ;;  %v2285_v26 = vpop.f32.mrf.mxu2  ;;  %v2308_v27 = vpop.f32.mrf.mxu3  ;;  %v4361_v55 = vld [vmem:[%s7845_s14 + $0x238] sm:$0xff] }
 0x52f   : > { %2449 = vmatpush.msra.mxu1 %v2285_v26  ;;  %2469 = vmatpush.msra.mxu2 %v2308_v27  ;;  %v4399_v26 = vld [vmem:[%s7845_s14 + $0x320] sm:$0xff]  ;;  %v4357_v27 = vld [vmem:[%s7845_s14 + $0x218] sm:$0xff] }
 0x530   : > { %2533 = vmatpush.msrb.mxu3 %v4344_v0  ;;  %v4359_v0 = vld [vmem:[%s7845_s14 + $0x228] sm:$0xff] }
 0x531   : > { %v2521_v58 = vpop.f32.mrf.mxu0  ;;  %2450 = vmatpush.msra.mxu1 %v2282_v20  ;;  %2470 = vmatpush.msra.mxu2 %v2305_v24  ;;  %v4365_v20 = vld [vmem:[%s7845_s14 + $0x258] sm:$0xff]  ;;  %v4405_v24 = vld [vmem:[%s7845_s14 + $0x350] sm:$0xff] }
 0x532   : > { %2534 = vmatpush.msrb.mxu3 %v4342_v28  ;;  %4323 = vmatmul.msk.f32.vlgmr.msra.gmra.mxu1 %vm1839_vm6, %v2311_v30  ;;  %v4397_v28 = vld [vmem:[%s7845_s14 + $0x310] sm:$0xff] }
 0x534   : > { %2535 = vmatpush.msrb.mxu3 %v4340_v29  ;;  %v4395_v29 = vld [vmem:[%s7845_s14 + $0x300] sm:$0xff] }
 0x535   : > { %4324 = vmatmul.msk.f32.vlgmr.msra.gmra.mxu2 %vm1839_vm6, %v2311_v30 }
 0x536   : > { %2536 = vmatpush.msrb.mxu3 %v4338_v18  ;;  %v4391_v18 = vld [vmem:[%s7845_s14 + $0x2e0] sm:$0xff] }
 0x538   : > { %2537 = vmatpush.msrb.mxu3 %v4336_v22  ;;  %v4389_v22 = vld [vmem:[%s7845_s14 + $0x2d0] sm:$0xff] }
 0x539   : > { %v2524_v31 = vpop.f32.mrf.mxu0 }
 0x53a   : > { %2538 = vmatpush.msrb.mxu3 %v4334_v23  ;;  %2569 = vmatpush.msrb.mxu1 %v2524_v31 }
 0x53c   : > { %2539 = vmatpush.msrb.mxu3 %v4332_v1  ;;  %2570 = vmatpush.msrb.mxu1 %v2521_v58  ;;  %v4393_v58 = vld [vmem:[%s7845_s14 + $0x2f0] sm:$0xff]  ;;  %v4387_v1 = vld [vmem:[%s7845_s14 + $0x2c0] sm:$0xff] }
 0x53d   : > { %4354 = vmatmul.msk.f32.vlgmr.msrb.gmra.mxu1 %vm1839_vm6, %v6452_v33 }
 0x53e   : > { %2540 = vmatpush.msrb.mxu3 %v4330_v54  ;;  %4378 = vmatpush.msk.msra.mxu1 %vm1771_vm4, %v4376_v32 }
 0x540   : > { %2541 = vmatpush.msrb.mxu3 %v4328_v34  ;;  %2632 = vmatpush.msra.mxu1 %v4374_v35  ;;  %v6634_v34 = vld [vmem:[%s7843_s12 + $0x20] sm:$0xff] }
 0x542   : > { %2542 = vmatpush.msrb.mxu3 %v4326_v36  ;;  %2633 = vmatpush.msra.mxu1 %v4372_v37  ;;  %v2976_v36 = vld [vmem:[%s7848_s17 + $0x3e8] sm:$0x1]  ;;  %v2971_v37 = vld [vmem:[%s7848_s17 + $0x3c0] sm:$0xff] }
 0x543   : > { %4351 = vmatmul.msk.f32.vlgmr.msrb.gmra.mxu3 %vm1764_vm5, %v6384_v10 }
 0x544   : > { %2634 = vmatpush.msra.mxu1 %v4370_v38  ;;  %v2972_v38 = vld [vmem:[%s7848_s17 + $0x3c8] sm:$0xff] }
 0x546   : > { %2635 = vmatpush.msra.mxu1 %v4368_v39  ;;  %v2967_v39 = vld [vmem:[%s7848_s17 + $0x3a0] sm:$0xff] }
 0x548   : > { %2636 = vmatpush.msra.mxu1 %v4366_v40  ;;  %v2968_v40 = vld [vmem:[%s7848_s17 + $0x3a8] sm:$0xff] }
 0x54a   : > { %2637 = vmatpush.msra.mxu1 %v4364_v41  ;;  %v2912_v41 = vld [vmem:[%s7848_s17 + $0x1e8] sm:$0xff] }
 0x54b   : > { %4352 = vmatmul.msk.f32.gmra.mxu3 %vm1764_vm5, %v6394_v21 }
 0x54c   : > { %2638 = vmatpush.msra.mxu1 %v4362_v43  ;;  %v2963_v43 = vld [vmem:[%s7848_s17 + $0x380] sm:$0xff] }
 0x54e   : > { %2639 = vmatpush.msra.mxu1 %v4360_v42  ;;  %v2964_v42 = vld [vmem:[%s7848_s17 + $0x388] sm:$0xff] }
 0x550   : > { %2640 = vmatpush.msra.mxu1 %v4358_v44  ;;  %v2908_v44 = vld [vmem:[%s7848_s17 + $0x1c8] sm:$0xff] }
 0x552   : > { %2641 = vmatpush.msra.mxu1 %v4356_v45  ;;  %v2904_v45 = vld [vmem:[%s7848_s17 + $0x1a8] sm:$0xff] }
 0x553   : > { %4379 = vmatmul.msk.f32.vlgmr.msra.gmra.mxu1 %vm1764_vm5, %v6384_v10 }
 0x554   : > { %4412 = vmatpush.msk.msrb.mxu1 %vm1771_vm4, %v4408_v46  ;;  %v2959_v46 = vld [vmem:[%s7848_s17 + $0x360] sm:$0xff] }
 0x556   : > { %2777 = vmatpush.msrb.mxu1 %v4406_v47  ;;  %v2960_v47 = vld [vmem:[%s7848_s17 + $0x368] sm:$0xff] }
 0x558   : > { %2778 = vmatpush.msrb.mxu1 %v4404_v48  ;;  %v2900_v48 = vld [vmem:[%s7848_s17 + $0x188] sm:$0xff] }
 0x55a   : > { %2779 = vmatpush.msrb.mxu1 %v4402_v49  ;;  %v2955_v49 = vld [vmem:[%s7848_s17 + $0x340] sm:$0xff] }
 0x55b   : > { %4380 = vmatmul.msk.f32.gmra.mxu1 %vm1764_vm5, %v6394_v21 }
 0x55c   : > { %2780 = vmatpush.msrb.mxu1 %v4400_v52  ;;  %v2956_v52 = vld [vmem:[%s7848_s17 + $0x348] sm:$0xff] }
 0x55e   : > { %2781 = vmatpush.msrb.mxu1 %v4398_v53  ;;  %v2896_v53 = vld [vmem:[%s7848_s17 + $0x168] sm:$0xff] }
 0x560   : > { %2782 = vmatpush.msrb.mxu1 %v4396_v57  ;;  %v2951_v57 = vld [vmem:[%s7848_s17 + $0x320] sm:$0xff] }
 0x562   : > { %2783 = vmatpush.msrb.mxu1 %v4394_v59  ;;  %v2952_v59 = vld [vmem:[%s7848_s17 + $0x328] sm:$0xff] }
 0x564   : > { %2784 = vmatpush.msrb.mxu1 %v4392_v60  ;;  %v2892_v60 = vld [vmem:[%s7848_s17 + $0x148] sm:$0xff] }
 0x566   : > { %2785 = vmatpush.msrb.mxu1 %v4390_v61 }
 0x568   : > { %2786 = vmatpush.msrb.mxu1 %v4388_v62  ;;  %v2947_v62 = vld [vmem:[%s7848_s17 + $0x300] sm:$0xff] }
 0x569   : > { %4413 = vmatmul.msk.f32.vlgmr.msrb.gmra.mxu1 %vm1764_vm5, %v6384_v10 }
 0x56a   : > { %4420 = vmatpush.msk.msra.mxu1 %vm2033_vm8, %v2976_v36  ;;  %v2891_v36 = vld [vmem:[%s7848_s17 + $0x140] sm:$0xff] }
 0x56c   : > { %3056 = vmatpush.msra.mxu1 %v2972_v38  ;;  %v2914_v38 = vld [vmem:[%s7848_s17 + $0x1f8] sm:$0xff] }
 0x56e   : > { %3057 = vmatpush.msra.mxu1 %v2968_v40  ;;  %v2887_v40 = vld [vmem:[%s7848_s17 + $0x120] sm:$0xff] }
 0x570   : > { %3058 = vmatpush.msra.mxu1 %v2964_v42  ;;  %v2962_v42 = vld [vmem:[%s7848_s17 + $0x378] sm:$0xff] }
 0x571   : > { %4414 = vmatmul.msk.f32.gmra.mxu1 %vm1764_vm5, %v6394_v21 }
 0x572   : > { %3059 = vmatpush.msra.mxu1 %v2960_v47  ;;  %v2958_v47 = vld [vmem:[%s7848_s17 + $0x358] sm:$0xff] }
 0x574   : > { %3060 = vmatpush.msra.mxu1 %v2956_v52  ;;  %v2902_v52 = vld [vmem:[%s7848_s17 + $0x198] sm:$0xff] }
 0x576   : > { %3061 = vmatpush.msra.mxu1 %v2952_v59  ;;  %v2871_v59 = vld [vmem:[%s7848_s17 + $0xa0] sm:$0xff] }
 0x5af   : > { %v2452_v2 = vpop.f32.mrf.mxu1 }
 0x5b0   : > { %v2409_v63 = vpop.f32.mrf.mxu2  ;;  %v6539_v4 = vpop.f32.mrf.mxu3 }
 0x5b1   : > { %v2453_v3 = vadd.f32 %v2452_v2, %v2409_v63  ;;  %v2948_v63 = vld [vmem:[%s7848_s17 + $0x308] sm:$0xff] }
 0x5b2   : > { %v2888_v2 = vld [vmem:[%s7848_s17 + $0x128] sm:$0xff]  ;;  %3062 = vmatpush.msra.mxu1 %v2948_v63  ;;  %v2855_v63 = vld [vmem:[%s7848_s17 + $0x20] sm:$0xff] }
 0x5b8   : > { %v2472_v31 = vpop.f32.mrf.mxu2 }
 0x5b9   : > { %v2473_v54 = vadd.f32 %v2472_v31, %v6539_v4  ;;  %v2944_v4 = vld [vmem:[%s7848_s17 + $0x2e8] sm:$0xff]  ;;  %v2974_v31 = vld [vmem:[%s7848_s17 + $0x3d8] sm:$0xff] }
 0x5ba   : > { %v2572_v5 = vpop.f32.mrf.mxu1  ;;  %3063 = vmatpush.msra.mxu1 %v2944_v4  ;;  %v2909_v4 = vld [vmem:[%s7848_s17 + $0x1d0] sm:$0xff] }
 0x5bb   : > { %v6541_v6 = vadd.f32 %v2572_v5, %v2453_v3  ;;  %v2943_v3 = vld [vmem:[%s7848_s17 + $0x2e0] sm:$0xff]  ;;  %v2884_v5 = vld [vmem:[%s7848_s17 + $0x108] sm:$0xff] }
 0x5c6   : > { %v2544_v7 = vpop.f32.mrf.mxu3 }
 0x5ce   : > { %v2547_v8 = vpop.f32.mrf.mxu3 }
 0x5cf   : > { %2589 = vmatpush.msrb.mxu2 %v2547_v8  ;;  %v2940_v8 = vld [vmem:[%s7848_s17 + $0x2c8] sm:$0xff] }
 0x5d0   : > { %v2643_v9 = vpop.f32.mrf.mxu1  ;;  %3064 = vmatpush.msra.mxu1 %v2940_v8  ;;  %v2949_v8 = vld [vmem:[%s7848_s17 + $0x310] sm:$0xff] }
 0x5d1   : > { %2590 = vmatpush.msrb.mxu2 %v2544_v7  ;;  %v2939_v7 = vld [vmem:[%s7848_s17 + $0x2c0] sm:$0xff] }
 0x5d2   : > { %4355 = vmatmul.msk.f32.vlgmr.msrb.gmra.mxu2 %vm1839_vm6, %v6452_v33 }
 0x5d3   : > { %4381 = vmatpush.msk.msra.mxu2 %vm1771_vm4, %v4377_v11  ;;  %v2935_v11 = vld [vmem:[%s7848_s17 + $0x2a0] sm:$0xff] }
 0x5d5   : > { %2655 = vmatpush.msra.mxu2 %v4375_v12  ;;  %v2936_v12 = vld [vmem:[%s7848_s17 + $0x2a8] sm:$0xff] }
 0x5d6   : > { %3065 = vmatpush.msra.mxu1 %v2936_v12  ;;  %v2893_v12 = vld [vmem:[%s7848_s17 + $0x150] sm:$0xff] }
 0x5d7   : > { %2656 = vmatpush.msra.mxu2 %v4373_v13  ;;  %v2876_v13 = vld [vmem:[%s7848_s17 + $0xc8] sm:$0xff] }
 0x5d8   : > { %v2646_v19 = vpop.f32.mrf.mxu1 }
 0x5d9   : > { %2657 = vmatpush.msra.mxu2 %v4371_v16  ;;  %2691 = vmatpush.msra.mxu0 %v2646_v19  ;;  %v2931_v19 = vld [vmem:[%s7848_s17 + $0x280] sm:$0xff] }
 0x5db   : > { %2658 = vmatpush.msra.mxu2 %v4369_v15  ;;  %2692 = vmatpush.msra.mxu0 %v2643_v9  ;;  %v2880_v9 = vld [vmem:[%s7848_s17 + $0xe8] sm:$0xff] }
 0x5dc   : > { %4385 = vmatmul.msk.f32.vlgmr.msra.gmra.mxu0 %vm1839_vm6, %v6564_v17  ;;  %v2932_v15 = vld [vmem:[%s7848_s17 + $0x288] sm:$0xff] }
 0x5dd   : > { %2659 = vmatpush.msra.mxu2 %v4367_v50  ;;  %4409 = vmatpush.msk.msrb.mxu0 %vm1771_vm4, %v4407_v56  ;;  %v2927_v50 = vld [vmem:[%s7848_s17 + $0x260] sm:$0xff]  ;;  %v2928_v56 = vld [vmem:[%s7848_s17 + $0x268] sm:$0xff] }
 0x5de   : > { %3066 = vmatpush.msra.mxu1 %v2932_v15  ;;  %v2889_v15 = vld [vmem:[%s7848_s17 + $0x130] sm:$0xff] }
 0x5df   : > { %2660 = vmatpush.msra.mxu2 %v4365_v20  ;;  %2754 = vmatpush.msrb.mxu0 %v4405_v24  ;;  %v2872_v20 = vld [vmem:[%s7848_s17 + $0xa8] sm:$0xff] }
 0x5e0   : > { %3067 = vmatpush.msra.mxu1 %v2928_v56  ;;  %v2890_v56 = vld [vmem:[%s7848_s17 + $0x138] sm:$0xff] }
 0x5e1   : > { %2661 = vmatpush.msra.mxu2 %v4363_v51  ;;  %2755 = vmatpush.msrb.mxu0 %v4403_v14  ;;  %v2923_v51 = vld [vmem:[%s7848_s17 + $0x240] sm:$0xff] }
 0x5e2   : > { %v2911_v14 = vld [vmem:[%s7848_s17 + $0x1e0] sm:$0xff] }
 0x5e3   : > { %2662 = vmatpush.msra.mxu2 %v4361_v55  ;;  %2756 = vmatpush.msrb.mxu0 %v4401_v25  ;;  %v2924_v55 = vld [vmem:[%s7848_s17 + $0x248] sm:$0xff] }
 0x5e4   : > { %v2868_v25 = vld [vmem:[%s7848_s17 + $0x88] sm:$0xff]  ;;  %3068 = vmatpush.msra.mxu1 %v2924_v55  ;;  %v2938_v55 = vld [vmem:[%s7848_s17 + $0x2b8] sm:$0xff] }
 0x5e5   : > { %2663 = vmatpush.msra.mxu2 %v4359_v0  ;;  %2757 = vmatpush.msrb.mxu0 %v4399_v26  ;;  %v2907_v0 = vld [vmem:[%s7848_s17 + $0x1c0] sm:$0xff]  ;;  %v2920_v26 = vld [vmem:[%s7848_s17 + $0x228] sm:$0xff] }
 0x5e6   : > { %v2788_v30 = vpop.f32.mrf.mxu1  ;;  %3069 = vmatpush.msra.mxu1 %v2920_v26  ;;  %v2934_v26 = vld [vmem:[%s7848_s17 + $0x298] sm:$0xff] }
 0x5e7   : > { %2664 = vmatpush.msra.mxu2 %v4357_v27  ;;  %2758 = vmatpush.msrb.mxu0 %v4397_v28  ;;  %v2915_v27 = vld [vmem:[%s7848_s17 + $0x200] sm:$0xff]  ;;  %v2864_v28 = vld [vmem:[%s7848_s17 + $0x68] sm:$0xff] }
 0x5e8   : > { %4382 = vmatmul.msk.f32.vlgmr.msra.gmra.mxu2 %vm1764_vm5, %v6384_v10 }
 0x5e9   : > { %2759 = vmatpush.msrb.mxu0 %v4395_v29  ;;  %v2903_v29 = vld [vmem:[%s7848_s17 + $0x1a0] sm:$0xff] }
 0x5eb   : > { %2760 = vmatpush.msrb.mxu0 %v4393_v58  ;;  %v2977_v58 = vld [vmem:[%s7848_s17 + $0x3f0] sm:$0x1] }
 0x5ed   : > { %2761 = vmatpush.msrb.mxu0 %v4391_v18  ;;  %v2978_v18 = vld [vmem:[%s7848_s17 + $0x3f8] sm:$0x1] }
 0x5ee   : > { %v2791_v23 = vpop.f32.mrf.mxu1 }
 0x5ef   : > { %2762 = vmatpush.msrb.mxu0 %v4389_v22  ;;  %2833 = vmatpush.msrb.mxu2 %v2791_v23  ;;  %v2860_v22 = vld [vmem:[%s7848_s17 + $0x48] sm:$0xff]  ;;  %v2899_v23 = vld [vmem:[%s7848_s17 + $0x180] sm:$0xff] }
 0x5f0   : > { %4383 = vmatmul.msk.f32.gmra.mxu2 %vm1764_vm5, %v6394_v21 }
 0x5f1   : > { %2763 = vmatpush.msrb.mxu0 %v4387_v1  ;;  %2834 = vmatpush.msrb.mxu2 %v2788_v30  ;;  %v2916_v30 = vld [vmem:[%s7848_s17 + $0x208] sm:$0xff]  ;;  %v2973_v1 = vld [vmem:[%s7848_s17 + $0x3d0] sm:$0xff] }
 0x5f2   : > { %4410 = vmatmul.msk.f32.vlgmr.msrb.gmra.mxu0 %vm1764_vm5, %v6384_v10  ;;  %3070 = vmatpush.msra.mxu1 %v2916_v30  ;;  %v2878_v30 = vld [vmem:[%s7848_s17 + $0xd8] sm:$0xff] }
 0x5f3   : > { %3035 = vmatpush.msra.mxu0 %v2912_v41  ;;  %v2961_v41 = vld [vmem:[%s7848_s17 + $0x370] sm:$0xff] }
 0x5f4   : > { %4424 = vmatpush.msk.msrb.mxu1 %vm2033_vm8, %v2978_v18  ;;  %v2925_v18 = vld [vmem:[%s7848_s17 + $0x250] sm:$0xff] }
 0x5f5   : > { %3036 = vmatpush.msra.mxu0 %v2908_v44  ;;  %v2883_v44 = vld [vmem:[%s7848_s17 + $0x100] sm:$0xff] }
 0x5f6   : > { %3136 = vmatpush.msrb.mxu1 %v2974_v31  ;;  %v2921_v31 = vld [vmem:[%s7848_s17 + $0x230] sm:$0xff] }
 0x5f7   : > { %3037 = vmatpush.msra.mxu0 %v2904_v45  ;;  %v2957_v45 = vld [vmem:[%s7848_s17 + $0x350] sm:$0xff] }
 0x5f8   : > { %4417 = vmatmul.msk.f32.vlgmr.msrb.gmra.mxu2 %vm1839_vm6, %v6634_v34 }
 0x5f9   : > { %3038 = vmatpush.msra.mxu0 %v2900_v48  ;;  %v2879_v48 = vld [vmem:[%s7848_s17 + $0xe0] sm:$0xff] }
 0x5fa   : > { %4411 = vmatmul.msk.f32.gmra.mxu0 %vm1764_vm5, %v6394_v21  ;;  %v2975_v21 = vld [vmem:[%s7848_s17 + $0x3e0] sm:$0x1] }
 0x5fb   : > { %4418 = vmatpush.msk.msra.mxu2 %vm2033_vm8, %v2975_v21  ;;  %3039 = vmatpush.msra.mxu0 %v2896_v53  ;;  %v2852_v21 = vld [vmem:[%s7848_s17 + $0x8] sm:$0xff]  ;;  %v2954_v53 = vld [vmem:[%s7848_s17 + $0x338] sm:$0xff] }
 0x5fd   : > { %3016 = vmatpush.msra.mxu2 %v2971_v37  ;;  %3040 = vmatpush.msra.mxu0 %v2892_v60  ;;  %v2965_v37 = vld [vmem:[%s7848_s17 + $0x390] sm:$0xff]  ;;  %v2867_v60 = vld [vmem:[%s7848_s17 + $0x80] sm:$0xff] }
 0x5ff   : > { %3017 = vmatpush.msra.mxu2 %v2967_v39  ;;  %3041 = vmatpush.msra.mxu0 %v2888_v2  ;;  %v2966_v39 = vld [vmem:[%s7848_s17 + $0x398] sm:$0xff]  ;;  %v2851_v2 = vld [vmem:[%s7848_s17] sm:$0xff] }
 0x601   : > { %3018 = vmatpush.msra.mxu2 %v2963_v43  ;;  %3042 = vmatpush.msra.mxu0 %v2884_v5  ;;  %v2910_v43 = vld [vmem:[%s7848_s17 + $0x1d8] sm:$0xff]  ;;  %v2905_v5 = vld [vmem:[%s7848_s17 + $0x1b0] sm:$0xff] }
 0x603   : > { %3019 = vmatpush.msra.mxu2 %v2959_v46  ;;  %3043 = vmatpush.msra.mxu0 %v2880_v9  ;;  %v2906_v46 = vld [vmem:[%s7848_s17 + $0x1b8] sm:$0xff] }
 0x604   : > { %v2898_v9 = vld [vmem:[%s7848_s17 + $0x178] sm:$0xff] }
 0x605   : > { %3020 = vmatpush.msra.mxu2 %v2955_v49  ;;  %3044 = vmatpush.msra.mxu0 %v2876_v13  ;;  %v2953_v49 = vld [vmem:[%s7848_s17 + $0x330] sm:$0xff] }
 0x606   : > { %v2945_v13 = vld [vmem:[%s7848_s17 + $0x2f0] sm:$0xff] }
 0x607   : > { %3021 = vmatpush.msra.mxu2 %v2951_v57  ;;  %3045 = vmatpush.msra.mxu0 %v2872_v20  ;;  %v2875_v57 = vld [vmem:[%s7848_s17 + $0xc0] sm:$0xff]  ;;  %v2942_v20 = vld [vmem:[%s7848_s17 + $0x2d8] sm:$0xff] }
 0x609   : > { %3022 = vmatpush.msra.mxu2 %v2947_v62  ;;  %3046 = vmatpush.msra.mxu0 %v2868_v25  ;;  %v2859_v62 = vld [vmem:[%s7848_s17 + $0x40] sm:$0xff]  ;;  %v2933_v25 = vld [vmem:[%s7848_s17 + $0x290] sm:$0xff] }
 0x60b   : > { %3023 = vmatpush.msra.mxu2 %v2943_v3  ;;  %3047 = vmatpush.msra.mxu0 %v2864_v28  ;;  %v2913_v3 = vld [vmem:[%s7848_s17 + $0x1f0] sm:$0xff] }
 0x60c   : > { %v2929_v28 = vld [vmem:[%s7848_s17 + $0x270] sm:$0xff] }
 0x60d   : > { %3024 = vmatpush.msra.mxu2 %v2939_v7  ;;  %3048 = vmatpush.msra.mxu0 %v2860_v22  ;;  %v2897_v7 = vld [vmem:[%s7848_s17 + $0x170] sm:$0xff]  ;;  %v2874_v22 = vld [vmem:[%s7848_s17 + $0xb8] sm:$0xff] }
 0x60f   : > { %3025 = vmatpush.msra.mxu2 %v2935_v11  ;;  %v2950_v11 = vld [vmem:[%s7848_s17 + $0x318] sm:$0xff] }
 0x611   : > { %3026 = vmatpush.msra.mxu2 %v2931_v19  ;;  %v2946_v19 = vld [vmem:[%s7848_s17 + $0x2f8] sm:$0xff] }
 0x613   : > { %3027 = vmatpush.msra.mxu2 %v2927_v50  ;;  %v2941_v50 = vld [vmem:[%s7848_s17 + $0x2d0] sm:$0xff] }
 0x615   : > { %3028 = vmatpush.msra.mxu2 %v2923_v51  ;;  %v2937_v51 = vld [vmem:[%s7848_s17 + $0x2b0] sm:$0xff] }
 0x655   : > { %v2592_v32 = vpop.f32.mrf.mxu2 }
 0x656   : > { %v6629_v33 = vadd.f32 %v2592_v32, %v2473_v54  ;;  %v2856_v54 = vld [vmem:[%s7848_s17 + $0x28] sm:$0xff]  ;;  %v2895_v32 = vld [vmem:[%s7848_s17 + $0x160] sm:$0xff] }
 0x657   : > { %3049 = vmatpush.msra.mxu0 %v2856_v54  ;;  %v2870_v54 = vld [vmem:[%s7848_s17 + $0x98] sm:$0xff] }
 0x659   : > { %v2694_v35 = vpop.f32.mrf.mxu0  ;;  %3050 = vmatpush.msra.mxu0 %v2852_v21  ;;  %v2866_v21 = vld [vmem:[%s7848_s17 + $0x78] sm:$0xff] }
 0x65a   : > { %v6639_v10 = vadd.f32 %v2694_v35, %v6541_v6  ;;  %v2970_v35 = vld [vmem:[%s7848_s17 + $0x3b8] sm:$0xff] }
 0x65b   : > { %3137 = vmatpush.msrb.mxu1 %v2970_v35  ;;  %3115 = vmatpush.msrb.mxu0 %v2914_v38  ;;  %v2917_v35 = vld [vmem:[%s7848_s17 + $0x210] sm:$0xff]  ;;  %v2862_v38 = vld [vmem:[%s7848_s17 + $0x58] sm:$0xff] }
 0x65d   : > { %3138 = vmatpush.msrb.mxu1 %v2966_v39  ;;  %3116 = vmatpush.msrb.mxu0 %v2910_v43  ;;  %v2857_v39 = vld [vmem:[%s7848_s17 + $0x30] sm:$0xff]  ;;  %v2854_v43 = vld [vmem:[%s7848_s17 + $0x18] sm:$0xff] }
 0x65f   : > { %3139 = vmatpush.msrb.mxu1 %v2962_v42  ;;  %3117 = vmatpush.msrb.mxu0 %v2906_v46 }
 0x661   : > { %3140 = vmatpush.msrb.mxu1 %v2958_v47  ;;  %3118 = vmatpush.msrb.mxu0 %v2902_v52  ;;  %v2845_v47 = vpop.permute.xlu2 %2844 }
 0x663   : > { %3141 = vmatpush.msrb.mxu1 %v2954_v53  ;;  %3119 = vmatpush.msrb.mxu0 %v2898_v9  ;;  %v3370_v9 = vld [vmem:[%s7849_s18 + $0x3e0] sm:$0xff] }
 0x665   : > { %3142 = vmatpush.msrb.mxu1 %v2950_v11  ;;  %v3270_v11 = vld [vmem:[%s7849_s18 + $0xc0] sm:$0xff] }
 0x667   : > { %3143 = vmatpush.msrb.mxu1 %v2946_v19 }
 0x669   : > { %3144 = vmatpush.msrb.mxu1 %v2942_v20 }
 0x66b   : > { %v2666_v61 = vpop.f32.mrf.mxu2  ;;  %3145 = vmatpush.msrb.mxu1 %v2938_v55  ;;  %v3258_v55 = vld [vmem:[%s7849_s18 + $0x60] sm:$0xff] }
 0x66d   : > { %3146 = vmatpush.msrb.mxu1 %v2934_v26  ;;  %v3486_v26 = vld [vmem:[%s7849_s18 + $0x780] sm:$0xff] }
 0x66f   : > { %v2765_v6 = vpop.f32.mrf.mxu0 }
 0x673   : > { %v2669_v16 = vpop.f32.mrf.mxu2 }
 0x674   : > { %2711 = vmatpush.msra.mxu3 %v2669_v16  ;;  %v2894_v16 = vld [vmem:[%s7848_s17 + $0x158] sm:$0xff] }
 0x675   : > { %3120 = vmatpush.msrb.mxu0 %v2894_v16  ;;  %v3266_v16 = vld [vmem:[%s7849_s18 + $0xa0] sm:$0xff] }
 0x676   : > { %2712 = vmatpush.msra.mxu3 %v2666_v61  ;;  %v2863_v61 = vld [vmem:[%s7848_s17 + $0x60] sm:$0xff] }
 0x677   : > { %4386 = vmatmul.msk.f32.vlgmr.msra.gmra.mxu3 %vm1839_vm6, %v6564_v17  ;;  %v2768_v24 = vpop.f32.mrf.mxu0  ;;  %v2919_v17 = vld [vmem:[%s7848_s17 + $0x220] sm:$0xff]  ;;  %3121 = vmatpush.msrb.mxu0 %v2890_v56 }
 0x678   : > { %2813 = vmatpush.msrb.mxu3 %v2768_v24  ;;  %3029 = vmatpush.msra.mxu2 %v2919_v17  ;;  %v2885_v24 = vld [vmem:[%s7848_s17 + $0x110] sm:$0xff]  ;;  %v3262_v56 = vld [vmem:[%s7849_s18 + $0x80] sm:$0xff] }
 0x679   : > { %v2881_v17 = vld [vmem:[%s7848_s17 + $0xf0] sm:$0xff] }
 0x67a   : > { %2814 = vmatpush.msrb.mxu3 %v2765_v6  ;;  %3030 = vmatpush.msra.mxu2 %v2915_v27  ;;  %v2901_v6 = vld [vmem:[%s7848_s17 + $0x190] sm:$0xff] }
 0x67b   : > { %v2877_v27 = vld [vmem:[%s7848_s17 + $0xd0] sm:$0xff] }
 0x67c   : > { %2995 = vmatpush.msra.mxu3 %v2911_v14  ;;  %4422 = vmatpush.msk.msrb.mxu2 %vm2033_vm8, %v2977_v58  ;;  %v2886_v14 = vld [vmem:[%s7848_s17 + $0x118] sm:$0xff]  ;;  %v2873_v58 = vld [vmem:[%s7848_s17 + $0xb0] sm:$0xff] }
 0x67d   : > { %3122 = vmatpush.msrb.mxu0 %v2886_v14 }
 0x67e   : > { %2996 = vmatpush.msra.mxu3 %v2907_v0  ;;  %3096 = vmatpush.msrb.mxu2 %v2973_v1  ;;  %v2882_v0 = vld [vmem:[%s7848_s17 + $0xf8] sm:$0xff]  ;;  %v2869_v1 = vld [vmem:[%s7848_s17 + $0x90] sm:$0xff] }
 0x67f   : > { %4416 = vmatmul.msk.f32.vlgmr.msrb.gmra.mxu3 %vm1839_vm6, %v6634_v34  ;;  %v2969_v34 = vld [vmem:[%s7848_s17 + $0x3b0] sm:$0xff]  ;;  %3123 = vmatpush.msrb.mxu0 %v2882_v0  ;;  %v3254_v0 = vld [vmem:[%s7849_s18 + $0x40] sm:$0xff] }
 0x680   : > { %2997 = vmatpush.msra.mxu3 %v2903_v29  ;;  %3097 = vmatpush.msrb.mxu2 %v2969_v34  ;;  %v2930_v29 = vld [vmem:[%s7848_s17 + $0x278] sm:$0xff]  ;;  %v2865_v34 = vld [vmem:[%s7848_s17 + $0x70] sm:$0xff] }
 0x681   : > { %3124 = vmatpush.msrb.mxu0 %v2878_v30  ;;  %3147 = vmatpush.msrb.mxu1 %v2930_v29 }
 0x682   : > { %2998 = vmatpush.msra.mxu3 %v2899_v23  ;;  %3098 = vmatpush.msrb.mxu2 %v2965_v37  ;;  %v2926_v23 = vld [vmem:[%s7848_s17 + $0x258] sm:$0xff]  ;;  %v2861_v37 = vld [vmem:[%s7848_s17 + $0x50] sm:$0xff] }
 0x683   : > { %3125 = vmatpush.msrb.mxu0 %v2874_v22  ;;  %3148 = vmatpush.msrb.mxu1 %v2926_v23  ;;  %v3346_v22 = vld [vmem:[%s7849_s18 + $0x320] sm:$0xff] }
 0x684   : > { %2999 = vmatpush.msra.mxu3 %v2895_v32  ;;  %3099 = vmatpush.msrb.mxu2 %v2961_v41  ;;  %v2922_v32 = vld [vmem:[%s7848_s17 + $0x238] sm:$0xff]  ;;  %v2853_v41 = vld [vmem:[%s7848_s17 + $0x10] sm:$0xff]  ;;  %v3478_v23 = vld [vmem:[%s7849_s18 + $0x740] sm:$0xff] }
 0x685   : > { %3126 = vmatpush.msrb.mxu0 %v2870_v54  ;;  %3149 = vmatpush.msrb.mxu1 %v2922_v32  ;;  %v3246_v54 = vld [vmem:[%s7849_s18] sm:$0xff] }
 0x686   : > { %3000 = vmatpush.msra.mxu3 %v2891_v36  ;;  %3100 = vmatpush.msrb.mxu2 %v2957_v45  ;;  %v2918_v36 = vld [vmem:[%s7848_s17 + $0x218] sm:$0xff]  ;;  %v3474_v32 = vld [vmem:[%s7849_s18 + $0x720] sm:$0xff] }
 0x687   : > { %3127 = vmatpush.msrb.mxu0 %v2866_v21  ;;  %3150 = vmatpush.msrb.mxu1 %v2918_v36  ;;  %v3307_v21 = vld [vmem:[%s7849_s18 + $0x1e8] sm:$0xff]  ;;  %v3470_v36 = vld [vmem:[%s7849_s18 + $0x700] sm:$0xff] }
 0x688   : > { %3001 = vmatpush.msra.mxu3 %v2887_v40  ;;  %3101 = vmatpush.msrb.mxu2 %v2953_v49  ;;  %v2858_v40 = vld [vmem:[%s7848_s17 + $0x38] sm:$0xff] }
 0x689   : > { %3128 = vmatpush.msrb.mxu0 %v2862_v38  ;;  %v3334_v38 = vld [vmem:[%s7849_s18 + $0x2c0] sm:$0xff] }
 0x68a   : > { %3002 = vmatpush.msra.mxu3 %v2883_v44  ;;  %3102 = vmatpush.msrb.mxu2 %v2949_v8  ;;  %v2836_v44 = vpop.f32.mrf.mxu2  ;;  %v3274_v8 = vld [vmem:[%s7849_s18 + $0xe0] sm:$0xff] }
 0x68b   : > { %3129 = vmatpush.msrb.mxu0 %v2858_v40  ;;  %v3466_v40 = vld [vmem:[%s7849_s18 + $0x6e0] sm:$0xff] }
 0x68c   : > { %3003 = vmatpush.msra.mxu3 %v2879_v48  ;;  %3103 = vmatpush.msrb.mxu2 %v2945_v13  ;;  %v3366_v13 = vld [vmem:[%s7849_s18 + $0x3c0] sm:$0xff] }
 0x68d   : > { %3130 = vmatpush.msrb.mxu0 %v2854_v43  ;;  %v3330_v43 = vld [vmem:[%s7849_s18 + $0x2a0] sm:$0xff] }
 0x68e   : > { %3004 = vmatpush.msra.mxu3 %v2875_v57  ;;  %3104 = vmatpush.msrb.mxu2 %v2941_v50 }
 0x690   : > { %3005 = vmatpush.msra.mxu3 %v2871_v59  ;;  %3105 = vmatpush.msrb.mxu2 %v2937_v51  ;;  %v3358_v51 = vld [vmem:[%s7849_s18 + $0x380] sm:$0xff] }
 0x692   : > { %3006 = vmatpush.msra.mxu3 %v2867_v60  ;;  %3106 = vmatpush.msrb.mxu2 %v2933_v25  ;;  %v3302_v60 = vld [vmem:[%s7849_s18 + $0x1c0] sm:$0xff] }
 0x693   : > { %v3354_v25 = vld [vmem:[%s7849_s18 + $0x360] sm:$0xff] }
 0x694   : > { %3007 = vmatpush.msra.mxu3 %v2863_v61  ;;  %3107 = vmatpush.msrb.mxu2 %v2929_v28  ;;  %v3294_v61 = vld [vmem:[%s7849_s18 + $0x180] sm:$0xff] }
 0x695   : > { %v3250_v28 = vld [vmem:[%s7849_s18 + $0x20] sm:$0xff] }
 0x696   : > { %3008 = vmatpush.msra.mxu3 %v2859_v62  ;;  %3108 = vmatpush.msrb.mxu2 %v2925_v18  ;;  %v3290_v62 = vld [vmem:[%s7849_s18 + $0x160] sm:$0xff] }
 0x698   : > { %3009 = vmatpush.msra.mxu3 %v2855_v63  ;;  %3109 = vmatpush.msrb.mxu2 %v2921_v31  ;;  %v3286_v63 = vld [vmem:[%s7849_s18 + $0x140] sm:$0xff] }
 0x699   : > { %v3342_v31 = vld [vmem:[%s7849_s18 + $0x300] sm:$0xff] }
 0x69a   : > { %3010 = vmatpush.msra.mxu3 %v2851_v2  ;;  %3110 = vmatpush.msrb.mxu2 %v2917_v35  ;;  %v3282_v2 = vld [vmem:[%s7849_s18 + $0x120] sm:$0xff] }
 0x69b   : > { %v3338_v35 = vld [vmem:[%s7849_s18 + $0x2e0] sm:$0xff] }
 0x69c   : > { %3075 = vmatpush.msrb.mxu3 %v2913_v3 }
 0x69e   : > { %3076 = vmatpush.msrb.mxu3 %v2909_v4  ;;  %v3278_v4 = vld [vmem:[%s7849_s18 + $0x100] sm:$0xff] }
 0x6a0   : > { %3077 = vmatpush.msrb.mxu3 %v2905_v5 }
 0x6a2   : > { %3078 = vmatpush.msrb.mxu3 %v2901_v6 }
 0x6a4   : > { %3079 = vmatpush.msrb.mxu3 %v2897_v7  ;;  %v3155_v7 = vld [vmem:[%s7846_s15] sm:$0x1] }
 0x6a6   : > { %3080 = vmatpush.msrb.mxu3 %v2893_v12 }
 0x6a8   : > { %3081 = vmatpush.msrb.mxu3 %v2889_v15  ;;  %v3362_v15 = vld [vmem:[%s7849_s18 + $0x3a0] sm:$0xff] }
 0x6aa   : > { %3082 = vmatpush.msrb.mxu3 %v2885_v24 }
 0x6ac   : > { %3083 = vmatpush.msrb.mxu3 %v2881_v17  ;;  %v3490_v17 = vld [vmem:[%s7849_s18 + $0x7a0] sm:$0x7f] }
 0x6ae   : > { %3084 = vmatpush.msrb.mxu3 %v2877_v27  ;;  %v3350_v27 = vld [vmem:[%s7849_s18 + $0x340] sm:$0xff] }
 0x6b0   : > { %3085 = vmatpush.msrb.mxu3 %v2873_v58  ;;  %v3482_v58 = vld [vmem:[%s7849_s18 + $0x760] sm:$0xff] }
 0x6b2   : > { %3086 = vmatpush.msrb.mxu3 %v2869_v1  ;;  %v3434_v1 = vld [vmem:[%s7849_s18 + $0x5e0] sm:$0xff] }
 0x6b4   : > { %3087 = vmatpush.msrb.mxu3 %v2865_v34  ;;  %v3430_v34 = vld [vmem:[%s7849_s18 + $0x5c0] sm:$0xff] }
 0x6b6   : > { %3088 = vmatpush.msrb.mxu3 %v2861_v37  ;;  %v3426_v37 = vld [vmem:[%s7849_s18 + $0x5a0] sm:$0xff] }
 0x6b8   : > { %3089 = vmatpush.msrb.mxu3 %v2857_v39  ;;  %v3303_v39 = vld [vmem:[%s7849_s18 + $0x1c8] sm:$0xff] }
 0x6ba   : > { %3090 = vmatpush.msrb.mxu3 %v2853_v41  ;;  %v3422_v41 = vld [vmem:[%s7849_s18 + $0x580] sm:$0xff] }
 0x6fa   : > { %v2714_v42 = vpop.f32.mrf.mxu3 }
 0x6fb   : > { %v2718_v45 = vadd.f32 %v2714_v42, %v6629_v33  ;;  %v3306_v33 = vld [vmem:[%s7849_s18 + $0x1e0] sm:$0xff]  ;;  %v3299_v42 = vld [vmem:[%s7849_s18 + $0x1a8] sm:$0xff] }
 0x6fd   : > { %v2840_v46 = vadd.f32 %v2836_v44, %v2718_v45  ;;  %v3462_v44 = vld [vmem:[%s7849_s18 + $0x6c0] sm:$0xff] }
 0x6fe   : > { %v3418_v45 = vld [vmem:[%s7849_s18 + $0x560] sm:$0xff] }
 0x6ff   : > { %v2848_v48 = vadd.f32 %v2845_v47, %v2840_v46  ;;  %v3326_v46 = vld [vmem:[%s7849_s18 + $0x280] sm:$0xff] }
 0x701   : > { %v2850_v49 = vmax.f32 %v2848_v48, 0.0  ;;  %v3458_v48 = vld [vmem:[%s7849_s18 + $0x6a0] sm:$0xff] }
 0x702   : > { %v2816_v52 = vpop.f32.mrf.mxu3 }
 0x703   : > { %v2839_v53 = vadd.f32 %v2816_v52, %v6639_v10  ;;  %4419 = vmatmul.msk.f32.vlgmr.msra.gmra.mxu2 %vm2979_vm12, %v2850_v49  ;;  %4421 = vmatmul.msk.f32.vlgmr.msra.gmra.mxu1 %vm2979_vm12, %v2850_v49  ;;  %v3298_v10 = vld [vmem:[%s7849_s18 + $0x1a0] sm:$0xff] }
 0x704   : > { %3520 = vmatpush.msra.mxu1 %v3306_v33  ;;  %v3322_v52 = vld [vmem:[%s7849_s18 + $0x260] sm:$0xff] }
 0x705   : > { %v2847_v57 = vadd.f32 %v2845_v47, %v2839_v53  ;;  %v3295_v47 = vld [vmem:[%s7849_s18 + $0x188] sm:$0xff]  ;;  %v3318_v33 = vld [vmem:[%s7849_s18 + $0x240] sm:$0xff] }
 0x706   : > { %3521 = vmatpush.msra.mxu1 %v3302_v60  ;;  %v3291_v53 = vld [vmem:[%s7849_s18 + $0x168] sm:$0xff] }
 0x707   : > { %v2849_v59 = vmax.f32 %v2847_v57, 0.0  ;;  %v3454_v57 = vld [vmem:[%s7849_s18 + $0x680] sm:$0xff]  ;;  %v3287_v60 = vld [vmem:[%s7849_s18 + $0x148] sm:$0xff] }
 0x708   : > { %3522 = vmatpush.msra.mxu1 %v3298_v10  ;;  %v3450_v10 = vld [vmem:[%s7849_s18 + $0x660] sm:$0xff] }
 0x709   : > { %3011 = vmatmul.f32.vlgmr.msra.gmra.mxu3 %v2849_v59  ;;  %3051 = vmatmul.f32.vlgmr.msra.gmra.mxu0 %v2849_v59 }
 0x70a   : > { %3523 = vmatpush.msra.mxu1 %v3294_v61  ;;  %v3406_v61 = vld [vmem:[%s7849_s18 + $0x500] sm:$0xff] }
 0x70b   : > { %4423 = vmatmul.msk.f32.vlgmr.msrb.gmra.mxu2 %vm2979_vm12, %v2850_v49  ;;  %4425 = vmatmul.msk.f32.vlgmr.msrb.gmra.mxu1 %vm2979_vm12, %v2850_v49  ;;  %v3414_v49 = vld [vmem:[%s7849_s18 + $0x540] sm:$0xff] }
 0x70c   : > { %3524 = vmatpush.msra.mxu1 %v3290_v62  ;;  %v3314_v62 = vld [vmem:[%s7849_s18 + $0x220] sm:$0xff] }
 0x70e   : > { %3525 = vmatpush.msra.mxu1 %v3286_v63  ;;  %v3283_v63 = vld [vmem:[%s7849_s18 + $0x128] sm:$0xff] }
 0x710   : > { %3526 = vmatpush.msra.mxu1 %v3282_v2  ;;  %v3446_v2 = vld [vmem:[%s7849_s18 + $0x640] sm:$0xff] }
 0x711   : > { %3091 = vmatmul.f32.vlgmr.msrb.gmra.mxu3 %v2849_v59  ;;  %3131 = vmatmul.f32.vlgmr.msrb.gmra.mxu0 %v2849_v59  ;;  %v3410_v59 = vld [vmem:[%s7849_s18 + $0x520] sm:$0xff] }
 0x712   : > { %3527 = vmatpush.msra.mxu1 %v3278_v4  ;;  %v3310_v4 = vld [vmem:[%s7849_s18 + $0x200] sm:$0xff] }
 0x714   : > { %3528 = vmatpush.msra.mxu1 %v3274_v8  ;;  %v3398_v8 = vld [vmem:[%s7849_s18 + $0x4c0] sm:$0xff] }
 0x716   : > { %3529 = vmatpush.msra.mxu1 %v3270_v11  ;;  %v3438_v11 = vld [vmem:[%s7849_s18 + $0x600] sm:$0xff] }
 0x718   : > { %3530 = vmatpush.msra.mxu1 %v3266_v16  ;;  %v3394_v16 = vld [vmem:[%s7849_s18 + $0x4a0] sm:$0xff] }
 0x71a   : > { %3531 = vmatpush.msra.mxu1 %v3262_v56  ;;  %v3390_v56 = vld [vmem:[%s7849_s18 + $0x480] sm:$0xff] }
 0x71c   : > { %3532 = vmatpush.msra.mxu1 %v3258_v55  ;;  %v3419_v55 = vld [vmem:[%s7849_s18 + $0x568] sm:$0xff] }
 0x71e   : > { %3533 = vmatpush.msra.mxu1 %v3254_v0  ;;  %v3415_v0 = vld [vmem:[%s7849_s18 + $0x548] sm:$0xff] }
 0x720   : > { %3534 = vmatpush.msra.mxu1 %v3250_v28  ;;  %v3411_v28 = vld [vmem:[%s7849_s18 + $0x528] sm:$0xff] }
 0x722   : > { %3535 = vmatpush.msra.mxu1 %v3246_v54  ;;  %v3399_v54 = vld [vmem:[%s7849_s18 + $0x4c8] sm:$0xff] }
 0x724   : > { %3600 = vmatpush.msrb.mxu1 %v3307_v21  ;;  %v3479_v21 = vld [vmem:[%s7849_s18 + $0x748] sm:$0xff] }
 0x726   : > { %3601 = vmatpush.msrb.mxu1 %v3303_v39  ;;  %v3331_v39 = vld [vmem:[%s7849_s18 + $0x2a8] sm:$0xff] }
 0x728   : > { %3602 = vmatpush.msrb.mxu1 %v3299_v42  ;;  %v3323_v42 = vld [vmem:[%s7849_s18 + $0x268] sm:$0xff] }
 0x72a   : > { %3603 = vmatpush.msrb.mxu1 %v3295_v47  ;;  %v3471_v47 = vld [vmem:[%s7849_s18 + $0x708] sm:$0xff] }
 0x72c   : > { %3604 = vmatpush.msrb.mxu1 %v3291_v53  ;;  %v3467_v53 = vld [vmem:[%s7849_s18 + $0x6e8] sm:$0xff] }
 0x72e   : > { %3605 = vmatpush.msrb.mxu1 %v3287_v60  ;;  %v3251_v60 = vld [vmem:[%s7849_s18 + $0x28] sm:$0xff] }
 0x730   : > { %3606 = vmatpush.msrb.mxu1 %v3283_v63  ;;  %v3451_v63 = vld [vmem:[%s7849_s18 + $0x668] sm:$0xff] }
 0x780   : > { %v3072_v3 = vpop.f32.mrf.mxu1 }
 0x786   : > { %v3052_v5 = vpop.f32.mrf.mxu0  ;;  %v3032_v12 = vpop.f32.mrf.mxu2 }
 0x787   : > { %v3073_v6 = vadd.f32 %v3072_v3, %v3052_v5  ;;  %v3402_v3 = vld [vmem:[%s7849_s18 + $0x4e0] sm:$0xff]  ;;  %v3279_v5 = vld [vmem:[%s7849_s18 + $0x108] sm:$0xff] }
 0x788   : > { %v3152_v20 = vpop.f32.mrf.mxu1  ;;  %3607 = vmatpush.msrb.mxu1 %v3279_v5  ;;  %v3160_v5 = vpop.permute.xlu0 %3159 }
 0x789   : > { %3201 = vmatpush.msra.mxu2 %v3073_v6  ;;  %v3442_v6 = vld [vmem:[%s7849_s18 + $0x620] sm:$0xff] }
 0x78a   : > { %4427 = vmatmul.msk.f32.vlgmr.msra.gmra.mxu2 %vm2092_vm11, %v3155_v7 }
 0x78b   : > { %3540 = vmatpush.msrb.mxu2 %v3370_v9  ;;  %v3275_v9 = vld [vmem:[%s7849_s18 + $0xe8] sm:$0xff] }
 0x78c   : > { %v3012_v19 = vpop.f32.mrf.mxu3  ;;  %3608 = vmatpush.msrb.mxu1 %v3275_v9  ;;  %v3492_v9 = vld [vmem:[%s7849_s18 + $0x7b0] sm:$0x7f] }
 0x78d   : > { %v3033_v50 = vadd.f32 %v3032_v12, %v3012_v19  ;;  %3541 = vmatpush.msrb.mxu2 %v3366_v13  ;;  %v3431_v12 = vld [vmem:[%s7849_s18 + $0x5c8] sm:$0xff] }
 0x78e   : > { %v3132_v24 = vpop.f32.mrf.mxu0  ;;  %v3112_v30 = vpop.f32.mrf.mxu2  ;;  %v3371_v13 = vld [vmem:[%s7849_s18 + $0x3e8] sm:$0xff] }
 0x78f   : > { %v3153_v14 = vadd.f32 %v3152_v20, %v3132_v24  ;;  %3181 = vmatpush.msra.mxu3 %v3033_v50  ;;  %3542 = vmatpush.msrb.mxu2 %v3362_v15  ;;  %v3427_v19 = vld [vmem:[%s7849_s18 + $0x5a8] sm:$0xff] }
 0x790   : > { %4426 = vmatmul.msk.f32.vlgmr.msra.gmra.mxu3 %vm2092_vm11, %v3155_v7  ;;  %v3271_v15 = vld [vmem:[%s7849_s18 + $0xc8] sm:$0xff] }
 0x791   : > { %3241 = vmatpush.msra.mxu0 %v3153_v14  ;;  %3543 = vmatpush.msrb.mxu2 %v3358_v51  ;;  %v3367_v50 = vld [vmem:[%s7849_s18 + $0x3c8] sm:$0xff]  ;;  %v3386_v14 = vld [vmem:[%s7849_s18 + $0x460] sm:$0xff] }
 0x792   : > { %4429 = vmatmul.msk.f32.vlgmr.msra.gmra.mxu0 %vm2092_vm11, %v3155_v7  ;;  %v3423_v20 = vld [vmem:[%s7849_s18 + $0x588] sm:$0xff]  ;;  %3609 = vmatpush.msrb.mxu1 %v3271_v15  ;;  %v3484_v15 = vld [vmem:[%s7849_s18 + $0x770] sm:$0xff] }
 0x793   : > { %4430 = vmatpush.msk.msrb.mxu0 %vm1630_vm2, %v3490_v17  ;;  %3544 = vmatpush.msrb.mxu2 %v3354_v25  ;;  %v3267_v24 = vld [vmem:[%s7849_s18 + $0xa8] sm:$0xff]  ;;  %v3382_v25 = vld [vmem:[%s7849_s18 + $0x440] sm:$0xff] }
 0x794   : > { %v3092_v29 = vpop.f32.mrf.mxu3  ;;  %v3363_v51 = vld [vmem:[%s7849_s18 + $0x3a8] sm:$0xff]  ;;  %3610 = vmatpush.msrb.mxu1 %v3267_v24  ;;  %v3428_v24 = vld [vmem:[%s7849_s18 + $0x5b0] sm:$0xff] }
 0x795   : > { %v3113_v18 = vadd.f32 %v3112_v30, %v3092_v29  ;;  %3583 = vmatpush.msrb.mxu0 %v3486_v26  ;;  %3545 = vmatpush.msrb.mxu2 %v3350_v27  ;;  %v3359_v17 = vld [vmem:[%s7849_s18 + $0x388] sm:$0xff]  ;;  %v3378_v27 = vld [vmem:[%s7849_s18 + $0x420] sm:$0xff] }
 0x796   : > { %v3355_v26 = vld [vmem:[%s7849_s18 + $0x368] sm:$0xff]  ;;  %v3374_v29 = vld [vmem:[%s7849_s18 + $0x400] sm:$0xff] }
 0x797   : > { %3221 = vmatpush.msrb.mxu3 %v3113_v18  ;;  %3584 = vmatpush.msrb.mxu0 %v3482_v58  ;;  %v3351_v30 = vld [vmem:[%s7849_s18 + $0x348] sm:$0xff] }
 0x798   : > { %4428 = vmatmul.msk.f32.vlgmr.msrb.gmra.mxu3 %vm2092_vm11, %v3155_v7  ;;  %3546 = vmatpush.msrb.mxu2 %v3346_v22  ;;  %v3435_v7 = vld [vmem:[%s7849_s18 + $0x5e8] sm:$0xff] }
 0x799   : > { %3585 = vmatpush.msrb.mxu0 %v3478_v23  ;;  %3560 = vmatpush.msra.mxu3 %v3434_v1  ;;  %v3407_v58 = vld [vmem:[%s7849_s18 + $0x508] sm:$0xff] }
 0x79a   : > { %3547 = vmatpush.msrb.mxu2 %v3342_v31  ;;  %v3491_v18 = vld [vmem:[%s7849_s18 + $0x7a8] sm:$0x7f] }
 0x79b   : > { %3586 = vmatpush.msrb.mxu0 %v3474_v32  ;;  %3561 = vmatpush.msra.mxu3 %v3430_v34  ;;  %v3347_v22 = vld [vmem:[%s7849_s18 + $0x328] sm:$0xff] }
 0x79c   : > { %3548 = vmatpush.msrb.mxu2 %v3338_v35  ;;  %v3403_v23 = vld [vmem:[%s7849_s18 + $0x4e8] sm:$0xff] }
 0x79d   : > { %3587 = vmatpush.msrb.mxu0 %v3470_v36  ;;  %3562 = vmatpush.msra.mxu3 %v3426_v37  ;;  %v3487_v1 = vld [vmem:[%s7849_s18 + $0x788] sm:$0xff] }
 0x79e   : > { %3549 = vmatpush.msrb.mxu2 %v3334_v38  ;;  %v3343_v31 = vld [vmem:[%s7849_s18 + $0x308] sm:$0xff] }
 0x79f   : > { %3588 = vmatpush.msrb.mxu0 %v3466_v40  ;;  %3563 = vmatpush.msra.mxu3 %v3422_v41  ;;  %v3483_v32 = vld [vmem:[%s7849_s18 + $0x768] sm:$0xff] }
 0x7a0   : > { %3550 = vmatpush.msrb.mxu2 %v3330_v43  ;;  %v3339_v34 = vld [vmem:[%s7849_s18 + $0x2e8] sm:$0xff] }
 0x7a1   : > { %3589 = vmatpush.msrb.mxu0 %v3462_v44  ;;  %3564 = vmatpush.msra.mxu3 %v3418_v45  ;;  %v3395_v35 = vld [vmem:[%s7849_s18 + $0x4a8] sm:$0xff] }
 0x7a2   : > { %3551 = vmatpush.msrb.mxu2 %v3326_v46  ;;  %v3335_v36 = vld [vmem:[%s7849_s18 + $0x2c8] sm:$0xff] }
 0x7a3   : > { %3590 = vmatpush.msrb.mxu0 %v3458_v48  ;;  %3565 = vmatpush.msra.mxu3 %v3414_v49  ;;  %v3391_v37 = vld [vmem:[%s7849_s18 + $0x488] sm:$0xff] }
 0x7a4   : > { %3552 = vmatpush.msrb.mxu2 %v3322_v52  ;;  %v3475_v38 = vld [vmem:[%s7849_s18 + $0x728] sm:$0xff] }
 0x7a5   : > { %3591 = vmatpush.msrb.mxu0 %v3454_v57  ;;  %3566 = vmatpush.msra.mxu3 %v3410_v59  ;;  %v3387_v40 = vld [vmem:[%s7849_s18 + $0x468] sm:$0xff] }
 0x7a6   : > { %3553 = vmatpush.msrb.mxu2 %v3318_v33  ;;  %v3327_v41 = vld [vmem:[%s7849_s18 + $0x288] sm:$0xff] }
 0x7a7   : > { %3592 = vmatpush.msrb.mxu0 %v3450_v10  ;;  %3567 = vmatpush.msra.mxu3 %v3406_v61  ;;  %v3383_v43 = vld [vmem:[%s7849_s18 + $0x448] sm:$0xff] }
 0x7a8   : > { %3554 = vmatpush.msrb.mxu2 %v3314_v62  ;;  %v3263_v44 = vld [vmem:[%s7849_s18 + $0x88] sm:$0xff] }
 0x7a9   : > { %3593 = vmatpush.msrb.mxu0 %v3446_v2  ;;  %3568 = vmatpush.msra.mxu3 %v3402_v3  ;;  %v3319_v45 = vld [vmem:[%s7849_s18 + $0x248] sm:$0xff] }
 0x7aa   : > { %3555 = vmatpush.msrb.mxu2 %v3310_v4  ;;  %v3379_v46 = vld [vmem:[%s7849_s18 + $0x428] sm:$0xff]  ;;  %3611 = vmatpush.msrb.mxu1 %v3263_v44  ;;  %v3396_v44 = vld [vmem:[%s7849_s18 + $0x4b0] sm:$0xff] }
 0x7ab   : > { %3594 = vmatpush.msrb.mxu0 %v3442_v6  ;;  %3569 = vmatpush.msra.mxu3 %v3398_v8  ;;  %v3259_v48 = vld [vmem:[%s7849_s18 + $0x68] sm:$0xff]  ;;  %v3162_v6 = vperm.slane %v3160_v5, 0  ;;  %v3336_v5 = vld [vmem:[%s7849_s18 + $0x2d0] sm:$0xff] }
 0x7ac   : > { %3640 = vmatpush.msra.mxu2 %v3435_v7  ;;  %v3315_v49 = vld [vmem:[%s7849_s18 + $0x228] sm:$0xff]  ;;  %3612 = vmatpush.msrb.mxu1 %v3259_v48  ;;  %v3392_v48 = vld [vmem:[%s7849_s18 + $0x490] sm:$0xff] }
 0x7ad   : > { %3595 = vmatpush.msrb.mxu0 %v3438_v11  ;;  %3570 = vmatpush.msra.mxu3 %v3394_v16  ;;  %v3375_v52 = vld [vmem:[%s7849_s18 + $0x408] sm:$0xff]  ;;  %v3488_v16 = vld [vmem:[%s7849_s18 + $0x790] sm:$0xff] }
 0x7ae   : > { %3641 = vmatpush.msra.mxu2 %v3431_v12  ;;  %v3255_v57 = vld [vmem:[%s7849_s18 + $0x48] sm:$0xff] }
 0x7af   : > { %3620 = vmatpush.msra.mxu0 %v3371_v13  ;;  %3571 = vmatpush.msra.mxu3 %v3390_v56  ;;  %v3311_v59 = vld [vmem:[%s7849_s18 + $0x208] sm:$0xff]  ;;  %v3436_v13 = vld [vmem:[%s7849_s18 + $0x5f0] sm:$0xff] }
 0x7b0   : > { %3642 = vmatpush.msra.mxu2 %v3427_v19  ;;  %v3463_v33 = vld [vmem:[%s7849_s18 + $0x6c8] sm:$0xff]  ;;  %3613 = vmatpush.msrb.mxu1 %v3255_v57  ;;  %v3432_v19 = vld [vmem:[%s7849_s18 + $0x5d0] sm:$0xff] }
 0x7b1   : > { %3621 = vmatpush.msra.mxu0 %v3367_v50  ;;  %3572 = vmatpush.msra.mxu3 %v3386_v14  ;;  %v3459_v10 = vld [vmem:[%s7849_s18 + $0x6a8] sm:$0xff]  ;;  %v3304_v14 = vld [vmem:[%s7849_s18 + $0x1d0] sm:$0xff] }
 0x7b2   : > { %3643 = vmatpush.msra.mxu2 %v3423_v20  ;;  %3614 = vmatpush.msrb.mxu1 %v3251_v60  ;;  %v3247_v61 = vld [vmem:[%s7849_s18 + $0x8] sm:$0xff]  ;;  %v3308_v20 = vld [vmem:[%s7849_s18 + $0x1f0] sm:$0xff] }
 0x7b3   : > { %3622 = vmatpush.msra.mxu0 %v3363_v51  ;;  %3573 = vmatpush.msra.mxu3 %v3382_v25  ;;  %v3455_v62 = vld [vmem:[%s7849_s18 + $0x688] sm:$0xff]  ;;  %v3480_v51 = vld [vmem:[%s7849_s18 + $0x750] sm:$0xff] }
 0x7b4   : > { %3644 = vmatpush.msra.mxu2 %v3419_v55  ;;  %3615 = vmatpush.msrb.mxu1 %v3247_v61  ;;  %v3447_v2 = vld [vmem:[%s7849_s18 + $0x648] sm:$0xff]  ;;  %v3424_v55 = vld [vmem:[%s7849_s18 + $0x590] sm:$0xff] }
 0x7b5   : > { %3623 = vmatpush.msra.mxu0 %v3359_v17  ;;  %3574 = vmatpush.msra.mxu3 %v3378_v27  ;;  %v3443_v3 = vld [vmem:[%s7849_s18 + $0x628] sm:$0xff]  ;;  %v3476_v17 = vld [vmem:[%s7849_s18 + $0x730] sm:$0xff] }
 0x7b6   : > { %3645 = vmatpush.msra.mxu2 %v3415_v0  ;;  %v3439_v4 = vld [vmem:[%s7849_s18 + $0x608] sm:$0xff]  ;;  %v3300_v25 = vld [vmem:[%s7849_s18 + $0x1b0] sm:$0xff] }
 0x7b7   : > { %3624 = vmatpush.msra.mxu0 %v3355_v26  ;;  %3575 = vmatpush.msra.mxu3 %v3374_v29  ;;  %v3420_v0 = vld [vmem:[%s7849_s18 + $0x570] sm:$0xff] }
 0x7b8   : > { %3646 = vmatpush.msra.mxu2 %v3411_v28  ;;  %v3472_v26 = vld [vmem:[%s7849_s18 + $0x710] sm:$0xff] }
 0x7b9   : > { %3625 = vmatpush.msra.mxu0 %v3351_v30  ;;  %4432 = vmatpush.msk.msrb.mxu3 %vm1630_vm2, %v3491_v18  ;;  %v3296_v27 = vld [vmem:[%s7849_s18 + $0x190] sm:$0xff] }
 0x7ba   : > { %3647 = vmatpush.msra.mxu2 %v3407_v58  ;;  %v3416_v28 = vld [vmem:[%s7849_s18 + $0x550] sm:$0xff] }
 0x7bb   : > { %3626 = vmatpush.msra.mxu0 %v3347_v22  ;;  %3663 = vmatpush.msrb.mxu3 %v3487_v1  ;;  %v3468_v29 = vld [vmem:[%s7849_s18 + $0x6f0] sm:$0xff] }
 0x7bc   : > { %3648 = vmatpush.msra.mxu2 %v3403_v23  ;;  %v3292_v18 = vld [vmem:[%s7849_s18 + $0x170] sm:$0xff] }
 0x7bd   : > { %3627 = vmatpush.msra.mxu0 %v3343_v31  ;;  %3664 = vmatpush.msrb.mxu3 %v3483_v32  ;;  %v3372_v22 = vld [vmem:[%s7849_s18 + $0x3f0] sm:$0xff] }
 0x7be   : > { %3649 = vmatpush.msra.mxu2 %v3399_v54  ;;  %v3412_v23 = vld [vmem:[%s7849_s18 + $0x530] sm:$0xff] }
 0x7bf   : > { %3628 = vmatpush.msra.mxu0 %v3339_v34  ;;  %3665 = vmatpush.msrb.mxu3 %v3479_v21  ;;  %v3464_v1 = vld [vmem:[%s7849_s18 + $0x6d0] sm:$0xff] }
 0x7c0   : > { %3650 = vmatpush.msra.mxu2 %v3395_v35  ;;  %v3288_v31 = vld [vmem:[%s7849_s18 + $0x150] sm:$0xff] }
 0x7c1   : > { %3629 = vmatpush.msra.mxu0 %v3335_v36  ;;  %3666 = vmatpush.msrb.mxu3 %v3475_v38  ;;  %v3368_v54 = vld [vmem:[%s7849_s18 + $0x3d0] sm:$0xff] }
 0x7c2   : > { %3651 = vmatpush.msra.mxu2 %v3391_v37  ;;  %v3408_v32 = vld [vmem:[%s7849_s18 + $0x510] sm:$0xff] }
 0x7c3   : > { %3630 = vmatpush.msra.mxu0 %v3331_v39  ;;  %3667 = vmatpush.msrb.mxu3 %v3471_v47  ;;  %v3460_v34 = vld [vmem:[%s7849_s18 + $0x6b0] sm:$0xff] }
 0x7c4   : > { %3652 = vmatpush.msra.mxu2 %v3387_v40  ;;  %v3284_v35 = vld [vmem:[%s7849_s18 + $0x130] sm:$0xff] }
 0x7c5   : > { %3631 = vmatpush.msra.mxu0 %v3327_v41  ;;  %3668 = vmatpush.msrb.mxu3 %v3467_v53  ;;  %v3364_v21 = vld [vmem:[%s7849_s18 + $0x3b0] sm:$0xff] }
 0x7c6   : > { %3653 = vmatpush.msra.mxu2 %v3383_v43  ;;  %v3404_v36 = vld [vmem:[%s7849_s18 + $0x4f0] sm:$0xff] }
 0x7c7   : > { %3632 = vmatpush.msra.mxu0 %v3323_v42  ;;  %3669 = vmatpush.msrb.mxu3 %v3463_v33  ;;  %v3456_v37 = vld [vmem:[%s7849_s18 + $0x690] sm:$0xff] }
 0x7c8   : > { %3654 = vmatpush.msra.mxu2 %v3379_v46  ;;  %v3280_v38 = vld [vmem:[%s7849_s18 + $0x110] sm:$0xff] }
 0x7c9   : > { %3633 = vmatpush.msra.mxu0 %v3319_v45  ;;  %3670 = vmatpush.msrb.mxu3 %v3459_v10  ;;  %v3360_v39 = vld [vmem:[%s7849_s18 + $0x390] sm:$0xff]  ;;  %v3373_v10 = vld [vmem:[%s7849_s18 + $0x3f8] sm:$0xff] }
 0x7ca   : > { %3655 = vmatpush.msra.mxu2 %v3375_v52  ;;  %v3400_v40 = vld [vmem:[%s7849_s18 + $0x4d0] sm:$0xff] }
 0x7cb   : > { %3634 = vmatpush.msra.mxu0 %v3315_v49  ;;  %3671 = vmatpush.msrb.mxu3 %v3455_v62  ;;  %v3452_v41 = vld [vmem:[%s7849_s18 + $0x670] sm:$0xff] }
 0x7cc   : > { %v3276_v43 = vld [vmem:[%s7849_s18 + $0xf0] sm:$0xff] }
 0x7cd   : > { %3635 = vmatpush.msra.mxu0 %v3311_v59  ;;  %3672 = vmatpush.msrb.mxu3 %v3451_v63  ;;  %v3356_v42 = vld [vmem:[%s7849_s18 + $0x370] sm:$0xff] }
 0x7ce   : > { %v3448_v45 = vld [vmem:[%s7849_s18 + $0x650] sm:$0xff] }
 0x7cf   : > { %3673 = vmatpush.msrb.mxu3 %v3447_v2  ;;  %v3272_v46 = vld [vmem:[%s7849_s18 + $0xd0] sm:$0xff]  ;;  %v3369_v2 = vld [vmem:[%s7849_s18 + $0x3d8] sm:$0xff] }
 0x7d0   : > { %v3352_v47 = vld [vmem:[%s7849_s18 + $0x350] sm:$0xff] }
 0x7d1   : > { %3674 = vmatpush.msrb.mxu3 %v3443_v3  ;;  %v3444_v49 = vld [vmem:[%s7849_s18 + $0x630] sm:$0xff] }
 0x7d2   : > { %v3268_v52 = vld [vmem:[%s7849_s18 + $0xb0] sm:$0xff] }
 0x7d3   : > { %3675 = vmatpush.msrb.mxu3 %v3439_v4  ;;  %v3348_v53 = vld [vmem:[%s7849_s18 + $0x330] sm:$0xff] }
 0x7d4   : > { %v3388_v57 = vld [vmem:[%s7849_s18 + $0x470] sm:$0xff] }
 0x7d5   : > { %v3440_v59 = vld [vmem:[%s7849_s18 + $0x610] sm:$0xff] }
 0x7d6   : > { %v3264_v33 = vld [vmem:[%s7849_s18 + $0x90] sm:$0xff] }
 0x7d7   : > { %v3344_v60 = vld [vmem:[%s7849_s18 + $0x310] sm:$0xff] }
 0x7d8   : > { %v3384_v61 = vld [vmem:[%s7849_s18 + $0x450] sm:$0xff] }
 0x7d9   : > { %v3260_v62 = vld [vmem:[%s7849_s18 + $0x70] sm:$0xff] }
 0x7da   : > { %v3340_v63 = vld [vmem:[%s7849_s18 + $0x2f0] sm:$0xff] }
 0x7db   : > { %v3380_v3 = vld [vmem:[%s7849_s18 + $0x430] sm:$0xff] }
 0x7dc   : > { %v3256_v4 = vld [vmem:[%s7849_s18 + $0x50] sm:$0xff] }
 0x80d   : > { %v3203_v7 = vpop.f32.mrf.mxu2 }
 0x80e   : > { %v7416_v8 = vadd.f32 %v3203_v7, %v3162_v6  ;;  %v3376_v7 = vld [vmem:[%s7849_s18 + $0x410] sm:$0xff] }
 0x80f   : > { %v3243_v11 = vpop.f32.mrf.mxu0 }
 0x810   : > { %v7421_v12 = vadd.f32 %v3243_v11, %v3162_v6  ;;  %3556 = vmatmul.f32.vlgmr.msrb.gmra.mxu2 %v7416_v8  ;;  %v3361_v11 = vld [vmem:[%s7849_s18 + $0x398] sm:$0xff] }
 0x811   : > { %4434 = vmatpush.msk.msrb.mxu2 %vm1630_vm2, %v3492_v9  ;;  %v3252_v9 = vld [vmem:[%s7849_s18 + $0x30] sm:$0xff] }
 0x812   : > { %4431 = vmatmul.msk.f32.vlgmr.msrb.gmra.mxu0 %vm3504_vm13, %v7421_v12 }
 0x813   : > { %3720 = vmatpush.msrb.mxu0 %v3436_v13  ;;  %3743 = vmatpush.msrb.mxu2 %v3488_v16  ;;  %v3183_v50 = vpop.f32.mrf.mxu3  ;;  %v3493_v13 = vld [vmem:[%s7849_s18 + $0x7b8] sm:$0x7f]  ;;  %v3332_v16 = vld [vmem:[%s7849_s18 + $0x2b0] sm:$0xff] }
 0x814   : > { %v7439_v56 = vadd.f32 %v3183_v50, %v3162_v6  ;;  %v3489_v50 = vld [vmem:[%s7849_s18 + $0x798] sm:$0xff] }
 0x815   : > { %3721 = vmatpush.msrb.mxu0 %v3432_v19  ;;  %3744 = vmatpush.msrb.mxu2 %v3484_v15  ;;  %v3248_v19 = vld [vmem:[%s7849_s18 + $0x10] sm:$0xff]  ;;  %v3357_v15 = vld [vmem:[%s7849_s18 + $0x378] sm:$0xff] }
 0x816   : > { %3536 = vmatmul.f32.vlgmr.msra.gmra.mxu1 %v7439_v56 }
 0x817   : > { %3680 = vmatpush.msra.mxu1 %v3308_v20  ;;  %3722 = vmatpush.msrb.mxu0 %v3428_v24  ;;  %v3328_v20 = vld [vmem:[%s7849_s18 + $0x290] sm:$0xff]  ;;  %v3309_v24 = vld [vmem:[%s7849_s18 + $0x1f8] sm:$0xff] }
 0x818   : > { %3745 = vmatpush.msrb.mxu2 %v3480_v51  ;;  %v3353_v51 = vld [vmem:[%s7849_s18 + $0x358] sm:$0xff] }
 0x819   : > { %3681 = vmatpush.msra.mxu1 %v3304_v14  ;;  %3723 = vmatpush.msrb.mxu0 %v3424_v55  ;;  %v3485_v14 = vld [vmem:[%s7849_s18 + $0x778] sm:$0xff]  ;;  %v3324_v55 = vld [vmem:[%s7849_s18 + $0x270] sm:$0xff] }
 0x81a   : > { %3746 = vmatpush.msrb.mxu2 %v3476_v17  ;;  %3636 = vmatmul.f32.vlgmr.msra.gmra.mxu0 %v7416_v8  ;;  %v3305_v17 = vld [vmem:[%s7849_s18 + $0x1d8] sm:$0xff] }
 0x81b   : > { %3682 = vmatpush.msra.mxu1 %v3300_v25  ;;  %3724 = vmatpush.msrb.mxu0 %v3420_v0  ;;  %v3223_v30 = vpop.f32.mrf.mxu3  ;;  %v3349_v25 = vld [vmem:[%s7849_s18 + $0x338] sm:$0xff] }
 0x81c   : > { %3747 = vmatpush.msrb.mxu2 %v3472_v26  ;;  %v7479_v58 = vadd.f32 %v3223_v30, %v3162_v6  ;;  %v3365_v6 = vld [vmem:[%s7849_s18 + $0x3b8] sm:$0xff]  ;;  %v3320_v26 = vld [vmem:[%s7849_s18 + $0x250] sm:$0xff] }
 0x81d   : > { %3683 = vmatpush.msra.mxu1 %v3296_v27  ;;  %3725 = vmatpush.msrb.mxu0 %v3416_v28  ;;  %v3481_v0 = vld [vmem:[%s7849_s18 + $0x758] sm:$0xff] }
 0x81e   : > { %3748 = vmatpush.msrb.mxu2 %v3468_v29  ;;  %3576 = vmatmul.f32.vlgmr.msra.gmra.mxu3 %v7479_v58  ;;  %v3301_v27 = vld [vmem:[%s7849_s18 + $0x1b8] sm:$0xff]  ;;  %v3316_v29 = vld [vmem:[%s7849_s18 + $0x230] sm:$0xff] }
 0x81f   : > { %3616 = vmatmul.f32.vlgmr.msrb.gmra.mxu1 %v7439_v56  ;;  %3656 = vmatmul.f32.vlgmr.msra.gmra.mxu2 %v7479_v58  ;;  %v3345_v28 = vld [vmem:[%s7849_s18 + $0x318] sm:$0xff] }
 0x820   : > { %3684 = vmatpush.msra.mxu1 %v3292_v18  ;;  %3700 = vmatpush.msra.mxu3 %v3372_v22  ;;  %v3477_v30 = vld [vmem:[%s7849_s18 + $0x738] sm:$0xff] }
 0x821   : > { %3726 = vmatpush.msrb.mxu0 %v3412_v23  ;;  %3749 = vmatpush.msrb.mxu2 %v3464_v1  ;;  %v3297_v18 = vld [vmem:[%s7849_s18 + $0x198] sm:$0xff]  ;;  %v3312_v1 = vld [vmem:[%s7849_s18 + $0x210] sm:$0xff] }
 0x822   : > { %3685 = vmatpush.msra.mxu1 %v3288_v31  ;;  %3701 = vmatpush.msra.mxu3 %v3368_v54  ;;  %v3341_v22 = vld [vmem:[%s7849_s18 + $0x2f8] sm:$0xff] }
 0x823   : > { %3727 = vmatpush.msrb.mxu0 %v3408_v32  ;;  %3750 = vmatpush.msrb.mxu2 %v3460_v34  ;;  %v3473_v23 = vld [vmem:[%s7849_s18 + $0x718] sm:$0xff] }
 0x824   : > { %3686 = vmatpush.msra.mxu1 %v3284_v35  ;;  %3702 = vmatpush.msra.mxu3 %v3364_v21  ;;  %v3293_v31 = vld [vmem:[%s7849_s18 + $0x178] sm:$0xff] }
 0x825   : > { %3728 = vmatpush.msrb.mxu0 %v3404_v36  ;;  %3751 = vmatpush.msrb.mxu2 %v3456_v37  ;;  %v3337_v54 = vld [vmem:[%s7849_s18 + $0x2d8] sm:$0xff] }
 0x826   : > { %3687 = vmatpush.msra.mxu1 %v3280_v38  ;;  %3703 = vmatpush.msra.mxu3 %v3360_v39  ;;  %v3437_v32 = vld [vmem:[%s7849_s18 + $0x5f8] sm:$0xff] }
 0x827   : > { %3729 = vmatpush.msrb.mxu0 %v3400_v40  ;;  %3752 = vmatpush.msrb.mxu2 %v3452_v41  ;;  %v3469_v34 = vld [vmem:[%s7849_s18 + $0x6f8] sm:$0xff] }
 0x828   : > { %4433 = vmatmul.msk.f32.vlgmr.msrb.gmra.mxu3 %vm3504_vm13, %v7421_v12  ;;  %3688 = vmatpush.msra.mxu1 %v3276_v43  ;;  %v3289_v35 = vld [vmem:[%s7849_s18 + $0x158] sm:$0xff] }
 0x829   : > { %3704 = vmatpush.msra.mxu3 %v3356_v42  ;;  %3730 = vmatpush.msrb.mxu0 %v3396_v44  ;;  %v3333_v21 = vld [vmem:[%s7849_s18 + $0x2b8] sm:$0xff] }
 0x82a   : > { %3753 = vmatpush.msrb.mxu2 %v3448_v45  ;;  %3689 = vmatpush.msra.mxu1 %v3272_v46  ;;  %v3433_v36 = vld [vmem:[%s7849_s18 + $0x5d8] sm:$0xff] }
 0x82b   : > { %3705 = vmatpush.msra.mxu3 %v3352_v47  ;;  %3731 = vmatpush.msrb.mxu0 %v3392_v48  ;;  %v3465_v37 = vld [vmem:[%s7849_s18 + $0x6d8] sm:$0xff] }
 0x82c   : > { %3754 = vmatpush.msrb.mxu2 %v3444_v49  ;;  %3690 = vmatpush.msra.mxu1 %v3268_v52  ;;  %v3285_v38 = vld [vmem:[%s7849_s18 + $0x138] sm:$0xff] }
 0x82d   : > { %3706 = vmatpush.msra.mxu3 %v3348_v53  ;;  %3732 = vmatpush.msrb.mxu0 %v3388_v57  ;;  %v3329_v39 = vld [vmem:[%s7849_s18 + $0x298] sm:$0xff] }
 0x82e   : > { %3755 = vmatpush.msrb.mxu2 %v3440_v59  ;;  %3691 = vmatpush.msra.mxu1 %v3264_v33  ;;  %v3429_v40 = vld [vmem:[%s7849_s18 + $0x5b8] sm:$0xff] }
 0x82f   : > { %4435 = vmatmul.msk.f32.vlgmr.msrb.gmra.mxu2 %vm3504_vm13, %v7421_v12  ;;  %3707 = vmatpush.msra.mxu3 %v3344_v60  ;;  %v3461_v41 = vld [vmem:[%s7849_s18 + $0x6b8] sm:$0xff] }
 0x830   : > { %3780 = vmatpush.msra.mxu2 %v3373_v10  ;;  %3733 = vmatpush.msrb.mxu0 %v3384_v61  ;;  %v3281_v43 = vld [vmem:[%s7849_s18 + $0x118] sm:$0xff] }
 0x831   : > { %3692 = vmatpush.msra.mxu1 %v3260_v62  ;;  %3708 = vmatpush.msra.mxu3 %v3340_v63  ;;  %v3325_v42 = vld [vmem:[%s7849_s18 + $0x278] sm:$0xff] }
 0x832   : > { %3781 = vmatpush.msra.mxu2 %v3369_v2  ;;  %3734 = vmatpush.msrb.mxu0 %v3380_v3  ;;  %v3425_v44 = vld [vmem:[%s7849_s18 + $0x598] sm:$0xff] }
 0x833   : > { %3693 = vmatpush.msra.mxu1 %v3256_v4  ;;  %3709 = vmatpush.msra.mxu3 %v3336_v5  ;;  %v3457_v45 = vld [vmem:[%s7849_s18 + $0x698] sm:$0xff] }
 0x834   : > { %3782 = vmatpush.msra.mxu2 %v3365_v6  ;;  %3735 = vmatpush.msrb.mxu0 %v3376_v7  ;;  %v3277_v46 = vld [vmem:[%s7849_s18 + $0xf8] sm:$0xff] }
 0x835   : > { %3736 = vmatmul.f32.vlgmr.msrb.gmra.mxu0 %v7479_v58  ;;  %3694 = vmatpush.msra.mxu1 %v3252_v9  ;;  %v3321_v47 = vld [vmem:[%s7849_s18 + $0x258] sm:$0xff] }
 0x836   : > { %3783 = vmatpush.msra.mxu2 %v3361_v11  ;;  %4436 = vmatpush.msk.msra.mxu0 %vm1630_vm2, %v3493_v13  ;;  %v3421_v48 = vld [vmem:[%s7849_s18 + $0x578] sm:$0xff] }
 0x837   : > { %3710 = vmatpush.msra.mxu3 %v3332_v16  ;;  %3695 = vmatpush.msra.mxu1 %v3248_v19  ;;  %v3453_v49 = vld [vmem:[%s7849_s18 + $0x678] sm:$0xff] }
 0x838   : > { %3784 = vmatpush.msra.mxu2 %v3357_v15  ;;  %3823 = vmatpush.msra.mxu0 %v3489_v50  ;;  %v3273_v52 = vld [vmem:[%s7849_s18 + $0xd8] sm:$0xff] }
 0x839   : > { %3711 = vmatpush.msra.mxu3 %v3328_v20  ;;  %3696 = vmatmul.f32.vlgmr.msra.gmra.mxu1 %v7439_v56  ;;  %v3317_v53 = vld [vmem:[%s7849_s18 + $0x238] sm:$0xff] }
 0x83a   : > { %3760 = vmatpush.msrb.mxu1 %v3309_v24  ;;  %3785 = vmatpush.msra.mxu2 %v3353_v51  ;;  %v3417_v57 = vld [vmem:[%s7849_s18 + $0x558] sm:$0xff] }
 0x83b   : > { %3824 = vmatpush.msra.mxu0 %v3485_v14  ;;  %3712 = vmatpush.msra.mxu3 %v3324_v55  ;;  %v3449_v59 = vld [vmem:[%s7849_s18 + $0x658] sm:$0xff] }
 0x83c   : > { %3761 = vmatpush.msrb.mxu1 %v3305_v17  ;;  %3786 = vmatpush.msra.mxu2 %v3349_v25  ;;  %v3269_v33 = vld [vmem:[%s7849_s18 + $0xb8] sm:$0xff]  ;;  %v3494_v17 = vld [vmem:[%s7850_s19] sm:$0xf] }
 0x83d   : > { %3825 = vmatpush.msra.mxu0 %v3481_v0  ;;  %3713 = vmatpush.msra.mxu3 %v3320_v26  ;;  %v3313_v60 = vld [vmem:[%s7849_s18 + $0x218] sm:$0xff]  ;;  %v3497_v0 = vperm.slane %v3494_v17, 1  ;;  %v3498_v26 = vperm.slane %v3494_v17, 2 }
 0x83e   : > { %3762 = vmatpush.msrb.mxu1 %v3301_v27  ;;  %3787 = vmatpush.msra.mxu2 %v3345_v28  ;;  %v3413_v10 = vld [vmem:[%s7849_s18 + $0x538] sm:$0xff] }
 0x83f   : > { %3826 = vmatpush.msra.mxu0 %v3477_v30  ;;  %3714 = vmatpush.msra.mxu3 %v3316_v29  ;;  %v3445_v61 = vld [vmem:[%s7849_s18 + $0x638] sm:$0xff]  ;;  %v3496_v30 = vperm.slane %v3494_v17, 0 }
 0x840   : > { %3763 = vmatpush.msrb.mxu1 %v3297_v18  ;;  %3788 = vmatpush.msra.mxu2 %v3341_v22  ;;  %v3265_v62 = vld [vmem:[%s7849_s18 + $0x98] sm:$0xff]  ;;  %v3499_v18 = vperm.slane %v3494_v17, 3 }
 0x841   : > { %3827 = vmatpush.msra.mxu0 %v3473_v23  ;;  %3715 = vmatpush.msra.mxu3 %v3312_v1  ;;  %v3409_v63 = vld [vmem:[%s7849_s18 + $0x518] sm:$0xff] }
 0x842   : > { %3716 = vmatmul.f32.vlgmr.msra.gmra.mxu3 %v7416_v8  ;;  %3764 = vmatpush.msrb.mxu1 %v3293_v31  ;;  %v3441_v2 = vld [vmem:[%s7849_s18 + $0x618] sm:$0xff] }
 0x843   : > { %3789 = vmatpush.msra.mxu2 %v3337_v54  ;;  %3800 = vmatpush.msrb.mxu3 %v3437_v32  ;;  %v3261_v3 = vld [vmem:[%s7849_s18 + $0x78] sm:$0xff] }
 0x844   : > { %3828 = vmatpush.msra.mxu0 %v3469_v34  ;;  %3765 = vmatpush.msrb.mxu1 %v3289_v35  ;;  %v3405_v4 = vld [vmem:[%s7849_s18 + $0x4f8] sm:$0xff] }
 0x845   : > { %3790 = vmatpush.msra.mxu2 %v3333_v21  ;;  %3801 = vmatpush.msrb.mxu3 %v3433_v36  ;;  %v3257_v5 = vld [vmem:[%s7849_s18 + $0x58] sm:$0xff] }
 0x846   : > { %3829 = vmatpush.msra.mxu0 %v3465_v37  ;;  %3766 = vmatpush.msrb.mxu1 %v3285_v38  ;;  %v3253_v6 = vld [vmem:[%s7849_s18 + $0x38] sm:$0xff] }
 0x847   : > { %3791 = vmatpush.msra.mxu2 %v3329_v39  ;;  %3802 = vmatpush.msrb.mxu3 %v3429_v40  ;;  %v3397_v7 = vld [vmem:[%s7849_s18 + $0x4b8] sm:$0xff] }
 0x848   : > { %3830 = vmatpush.msra.mxu0 %v3461_v41  ;;  %3767 = vmatpush.msrb.mxu1 %v3281_v43  ;;  %v3393_v9 = vld [vmem:[%s7849_s18 + $0x498] sm:$0xff] }
 0x849   : > { %3792 = vmatpush.msra.mxu2 %v3325_v42  ;;  %3803 = vmatpush.msrb.mxu3 %v3425_v44  ;;  %v3389_v11 = vld [vmem:[%s7849_s18 + $0x478] sm:$0xff]  ;;  %v3852_v44 = vlaneseq }
 0x84a   : > { %3831 = vmatpush.msra.mxu0 %v3457_v45  ;;  %3768 = vmatpush.msrb.mxu1 %v3277_v46  ;;  %v3385_v13 = vld [vmem:[%s7849_s18 + $0x458] sm:$0xff] }
 0x84b   : > { %3793 = vmatpush.msra.mxu2 %v3321_v47  ;;  %3804 = vmatpush.msrb.mxu3 %v3421_v48  ;;  %v3381_v16 = vld [vmem:[%s7849_s18 + $0x438] sm:$0xff]  ;;  %vm3854_vm15 = vcmp.lt.s32.totalorder %v3852_v44, 500 }
 0x84c   : > { %3832 = vmatpush.msra.mxu0 %v3453_v49  ;;  %3769 = vmatpush.msrb.mxu1 %v3273_v52  ;;  %v3377_v19 = vld [vmem:[%s7849_s18 + $0x418] sm:$0xff] }
 0x84d   : > { %3794 = vmatpush.msra.mxu2 %v3317_v53  ;;  %3805 = vmatpush.msrb.mxu3 %v3417_v57 }
 0x84e   : > { %3833 = vmatpush.msra.mxu0 %v3449_v59  ;;  %3770 = vmatpush.msrb.mxu1 %v3269_v33 }
 0x84f   : > { %3795 = vmatpush.msra.mxu2 %v3313_v60  ;;  %3806 = vmatpush.msrb.mxu3 %v3413_v10 }
 0x850   : > { %3834 = vmatpush.msra.mxu0 %v3445_v61  ;;  %3796 = vmatmul.f32.vlgmr.msra.gmra.mxu2 %v7416_v8  ;;  %v3401_v8 = vld [vmem:[%s7849_s18 + $0x4d8] sm:$0xff] }
 0x851   : > { %3771 = vmatpush.msrb.mxu1 %v3265_v62  ;;  %3807 = vmatpush.msrb.mxu3 %v3409_v63 }
 0x852   : > { %3835 = vmatpush.msra.mxu0 %v3441_v2 }
 0x853   : > { %4437 = vmatmul.msk.f32.vlgmr.msra.gmra.mxu0 %vm3504_vm13, %v7421_v12  ;;  %3772 = vmatpush.msrb.mxu1 %v3261_v3  ;;  %v3249_v12 = vld [vmem:[%s7849_s18 + $0x18] sm:$0xff] }
 0x854   : > { %3808 = vmatpush.msrb.mxu3 %v3405_v4 }
 0x855   : > { %3773 = vmatpush.msrb.mxu1 %v3257_v5 }
 0x856   : > { %3809 = vmatpush.msrb.mxu3 %v3401_v8 }
 0x857   : > { %3774 = vmatpush.msrb.mxu1 %v3253_v6 }
 0x858   : > { %3810 = vmatpush.msrb.mxu3 %v3397_v7 }
 0x859   : > { %3775 = vmatpush.msrb.mxu1 %v3249_v12 }
 0x85a   : > { %3811 = vmatpush.msrb.mxu3 %v3393_v9  ;;  %3776 = vmatmul.f32.vlgmr.msrb.gmra.mxu1 %v7439_v56 }
 0x85c   : > { %3812 = vmatpush.msrb.mxu3 %v3389_v11 }
 0x85e   : > { %3813 = vmatpush.msrb.mxu3 %v3385_v13 }
 0x860   : > { %3814 = vmatpush.msrb.mxu3 %v3381_v16 }
 0x862   : > { %3815 = vmatpush.msrb.mxu3 %v3377_v19 }
 0x863   : > { %3816 = vmatmul.f32.vlgmr.msrb.gmra.mxu3 %v7479_v58 }
 0x88f   : > { %v3597_v20 = vpop.f32.mrf.mxu0 }
 0x893   : > { %v3537_v15 = vpop.f32.mrf.mxu1  ;;  %v3557_v50 = vpop.f32.mrf.mxu2 }
 0x894   : > { %v3538_v31 = vadd.f32 %v3537_v15, %v3496_v30 }
 0x896   : > { %v3558_v36 = vadd.f32 %v3557_v50, %v3538_v31 }
 0x897   : > { %v3637_v25 = vpop.f32.mrf.mxu0 }
 0x89c   : > { %v3617_v24 = vpop.f32.mrf.mxu1 }
 0x89d   : > { %v3618_v29 = vadd.f32 %v3617_v24, %v3497_v0 }
 0x89f   : > { %v3638_v54 = vadd.f32 %v3637_v25, %v3618_v29 }
 0x8a1   : > { %v3577_v56 = vpop.f32.mrf.mxu3 }
 0x8a2   : > { %v3657_v51 = vpop.f32.mrf.mxu2  ;;  %v3578_v40 = vadd.f32 %v3577_v56, %v3558_v36 }
 0x8a3   : > { %v3658_v34 = vadd.f32 %v3657_v51, %v3638_v54 }
 0x8a4   : > { %v3598_v47 = vadd.f32 %v3597_v20, %v3578_v40 }
 0x8ab   : > { %v3677_v14 = vpop.f32.mrf.mxu3 }
 0x8ac   : > { %v3678_v37 = vadd.f32 %v3677_v14, %v3658_v34 }
 0x8ae   : > { %v3844_v45 = vrot.slane %v3678_v37, 7 }
 0x8b0   : > { %v3847_v52 = vsel %vm2033_vm8, %v3598_v47, %v3844_v45 }
 0x8b2   : > { %v3757_v27 = vpop.f32.mrf.mxu2  ;;  %v3737_v1 = vpop.f32.mrf.mxu0 }
 0x8b6   : > { %v3697_v55 = vpop.f32.mrf.mxu1 }
 0x8b7   : > { %v3698_v58 = vadd.f32 %v3697_v55, %v3498_v26 }
 0x8c5   : > { %v3717_v28 = vpop.f32.mrf.mxu3 }
 0x8c6   : > { %v3718_v23 = vadd.f32 %v3717_v28, %v3698_v58 }
 0x8c8   : > { %v3738_v35 = vadd.f32 %v3737_v1, %v3718_v23 }
 0x8ca   : > { %v3758_v41 = vadd.f32 %v3757_v27, %v3738_v35 }
 0x8cc   : > { %v3845_v48 = vrot.slane %v3758_v41, 6 }
 0x8d0   : > { %v3837_v42 = vpop.f32.mrf.mxu0 }
 0x8d3   : > { %v3797_v21 = vpop.f32.mrf.mxu2 }
 0x8d7   : > { %v3777_v22 = vpop.f32.mrf.mxu1 }
 0x8d8   : > { %v3778_v32 = vadd.f32 %v3777_v22, %v3499_v18 }
 0x8da   : > { %v3798_v38 = vadd.f32 %v3797_v21, %v3778_v32 }
 0x8e6   : > { %v3817_v39 = vpop.f32.mrf.mxu3 }
 0x8e7   : > { %v3818_v43 = vadd.f32 %v3817_v39, %v3798_v38 }
 0x8e9   : > { %v3838_v46 = vadd.f32 %v3837_v42, %v3818_v43 }
 0x8eb   : > { %v3846_v49 = vrot.slane %v3838_v46, 5 }
 0x8ed   : > { %v3849_v53 = vsel %vm3848_vm14, %v3845_v48, %v3846_v49 }
 0x8ee   : > { %v3850_v57 = vsel %vm1968_vm7, %v3847_v52, %v3849_v53 }
 0x8ef   : > { %3856 = vst.msk [vmem:[%s626_s16] sm:$0xf] %vm3854_vm15, %v3850_v57 }
 0x8f0 PF: > { %s32_s23 = sadd.s32 1, %s4458_s23  }
 0x8f1   : > { %p29_p4 = scmp.ge.s32.totalorder %s32_s23, 4  }
 0x8f3   :  { %31 = sbr.rel (!%p29_p4) target bundleno = 6 (0x6), region = 152 }

</bundles_post_ra>
